<compile_context>
chip_gen: v7x
topology: tpu7x:2x2x1
jax: 0.10.0
libtpu: 0.0.40
codegen_flags: <defaults>
</compile_context>

<pallas_src>
import jax
import jax.numpy as jnp
from jax.experimental import pallas as pl
from jax.experimental.pallas import tpu as pltpu

IN_FEATURES = 3072     # 3 * 32 * 32
HIDDEN = 512
OUT_FEATURES = 10
OUT_PAD = 128          # lane-dense padded output width (matches 128-wide MXU)
MAX_TILE_B = 1024      # keep under v7x's 64 MiB physical VMEM


def mlp_kernel(x_ref, w1_ref, b1_ref, w2_ref, b2_ref,
               w3_ref, b3_ref, w4_ref, b4_ref, o_ref, h_ref):
    # Cast x to bf16 in-kernel (no-op if the caller already supplies bf16).
    x = x_ref[...].astype(jnp.bfloat16)

    # Layer 1: (TILE_B, 3072) bf16 @ (3072, 512) bf16 -> f32 accumulate on MXU.
    h = jnp.dot(x, w1_ref[...], preferred_element_type=jnp.float32)
    # Bias + ReLU in f32 on the VPU, store hidden activation as bf16.
    h_ref[...] = jnp.maximum(h + b1_ref[...], 0.0).astype(jnp.bfloat16)

    # Layer 2 (dropout = identity in eval mode).
    h = jnp.dot(h_ref[...], w2_ref[...], preferred_element_type=jnp.float32)
    h_ref[...] = jnp.maximum(h + b2_ref[...], 0.0).astype(jnp.bfloat16)

    # Layer 3.
    h = jnp.dot(h_ref[...], w3_ref[...], preferred_element_type=jnp.float32)
    h_ref[...] = jnp.maximum(h + b3_ref[...], 0.0).astype(jnp.bfloat16)

    # Layer 4 -> lane-dense 128-wide (zero-padded) output block.
    out = jnp.dot(h_ref[...], w4_ref[...], preferred_element_type=jnp.float32)
    o_ref[...] = (out + b4_ref[...]).astype(o_ref.dtype)


def _round_up(n, m):
    return ((n + m - 1) // m) * m


def _default_tile_b():
    try:
        kind = jax.devices()[0].device_kind.lower()
    except Exception:
        kind = ""
    if "v6" in kind:
        return 1024   # v6e: 128 MiB VMEM, amortize per-step pipeline overhead
    return 512        # v5e: already compute-bound; v7x: respect 64 MiB VMEM


def prepare_params(params):
    """One-time, per-model weight preparation (hoisted out of the forward pass):
    bf16 weights for the MXU, fc4 zero-padded from 10 to 128 output lanes."""
    w1, b1, w2, b2, w3, b3, w4, b4 = params
    w1b = w1.astype(jnp.bfloat16)
    w2b = w2.astype(jnp.bfloat16)
    w3b = w3.astype(jnp.bfloat16)
    w4p = jnp.zeros((HIDDEN, OUT_PAD), jnp.bfloat16).at[:, :OUT_FEATURES].set(
        w4.astype(jnp.bfloat16))
    b4p = jnp.zeros((1, OUT_PAD), jnp.float32).at[:, :OUT_FEATURES].set(
        b4.reshape(1, OUT_FEATURES).astype(jnp.float32))
    b1 = b1.reshape(1, HIDDEN).astype(jnp.float32)
    b2 = b2.reshape(1, HIDDEN).astype(jnp.float32)
    b3 = b3.reshape(1, HIDDEN).astype(jnp.float32)
    return (w1b, b1, w2b, b2, w3b, b3, w4p, b4p)


def mod3_forward(x_nchw, prepared_params, *, tile_b=None):
    """x_nchw: (B, 3, 32, 32) float32 (or bfloat16). Returns (B, 10) f32 logits."""
    B = x_nchw.shape[0]
    x2d = x_nchw.reshape(B, -1)
    assert x2d.shape[1] == IN_FEATURES
    if x2d.dtype != jnp.bfloat16:
        x2d = x2d.astype(jnp.float32)   # kernel casts to bf16 in VMEM

    w1b, b1, w2b, b2, w3b, b3, w4p, b4p = prepared_params

    if tile_b is None:
        tile_b = _default_tile_b()

    # Batch tile: multiple of 16 (bf16 sublane packing for the scratch), capped.
    b16 = _round_up(B, 16)
    tb = min(_round_up(max(int(tile_b), 16), 16), MAX_TILE_B, b16)
    # Ensure >= 2 grid steps when the batch allows it so the "parallel" axis
    # actually shards across v7x's two TensorCores.
    if b16 >= 32:
        tb = min(tb, _round_up(pl.cdiv(b16, 2), 16))

    b_padded = _round_up(B, tb)
    if b_padded != B:
        x2d = jnp.pad(x2d, ((0, b_padded - B), (0, 0)))

    grid = (b_padded // tb,)

    def resident(shape):
        # Weight/bias blocks: constant index_map -> DMA'd once, stay resident
        # in VMEM across all batch tiles.
        return pl.BlockSpec(shape, lambda i: (0, 0))

    out = pl.pallas_call(
        mlp_kernel,
        out_shape=jax.ShapeDtypeStruct((b_padded, OUT_PAD), jnp.float32),
        grid=grid,
        in_specs=[
            pl.BlockSpec((tb, IN_FEATURES), lambda i: (i, 0)),        # x batch tile
            resident((IN_FEATURES, HIDDEN)), resident((1, HIDDEN)),   # fc1
            resident((HIDDEN, HIDDEN)),      resident((1, HIDDEN)),   # fc2
            resident((HIDDEN, HIDDEN)),      resident((1, HIDDEN)),   # fc3
            resident((HIDDEN, OUT_PAD)),     resident((1, OUT_PAD)),  # fc4 (padded)
        ],
        out_specs=pl.BlockSpec((tb, OUT_PAD), lambda i: (i, 0)),
        scratch_shapes=[pltpu.VMEM((tb, HIDDEN), jnp.bfloat16)],      # bf16 hidden
        compiler_params=pltpu.CompilerParams(
            dimension_semantics=("parallel",),   # megacore sharding on v7x
            vmem_limit_bytes=48 << 20,           # fits all tile choices, < 64 MiB
        ),
    )(x2d, w1b, b1, w2b, b2, w3b, b3, w4p, b4p)

    return out[:B, :OUT_FEATURES]


def init_linear(key, fan_in, fan_out):
    """Deterministic init mimicking nn.Linear's uniform(-1/sqrt(fan_in), +1/sqrt(fan_in)).
    Returns (W_T, b) with W_T of shape (fan_in, fan_out), b of shape (1, fan_out)."""
    kw, kb = jax.random.split(key)
    bound = 1.0 / jnp.sqrt(jnp.float32(fan_in))
    w = jax.random.uniform(kw, (fan_in, fan_out), jnp.float32, -bound, bound)
    b = jax.random.uniform(kb, (1, fan_out), jnp.float32, -bound, bound)
    return w, b


def make_params(key):
    k1, k2, k3, k4 = jax.random.split(key, 4)
    w1, b1 = init_linear(k1, IN_FEATURES, HIDDEN)
    w2, b2 = init_linear(k2, HIDDEN, HIDDEN)
    w3, b3 = init_linear(k3, HIDDEN, HIDDEN)
    w4, b4 = init_linear(k4, HIDDEN, OUT_FEATURES)
    return (w1, b1, w2, b2, w3, b3, w4, b4)


def reference_forward(x_nchw, params):
    """Pure-JAX f32 reference of the same forward (eval-mode dropout)."""
    w1, b1, w2, b2, w3, b3, w4, b4 = params
    x = x_nchw.reshape(x_nchw.shape[0], -1)
    h = jnp.maximum(x @ w1 + b1, 0.0)
    h = jnp.maximum(h @ w2 + b2, 0.0)
    h = jnp.maximum(h @ w3 + b3, 0.0)
    return h @ w4 + b4


if __name__ == "__main__":
    key = jax.random.PRNGKey(0)
    kx, kp = jax.random.split(key)

    # Input consistent with fc1's in_features = 3072 = 3*32*32 (CIFAR-10-like).
    # B chosen not to be a multiple of the batch tile to exercise padding.
    B = 12
    x = jax.random.normal(kx, (B, 3, 32, 32), dtype=jnp.float32)

    params = make_params(kp)            # f32 "model" parameters
    prepped = prepare_params(params)    # one-time cast/pad, hoisted out of forward

    out = mod3_forward(x, prepped)
    out = jax.block_until_ready(out)

    ref = reference_forward(x, params)
    assert out.shape == (B, OUT_FEATURES), out.shape
    # bf16 weights + bf16 hidden activations (f32 accumulation) vs f32 reference.
    assert jnp.allclose(out, ref, atol=8e-2, rtol=8e-2), "mismatch vs JAX reference"

    print("KERNEL_OK")
</pallas_src>

<mosaic_0001>
module attributes {stable_mosaic.version = 11 : i64} {
  func.func @mlp_kernel(%arg0: i32, %arg1: memref<16x3072xf32, #tpu.memory_space<vmem>>, %arg2: memref<3072x512xbf16, #tpu.memory_space<vmem>>, %arg3: memref<1x512xf32, #tpu.memory_space<vmem>>, %arg4: memref<512x512xbf16, #tpu.memory_space<vmem>>, %arg5: memref<1x512xf32, #tpu.memory_space<vmem>>, %arg6: memref<512x512xbf16, #tpu.memory_space<vmem>>, %arg7: memref<1x512xf32, #tpu.memory_space<vmem>>, %arg8: memref<512x128xbf16, #tpu.memory_space<vmem>>, %arg9: memref<1x128xf32, #tpu.memory_space<vmem>>, %arg10: memref<16x128xf32, #tpu.memory_space<vmem>>, %arg11: memref<16x512xbf16, #tpu.memory_space<vmem>>) attributes {dimension_semantics = [#tpu.dimension_semantics<parallel>], iteration_bounds = array<i64: 1>, scalar_prefetch = 0 : i64, scratch_operands = 1 : i64, tpu.core_type = #tpu.core_type<tc>, window_params = [{transform_indices = @transform_0, window_bounds = array<i64: 16, 3072>}, {pipeline_mode = #tpu.pipeline_mode<synchronous>, transform_indices = @transform_1, window_bounds = array<i64: 3072, 512>}, {pipeline_mode = #tpu.pipeline_mode<synchronous>, transform_indices = @transform_2, window_bounds = array<i64: 1, 512>}, {pipeline_mode = #tpu.pipeline_mode<synchronous>, transform_indices = @transform_3, window_bounds = array<i64: 512, 512>}, {pipeline_mode = #tpu.pipeline_mode<synchronous>, transform_indices = @transform_4, window_bounds = array<i64: 1, 512>}, {pipeline_mode = #tpu.pipeline_mode<synchronous>, transform_indices = @transform_5, window_bounds = array<i64: 512, 512>}, {pipeline_mode = #tpu.pipeline_mode<synchronous>, transform_indices = @transform_6, window_bounds = array<i64: 1, 512>}, {pipeline_mode = #tpu.pipeline_mode<synchronous>, transform_indices = @transform_7, window_bounds = array<i64: 512, 128>}, {pipeline_mode = #tpu.pipeline_mode<synchronous>, transform_indices = @transform_8, window_bounds = array<i64: 1, 128>}, {transform_indices = @transform_9, window_bounds = array<i64: 16, 128>}]} {
    %c0 = arith.constant 0 : index
    %c0_0 = arith.constant 0 : index
    %0 = vector.load %arg1[%c0, %c0_0] : memref<16x3072xf32, #tpu.memory_space<vmem>>, vector<16x3072xf32>
    %1 = arith.truncf %0 : vector<16x3072xf32> to vector<16x3072xbf16>
    %c0_1 = arith.constant 0 : index
    %c0_2 = arith.constant 0 : index
    %2 = vector.load %arg2[%c0_1, %c0_2] : memref<3072x512xbf16, #tpu.memory_space<vmem>>, vector<3072x512xbf16>
    %cst = arith.constant dense<0.000000e+00> : vector<16x512xf32>
    %3 = tpu.matmul %1, %2, %cst {dimension_numbers = #tpu.dot_dimension_numbers<[1], [0], [0], [1], [0, 0, 1, 1], [], []>} : vector<16x3072xbf16>, vector<3072x512xbf16>, vector<16x512xf32> -> vector<16x512xf32>
    %c0_3 = arith.constant 0 : index
    %c0_4 = arith.constant 0 : index
    %4 = vector.load %arg3[%c0_3, %c0_4] : memref<1x512xf32, #tpu.memory_space<vmem>>, vector<1x512xf32>
    %5 = vector.broadcast %4 : vector<1x512xf32> to vector<16x512xf32>
    %6 = arith.addf %3, %5 : vector<16x512xf32>
    %cst_5 = arith.constant 0.000000e+00 : f32
    %7 = vector.broadcast %cst_5 : f32 to vector<16x512xf32>
    %8 = arith.maximumf %6, %7 : vector<16x512xf32>
    %9 = arith.truncf %8 : vector<16x512xf32> to vector<16x512xbf16>
    %c0_6 = arith.constant 0 : index
    %c0_7 = arith.constant 0 : index
    %10 = vector.load %arg11[%c0_6, %c0_7] : memref<16x512xbf16, #tpu.memory_space<vmem>>, vector<16x512xbf16>
    tpu.vector_store %arg11[%c0_6, %c0_7], %9 {strides = array<i32>} : memref<16x512xbf16, #tpu.memory_space<vmem>>, vector<16x512xbf16>,
    %c0_8 = arith.constant 0 : index
    %c0_9 = arith.constant 0 : index
    %11 = vector.load %arg11[%c0_8, %c0_9] : memref<16x512xbf16, #tpu.memory_space<vmem>>, vector<16x512xbf16>
    %c0_10 = arith.constant 0 : index
    %c0_11 = arith.constant 0 : index
    %12 = vector.load %arg4[%c0_10, %c0_11] : memref<512x512xbf16, #tpu.memory_space<vmem>>, vector<512x512xbf16>
    %cst_12 = arith.constant dense<0.000000e+00> : vector<16x512xf32>
    %13 = tpu.matmul %11, %12, %cst_12 {dimension_numbers = #tpu.dot_dimension_numbers<[1], [0], [0], [1], [0, 0, 1, 1], [], []>} : vector<16x512xbf16>, vector<512x512xbf16>, vector<16x512xf32> -> vector<16x512xf32>
    %c0_13 = arith.constant 0 : index
    %c0_14 = arith.constant 0 : index
    %14 = vector.load %arg5[%c0_13, %c0_14] : memref<1x512xf32, #tpu.memory_space<vmem>>, vector<1x512xf32>
    %15 = vector.broadcast %14 : vector<1x512xf32> to vector<16x512xf32>
    %16 = arith.addf %13, %15 : vector<16x512xf32>
    %cst_15 = arith.constant 0.000000e+00 : f32
    %17 = vector.broadcast %cst_15 : f32 to vector<16x512xf32>
    %18 = arith.maximumf %16, %17 : vector<16x512xf32>
    %19 = arith.truncf %18 : vector<16x512xf32> to vector<16x512xbf16>
    %c0_16 = arith.constant 0 : index
    %c0_17 = arith.constant 0 : index
    %20 = vector.load %arg11[%c0_16, %c0_17] : memref<16x512xbf16, #tpu.memory_space<vmem>>, vector<16x512xbf16>
    tpu.vector_store %arg11[%c0_16, %c0_17], %19 {strides = array<i32>} : memref<16x512xbf16, #tpu.memory_space<vmem>>, vector<16x512xbf16>,
    %c0_18 = arith.constant 0 : index
    %c0_19 = arith.constant 0 : index
    %21 = vector.load %arg11[%c0_18, %c0_19] : memref<16x512xbf16, #tpu.memory_space<vmem>>, vector<16x512xbf16>
    %c0_20 = arith.constant 0 : index
    %c0_21 = arith.constant 0 : index
    %22 = vector.load %arg6[%c0_20, %c0_21] : memref<512x512xbf16, #tpu.memory_space<vmem>>, vector<512x512xbf16>
    %cst_22 = arith.constant dense<0.000000e+00> : vector<16x512xf32>
    %23 = tpu.matmul %21, %22, %cst_22 {dimension_numbers = #tpu.dot_dimension_numbers<[1], [0], [0], [1], [0, 0, 1, 1], [], []>} : vector<16x512xbf16>, vector<512x512xbf16>, vector<16x512xf32> -> vector<16x512xf32>
    %c0_23 = arith.constant 0 : index
    %c0_24 = arith.constant 0 : index
    %24 = vector.load %arg7[%c0_23, %c0_24] : memref<1x512xf32, #tpu.memory_space<vmem>>, vector<1x512xf32>
    %25 = vector.broadcast %24 : vector<1x512xf32> to vector<16x512xf32>
    %26 = arith.addf %23, %25 : vector<16x512xf32>
    %cst_25 = arith.constant 0.000000e+00 : f32
    %27 = vector.broadcast %cst_25 : f32 to vector<16x512xf32>
    %28 = arith.maximumf %26, %27 : vector<16x512xf32>
    %29 = arith.truncf %28 : vector<16x512xf32> to vector<16x512xbf16>
    %c0_26 = arith.constant 0 : index
    %c0_27 = arith.constant 0 : index
    %30 = vector.load %arg11[%c0_26, %c0_27] : memref<16x512xbf16, #tpu.memory_space<vmem>>, vector<16x512xbf16>
    tpu.vector_store %arg11[%c0_26, %c0_27], %29 {strides = array<i32>} : memref<16x512xbf16, #tpu.memory_space<vmem>>, vector<16x512xbf16>,
    %c0_28 = arith.constant 0 : index
    %c0_29 = arith.constant 0 : index
    %31 = vector.load %arg11[%c0_28, %c0_29] : memref<16x512xbf16, #tpu.memory_space<vmem>>, vector<16x512xbf16>
    %c0_30 = arith.constant 0 : index
    %c0_31 = arith.constant 0 : index
    %32 = vector.load %arg8[%c0_30, %c0_31] : memref<512x128xbf16, #tpu.memory_space<vmem>>, vector<512x128xbf16>
    %cst_32 = arith.constant dense<0.000000e+00> : vector<16x128xf32>
    %33 = tpu.matmul %31, %32, %cst_32 {dimension_numbers = #tpu.dot_dimension_numbers<[1], [0], [0], [1], [0, 0, 1, 1], [], []>} : vector<16x512xbf16>, vector<512x128xbf16>, vector<16x128xf32> -> vector<16x128xf32>
    %c0_33 = arith.constant 0 : index
    %c0_34 = arith.constant 0 : index
    %34 = vector.load %arg9[%c0_33, %c0_34] : memref<1x128xf32, #tpu.memory_space<vmem>>, vector<1x128xf32>
    %35 = vector.broadcast %34 : vector<1x128xf32> to vector<16x128xf32>
    %36 = arith.addf %33, %35 : vector<16x128xf32>
    %c0_35 = arith.constant 0 : index
    %c0_36 = arith.constant 0 : index
    %37 = vector.load %arg10[%c0_35, %c0_36] : memref<16x128xf32, #tpu.memory_space<vmem>>, vector<16x128xf32>
    tpu.vector_store %arg10[%c0_35, %c0_36], %36 {strides = array<i32>} : memref<16x128xf32, #tpu.memory_space<vmem>>, vector<16x128xf32>,
    return
  }
  func.func @transform_0(%arg0: i32) -> (i32, i32) {
    %c0_i32 = arith.constant 0 : i32
    %c0_i32_0 = arith.constant 0 : i32
    return %arg0, %c0_i32 : i32, i32
  }
  func.func @transform_1(%arg0: i32) -> (i32, i32) {
    %c0_i32 = arith.constant 0 : i32
    %c0_i32_0 = arith.constant 0 : i32
    %c0_i32_1 = arith.constant 0 : i32
    return %c0_i32, %c0_i32_0 : i32, i32
  }
  func.func @transform_2(%arg0: i32) -> (i32, i32) {
    %c0_i32 = arith.constant 0 : i32
    %c0_i32_0 = arith.constant 0 : i32
    %c0_i32_1 = arith.constant 0 : i32
    return %c0_i32, %c0_i32_0 : i32, i32
  }
  func.func @transform_3(%arg0: i32) -> (i32, i32) {
    %c0_i32 = arith.constant 0 : i32
    %c0_i32_0 = arith.constant 0 : i32
    %c0_i32_1 = arith.constant 0 : i32
    return %c0_i32, %c0_i32_0 : i32, i32
  }
  func.func @transform_4(%arg0: i32) -> (i32, i32) {
    %c0_i32 = arith.constant 0 : i32
    %c0_i32_0 = arith.constant 0 : i32
    %c0_i32_1 = arith.constant 0 : i32
    return %c0_i32, %c0_i32_0 : i32, i32
  }
  func.func @transform_5(%arg0: i32) -> (i32, i32) {
    %c0_i32 = arith.constant 0 : i32
    %c0_i32_0 = arith.constant 0 : i32
    %c0_i32_1 = arith.constant 0 : i32
    return %c0_i32, %c0_i32_0 : i32, i32
  }
  func.func @transform_6(%arg0: i32) -> (i32, i32) {
    %c0_i32 = arith.constant 0 : i32
    %c0_i32_0 = arith.constant 0 : i32
    %c0_i32_1 = arith.constant 0 : i32
    return %c0_i32, %c0_i32_0 : i32, i32
  }
  func.func @transform_7(%arg0: i32) -> (i32, i32) {
    %c0_i32 = arith.constant 0 : i32
    %c0_i32_0 = arith.constant 0 : i32
    %c0_i32_1 = arith.constant 0 : i32
    return %c0_i32, %c0_i32_0 : i32, i32
  }
  func.func @transform_8(%arg0: i32) -> (i32, i32) {
    %c0_i32 = arith.constant 0 : i32
    %c0_i32_0 = arith.constant 0 : i32
    %c0_i32_1 = arith.constant 0 : i32
    return %c0_i32, %c0_i32_0 : i32, i32
  }
  func.func @transform_9(%arg0: i32) -> (i32, i32) {
    %c0_i32 = arith.constant 0 : i32
    %c0_i32_0 = arith.constant 0 : i32
    return %arg0, %c0_i32 : i32, i32
  }
}

</mosaic_0001>

<bundles_post_ra>
// kernel: tpu_custom_call.1
= control target key start
LH: loop header
LB: loop body
LE: loop exit
PB: predicated region body
PF: predicated region fallthrough
CT: control target
= control target key end

     0   :  { %14 = vsyncpa [#allocation4], 0  ;;  %s11506_s0 = inlined_call_operand.hbm [shape: f32[16,3072], index: 0, kind: input, shape index: {}]   ;;  %s11507_s1 = inlined_call_operand.hbm [shape: bf16[3072,512], index: 1, kind: input, shape index: {}]   ;;  %s11508_s2 = inlined_call_operand.hbm [shape: f32[1,512], index: 2, kind: input, shape index: {}]   ;;  %s11509_s3 = inlined_call_operand.hbm [shape: bf16[512,512], index: 3, kind: input, shape index: {}]   ;;  %s11510_s4 = inlined_call_operand.hbm [shape: f32[1,512], index: 4, kind: input, shape index: {}]   ;;  %s11511_s5 = inlined_call_operand.hbm [shape: bf16[512,512], index: 5, kind: input, shape index: {}]   ;;  %s11512_s6 = inlined_call_operand.hbm [shape: f32[1,512], index: 6, kind: input, shape index: {}]   ;;  %s11513_s7 = inlined_call_operand.hbm [shape: bf16[512,128], index: 7, kind: input, shape index: {}]   ;;  %s11514_s8 = inlined_call_operand.hbm [shape: f32[1,128], index: 8, kind: input, shape index: {}]   ;;  %s11515_s9 = inlined_call_operand.hbm [shape: f32[16,128], index: 9, kind: output, shape index: {}]  }
   0x1   :  { %15 = vsyncpa [#allocation7], 0 }
   0x2   :  { %16 = vsyncpa [#allocation10], 0 }
   0x3   :  { %17 = vsyncpa [#allocation13], 0 }
   0x4   :  { %18 = vsyncpa [#allocation16], 0 }
   0x5   :  { %19 = vsyncpa [#allocation5], 0  ;;  %s11281_s30 = smov [#allocation6]   ;;  %s11049_s13 = scalar_lea.hbm %s11507_s1, 98304 }
   0x6   :  { %s37_s10 = sshll.u32 %s11281_s30, 4  ;;  %p11050_p0 = scmp.ne.s32.totalorder %s11507_s1, %s11049_s13  ;;  %s38_s10 = int_to_ptr.vmem [resolvable:$true] %s37_s10 }
   0x7   :  { %p11053_p1 = scmp.lt.u32.totalorder %s11049_s13, %s11507_s1 }
   0x9   :  { %p11055_p2 = pnand %p11053_p1, %p11050_p0 }
   0xb   :  { %11058 = shalt.err (!%p11055_p2)
}
   0xc   :  { %s11059_s18 = scalar_lea.vmem %s38_s10, 98304  ;;  %p11064_p4 = scmp.lt.s32.totalorder %s38_s10, %s38_s10 }
   0xd   :  { %p11060_p3 = scmp.ne.s32.totalorder %s38_s10, %s11059_s18  ;;  %p11065_p5 = scmp.lt.s32.totalorder %s11059_s18, %s11059_s18 }
   0xf   :  { %p11066_p6 = por %p11065_p5, %p11064_p4 }
  0x11   :  { %p11067_p7 = pnand %p11066_p6, %p11060_p3 }
  0x13   :  { %11070 = shalt.err (!%p11067_p7)
}
  0x14   :  { %s11282_s19 = smov 256   ;;  %s11283_s20 = smov 16  }
  0x15   :  { %43 = dma.hbm_to_vmem [thread:$0]  %s11507_s1, 98304, %s38_s10, [#allocation7], %s11282_s19, %s11282_s19, %s11283_s20  }
  0x16   :  { %s11284_s23 = smov [#allocation9]   ;;  %s11285_s25 = smov [#allocation12]  }
  0x17   :  { %s59_s24 = sshll.u32 %s11284_s23, 4  ;;  %s81_s26 = sshll.u32 %s11285_s25, 4  ;;  %s60_s24 = int_to_ptr.vmem [resolvable:$true] %s59_s24  ;;  %s82_s26 = int_to_ptr.vmem [resolvable:$true] %s81_s26 }
  0x18   :  { %s11071_s29 = scalar_lea.hbm %s11509_s3, 16384 }
  0x19   :  { %p11072_p8 = scmp.ne.s32.totalorder %s11509_s3, %s11071_s29  ;;  %p11075_p9 = scmp.lt.u32.totalorder %s11071_s29, %s11509_s3 }
  0x1b   :  { %p11077_p10 = pnand %p11075_p9, %p11072_p8 }
  0x1d   :  { %11080 = shalt.err (!%p11077_p10)
}
  0x1e   :  { %s11081_s1 = scalar_lea.vmem %s60_s24, 16384  ;;  %p11086_p12 = scmp.lt.s32.totalorder %s60_s24, %s60_s24 }
  0x1f   :  { %p11082_p11 = scmp.ne.s32.totalorder %s60_s24, %s11081_s1  ;;  %p11087_p13 = scmp.lt.s32.totalorder %s11081_s1, %s11081_s1 }
  0x21   :  { %p11088_p0 = por %p11087_p13, %p11086_p12 }
  0x23   :  { %p11089_p1 = pnand %p11088_p0, %p11082_p11 }
  0x25   :  { %11092 = shalt.err (!%p11089_p1)
}
  0x26   :  { %65 = dma.hbm_to_vmem [thread:$0]  %s11509_s3, 16384, %s60_s24, [#allocation10], %s11282_s19, %s11282_s19, %s11283_s20  }
  0x27   :  { %s11093_s17 = scalar_lea.hbm %s11511_s5, 16384 }
  0x28   :  { %p11094_p2 = scmp.ne.s32.totalorder %s11511_s5, %s11093_s17  ;;  %p11097_p3 = scmp.lt.u32.totalorder %s11093_s17, %s11511_s5 }
  0x2a   :  { %p11099_p4 = pnand %p11097_p3, %p11094_p2 }
  0x2c   :  { %11102 = shalt.err (!%p11099_p4)
}
  0x2d   :  { %s11103_s25 = scalar_lea.vmem %s82_s26, 16384  ;;  %p11108_p6 = scmp.lt.s32.totalorder %s82_s26, %s82_s26 }
  0x2e   :  { %p11104_p5 = scmp.ne.s32.totalorder %s82_s26, %s11103_s25  ;;  %p11109_p7 = scmp.lt.s32.totalorder %s11103_s25, %s11103_s25 }
  0x30   :  { %p11110_p8 = por %p11109_p7, %p11108_p6 }
  0x32   :  { %p11111_p9 = pnand %p11110_p8, %p11104_p5 }
  0x34   :  { %11114 = shalt.err (!%p11111_p9)
}
  0x35   :  { %87 = dma.hbm_to_vmem [thread:$0]  %s11511_s5, 16384, %s82_s26, [#allocation13], %s11282_s19, %s11282_s19, %s11283_s20  }
  0x36   :  { %s11286_s27 = smov [#allocation15]   ;;  %s11115_s11 = scalar_lea.hbm %s11513_s7, 4096 }
  0x37   :  { %s103_s28 = sshll.u32 %s11286_s27, 4  ;;  %p11116_p10 = scmp.ne.s32.totalorder %s11513_s7, %s11115_s11  ;;  %s104_s28 = int_to_ptr.vmem [resolvable:$true] %s103_s28 }
  0x38   :  { %p11119_p11 = scmp.lt.u32.totalorder %s11115_s11, %s11513_s7 }
  0x3a   :  { %p11121_p12 = pnand %p11119_p11, %p11116_p10 }
  0x3c   :  { %11124 = shalt.err (!%p11121_p12)
}
  0x3d   :  { %s11125_s14 = scalar_lea.vmem %s104_s28, 4096  ;;  %p11130_p0 = scmp.lt.s32.totalorder %s104_s28, %s104_s28 }
  0x3e   :  { %p11126_p13 = scmp.ne.s32.totalorder %s104_s28, %s11125_s14  ;;  %p11131_p1 = scmp.lt.s32.totalorder %s11125_s14, %s11125_s14 }
  0x40   :  { %p11132_p2 = por %p11131_p1, %p11130_p0 }
  0x42   :  { %p11133_p3 = pnand %p11132_p2, %p11126_p13 }
  0x44   :  { %11136 = shalt.err (!%p11133_p3)
}
  0x45   :  { %s11287_s5 = smov 64   ;;  %s11288_s19 = smov 4  }
  0x46   :  { %109 = dma.hbm_to_vmem [thread:$0]  %s11513_s7, 4096, %s104_s28, [#allocation16], %s11287_s5, %s11287_s5, %s11288_s19  }
  0x47   :  { %s11289_s15 = smov [#allocation3]   ;;  %s11137_s21 = scalar_lea.hbm %s11506_s0, 6144 }
  0x48   :  { %s25_s16 = sshll.u32 %s11289_s15, 4  ;;  %p11138_p4 = scmp.ne.s32.totalorder %s11506_s0, %s11137_s21  ;;  %s26_s16 = int_to_ptr.vmem [resolvable:$true] %s25_s16 }
  0x49   :  { %p11141_p5 = scmp.lt.u32.totalorder %s11137_s21, %s11506_s0 }
  0x4b   :  { %p11143_p6 = pnand %p11141_p5, %p11138_p4 }
  0x4d   :  { %11146 = shalt.err (!%p11143_p6)
}
  0x4e   :  { %s11147_s24 = scalar_lea.vmem %s26_s16, 6144  ;;  %p11152_p8 = scmp.lt.s32.totalorder %s26_s16, %s26_s16 }
  0x4f   :  { %p11148_p7 = scmp.ne.s32.totalorder %s26_s16, %s11147_s24  ;;  %p11153_p9 = scmp.lt.s32.totalorder %s11147_s24, %s11147_s24 }
  0x51   :  { %p11154_p10 = por %p11153_p9, %p11152_p8 }
  0x53   :  { %p11155_p11 = pnand %p11154_p10, %p11148_p7 }
  0x55   :  { %11158 = shalt.err (!%p11155_p11)
}
  0x56   :  { %s11290_s7 = smov 3072   ;;  %s11291_s27 = smov 192  }
  0x57   :  { %31 = dma.hbm_to_vmem [thread:$0]  %s11506_s0, 6144, %s26_s16, [#allocation4], %s11290_s7, %s11290_s7, %s11291_s27  }
  0x58   :  { %s11292_s30 = smov [#allocation8]   ;;  %s11293_s12 = smov [#allocation11]  }
  0x59   :  { %s50_s11 = sshll.u32 %s11292_s30, 4  ;;  %s72_s13 = sshll.u32 %s11293_s12, 4  ;;  %s51_s11 = int_to_ptr.vmem [resolvable:$true] %s50_s11  ;;  %s73_s13 = int_to_ptr.vmem [resolvable:$true] %s72_s13 }
  0x5a   :  { %s11159_s14 = scalar_lea.hbm %s11508_s2, 64 }
  0x5b   :  { %p11160_p12 = scmp.ne.s32.totalorder %s11508_s2, %s11159_s14  ;;  %p11163_p13 = scmp.lt.u32.totalorder %s11159_s14, %s11508_s2 }
  0x5d   :  { %p11165_p0 = pnand %p11163_p13, %p11160_p12 }
  0x5f   :  { %11168 = shalt.err (!%p11165_p0)
}
  0x60   :  { %s11169_s0 = scalar_lea.vmem %s51_s11, 64  ;;  %p11174_p2 = scmp.lt.s32.totalorder %s51_s11, %s51_s11 }
  0x61   :  { %p11170_p1 = scmp.ne.s32.totalorder %s51_s11, %s11169_s0  ;;  %p11175_p3 = scmp.lt.s32.totalorder %s11169_s0, %s11169_s0 }
  0x63   :  { %p11176_p4 = por %p11175_p3, %p11174_p2 }
  0x65   :  { %p11177_p5 = pnand %p11176_p4, %p11170_p1 }
  0x67   :  { %11180 = shalt.err (!%p11177_p5)
}
  0x68   :  { %53 = dma.hbm_to_vmem [thread:$0]  %s11508_s2, 64, %s51_s11, [#allocation7]  }
  0x69   :  { %s11181_s21 = scalar_lea.hbm %s11510_s4, 64 }
  0x6a   :  { %p11182_p6 = scmp.ne.s32.totalorder %s11510_s4, %s11181_s21  ;;  %p11185_p7 = scmp.lt.u32.totalorder %s11181_s21, %s11510_s4 }
  0x6c   :  { %p11187_p8 = pnand %p11185_p7, %p11182_p6 }
  0x6e   :  { %11190 = shalt.err (!%p11187_p8)
}
  0x6f   :  { %s11191_s24 = scalar_lea.vmem %s73_s13, 64  ;;  %p11196_p10 = scmp.lt.s32.totalorder %s73_s13, %s73_s13 }
  0x70   :  { %p11192_p9 = scmp.ne.s32.totalorder %s73_s13, %s11191_s24  ;;  %p11197_p11 = scmp.lt.s32.totalorder %s11191_s24, %s11191_s24 }
  0x72   :  { %p11198_p12 = por %p11197_p11, %p11196_p10 }
  0x74   :  { %p11199_p13 = pnand %p11198_p12, %p11192_p9 }
  0x76   :  { %11202 = shalt.err (!%p11199_p13)
}
  0x77   :  { %75 = dma.hbm_to_vmem [thread:$0]  %s11510_s4, 64, %s73_s13, [#allocation10]  }
  0x78   :  { %s11294_s27 = smov [#allocation14]   ;;  %s11295_s29 = smov [#allocation17]  }
  0x79   :  { %s94_s28 = sshll.u32 %s11294_s27, 4  ;;  %s116_s30 = sshll.u32 %s11295_s29, 4  ;;  %s95_s28 = int_to_ptr.vmem [resolvable:$true] %s94_s28  ;;  %s117_s30 = int_to_ptr.vmem [resolvable:$true] %s116_s30 }
  0x7a   :  { %s11203_s1 = scalar_lea.hbm %s11512_s6, 64 }
  0x7b   :  { %p11204_p0 = scmp.ne.s32.totalorder %s11512_s6, %s11203_s1  ;;  %p11207_p1 = scmp.lt.u32.totalorder %s11203_s1, %s11512_s6 }
  0x7d   :  { %p11209_p2 = pnand %p11207_p1, %p11204_p0 }
  0x7f   :  { %11212 = shalt.err (!%p11209_p2)
}
  0x80   :  { %s11213_s4 = scalar_lea.vmem %s95_s28, 64  ;;  %p11218_p4 = scmp.lt.s32.totalorder %s95_s28, %s95_s28 }
  0x81   :  { %p11214_p3 = scmp.ne.s32.totalorder %s95_s28, %s11213_s4  ;;  %p11219_p5 = scmp.lt.s32.totalorder %s11213_s4, %s11213_s4 }
  0x83   :  { %p11220_p6 = por %p11219_p5, %p11218_p4 }
  0x85   :  { %p11221_p7 = pnand %p11220_p6, %p11214_p3 }
  0x87   :  { %11224 = shalt.err (!%p11221_p7)
}
  0x88   :  { %97 = dma.hbm_to_vmem [thread:$0]  %s11512_s6, 64, %s95_s28, [#allocation13]  }
  0x89   :  { %s11225_s15 = scalar_lea.hbm %s11514_s8, 16 }
  0x8a   :  { %p11226_p8 = scmp.ne.s32.totalorder %s11514_s8, %s11225_s15  ;;  %p11229_p9 = scmp.lt.u32.totalorder %s11225_s15, %s11514_s8 }
  0x8c   :  { %p11231_p10 = pnand %p11229_p9, %p11226_p8 }
  0x8e   :  { %11234 = shalt.err (!%p11231_p10)
}
  0x8f   :  { %s11235_s22 = scalar_lea.vmem %s117_s30, 16  ;;  %s11239_s23 = scalar_lea.vmem %s117_s30, 32 }
  0x90   :  { %p11236_p11 = scmp.ne.s32.totalorder %s117_s30, %s11235_s22  ;;  %p11240_p12 = scmp.lt.s32.totalorder %s117_s30, %s117_s30 }
  0x91   :  { %p11241_p13 = scmp.lt.s32.totalorder %s11239_s23, %s11235_s22 }
  0x93   :  { %p11242_p0 = por %p11241_p13, %p11240_p12 }
  0x95   :  { %p11243_p1 = pnand %p11242_p0, %p11236_p11 }
  0x97   :  { %11246 = shalt.err (!%p11243_p1)
}
  0x98   :  { %119 = dma.hbm_to_vmem [thread:$0]  %s11514_s8, 16, %s117_s30, [#allocation16]  }
  0x99   :  { %11269 = dma.done.wait [#allocation4], 6144  }
  0x9a   :  { %11270 = vsyncadd [#allocation4], 4294961152 }
  0x9b   :  { %11271 = dma.done.wait [#allocation7], 98368  }
  0x9c   :  { %11272 = vsyncadd [#allocation7], 4294868928 }
  0x9d   :  { %11273 = dma.done.wait [#allocation10], 16448  }
  0x9e   :  { %11274 = vsyncadd [#allocation10], 4294950848 }
  0x9f   :  { %11275 = dma.done.wait [#allocation13], 16448  }
  0xa0   :  { %11276 = vsyncadd [#allocation13], 4294950848 }
  0xa1   :  { %11277 = dma.done.wait [#allocation16], 4112  }
  0xa2   :  { %11278 = vsyncadd [#allocation16], 4294963184  ;;  %v9481_v0 = vld [vmem:[#allocation6 + $0x4] ss:$16 sps:$4 sm:$0xff]   ;;  %v9483_v1 = vld [vmem:[#allocation6 + $0xc] ss:$16 sps:$4 sm:$0xff]  }
  0xa3   :  { %4850 = vmatprep.subr.bf16.mxu0 %v9481_v0  ;;  %v9485_v2 = vld [vmem:[#allocation6] ss:$16 sps:$4 sm:$0xff]   ;;  %v9486_v3 = vld [vmem:[#allocation6 + $0x8] ss:$16 sps:$4 sm:$0xff]   ;;  %5366 = vmatprep.subr.bf16.mxu1 %v9483_v1  ;;  %v9487_v4 = vld [vmem:[#allocation6 + $0x24] ss:$16 sps:$4 sm:$0xff]  }
  0xa4   :  { %4851 = vmatpush1.bf16.msra.mxu0 %v9485_v2  ;;  %5367 = vmatpush1.bf16.msra.mxu1 %v9486_v3  ;;  %v9489_v5 = vld [vmem:[#allocation6 + $0x2c] ss:$16 sps:$4 sm:$0xff]   ;;  %v9491_v6 = vld [vmem:[#allocation6 + $0x20] ss:$16 sps:$4 sm:$0xff]   ;;  %v9492_v7 = vld [vmem:[#allocation6 + $0x28] ss:$16 sps:$4 sm:$0xff]  }
  0xa5   :  { %4852 = vmatprep.subr.bf16.mxu0 %v9487_v4  ;;  %5368 = vmatprep.subr.bf16.mxu1 %v9489_v5  ;;  %v9493_v8 = vld [vmem:[#allocation6 + $0x44] ss:$16 sps:$4 sm:$0xff]   ;;  %v9495_v9 = vld [vmem:[#allocation6 + $0x4c] ss:$16 sps:$4 sm:$0xff]   ;;  %v9497_v10 = vld [vmem:[#allocation6 + $0x40] ss:$16 sps:$4 sm:$0xff]  }
  0xa6   :  { %v9498_v11 = vld [vmem:[#allocation6 + $0x48] ss:$16 sps:$4 sm:$0xff]   ;;  %v9499_v12 = vld [vmem:[#allocation6 + $0x64] ss:$16 sps:$4 sm:$0xff]   ;;  %v9501_v13 = vld [vmem:[#allocation6 + $0x6c] ss:$16 sps:$4 sm:$0xff]  }
  0xa7   :  { %v9503_v14 = vld [vmem:[#allocation6 + $0x60] ss:$16 sps:$4 sm:$0xff]   ;;  %v9504_v15 = vld [vmem:[#allocation6 + $0x68] ss:$16 sps:$4 sm:$0xff]   ;;  %v9505_v16 = vld [vmem:[#allocation6 + $0x84] ss:$16 sps:$4 sm:$0xff]  }
  0xa8   :  { %4853 = vmatpush1.bf16.msra.mxu0 %v9491_v6  ;;  %5369 = vmatpush1.bf16.msra.mxu1 %v9492_v7  ;;  %v9507_v17 = vld [vmem:[#allocation6 + $0x8c] ss:$16 sps:$4 sm:$0xff]   ;;  %v9509_v18 = vld [vmem:[#allocation6 + $0x80] ss:$16 sps:$4 sm:$0xff]   ;;  %v9510_v19 = vld [vmem:[#allocation6 + $0x88] ss:$16 sps:$4 sm:$0xff]  }
  0xa9   :  { %4854 = vmatprep.subr.bf16.mxu0 %v9493_v8  ;;  %5370 = vmatprep.subr.bf16.mxu1 %v9495_v9  ;;  %v9511_v20 = vld [vmem:[#allocation6 + $0xa4] ss:$16 sps:$4 sm:$0xff]   ;;  %v9513_v21 = vld [vmem:[#allocation6 + $0xac] ss:$16 sps:$4 sm:$0xff]   ;;  %v9515_v22 = vld [vmem:[#allocation6 + $0xa0] ss:$16 sps:$4 sm:$0xff]  }
  0xaa   :  { %v9516_v23 = vld [vmem:[#allocation6 + $0xa8] ss:$16 sps:$4 sm:$0xff]   ;;  %v9517_v24 = vld [vmem:[#allocation6 + $0xc4] ss:$16 sps:$4 sm:$0xff]   ;;  %v9519_v25 = vld [vmem:[#allocation6 + $0xcc] ss:$16 sps:$4 sm:$0xff]  }
  0xab   :  { %v9521_v26 = vld [vmem:[#allocation6 + $0xc0] ss:$16 sps:$4 sm:$0xff]   ;;  %v9522_v27 = vld [vmem:[#allocation6 + $0xc8] ss:$16 sps:$4 sm:$0xff]   ;;  %v9523_v28 = vld [vmem:[#allocation6 + $0xe4] ss:$16 sps:$4 sm:$0xff]  }
  0xac   :  { %4855 = vmatpush1.bf16.msra.mxu0 %v9497_v10  ;;  %5371 = vmatpush1.bf16.msra.mxu1 %v9498_v11  ;;  %v9525_v29 = vld [vmem:[#allocation6 + $0xec] ss:$16 sps:$4 sm:$0xff]   ;;  %v9527_v30 = vld [vmem:[#allocation6 + $0xe0] ss:$16 sps:$4 sm:$0xff]   ;;  %v9528_v31 = vld [vmem:[#allocation6 + $0xe8] ss:$16 sps:$4 sm:$0xff]  }
  0xad   :  { %4856 = vmatprep.subr.bf16.mxu0 %v9499_v12  ;;  %5372 = vmatprep.subr.bf16.mxu1 %v9501_v13  ;;  %v9529_v32 = vld [vmem:[#allocation6 + $0x104] ss:$16 sps:$4 sm:$0xff]   ;;  %v9531_v33 = vld [vmem:[#allocation6 + $0x10c] ss:$16 sps:$4 sm:$0xff]   ;;  %v9533_v34 = vld [vmem:[#allocation6 + $0x100] ss:$16 sps:$4 sm:$0xff]  }
  0xae   :  { %v9534_v35 = vld [vmem:[#allocation6 + $0x108] ss:$16 sps:$4 sm:$0xff]   ;;  %v9535_v36 = vld [vmem:[#allocation6 + $0x124] ss:$16 sps:$4 sm:$0xff]   ;;  %v9537_v37 = vld [vmem:[#allocation6 + $0x12c] ss:$16 sps:$4 sm:$0xff]  }
  0xaf   :  { %v9539_v38 = vld [vmem:[#allocation6 + $0x120] ss:$16 sps:$4 sm:$0xff]   ;;  %v9540_v39 = vld [vmem:[#allocation6 + $0x128] ss:$16 sps:$4 sm:$0xff]   ;;  %v9541_v40 = vld [vmem:[#allocation6 + $0x144] ss:$16 sps:$4 sm:$0xff]  }
  0xb0   :  { %4857 = vmatpush1.bf16.msra.mxu0 %v9503_v14  ;;  %5373 = vmatpush1.bf16.msra.mxu1 %v9504_v15  ;;  %v9543_v41 = vld [vmem:[#allocation6 + $0x14c] ss:$16 sps:$4 sm:$0xff]   ;;  %v9545_v42 = vld [vmem:[#allocation6 + $0x140] ss:$16 sps:$4 sm:$0xff]   ;;  %v9546_v43 = vld [vmem:[#allocation6 + $0x148] ss:$16 sps:$4 sm:$0xff]  }
  0xb1   :  { %4858 = vmatprep.subr.bf16.mxu0 %v9505_v16  ;;  %5374 = vmatprep.subr.bf16.mxu1 %v9507_v17  ;;  %v9547_v44 = vld [vmem:[#allocation6 + $0x164] ss:$16 sps:$4 sm:$0xff]   ;;  %v9549_v45 = vld [vmem:[#allocation6 + $0x16c] ss:$16 sps:$4 sm:$0xff]   ;;  %v9551_v48 = vld [vmem:[#allocation6 + $0x160] ss:$16 sps:$4 sm:$0xff]  }
  0xb2   :  { %v149_v46 = vld [vmem:[#allocation3 + $0x8] sm:$0xff]  ;;  %v9553_v51 = vld [vmem:[#allocation6 + $0x184] ss:$16 sps:$4 sm:$0xff]   ;;  %v9557_v53 = vld [vmem:[#allocation6 + $0x180] ss:$16 sps:$4 sm:$0xff]   ;;  %s11296_s8 = smov [#allocation18]  }
  0xb3   :  { %v173_v47 = vld [vmem:[#allocation3 + $0xc8] sm:$0xff]  ;;  %v9559_v55 = vld [vmem:[#allocation6 + $0x1a4] ss:$16 sps:$4 sm:$0xff]   ;;  %v9563_v57 = vld [vmem:[#allocation6 + $0x1a0] ss:$16 sps:$4 sm:$0xff]   ;;  %s8218_s3 = sshll.u32 %s11296_s8, 4  ;;  %s8219_s3 = int_to_ptr.vmem [resolvable:$true] %s8218_s3 }
  0xb4   :  { %4859 = vmatpush1.bf16.msra.mxu0 %v9509_v18  ;;  %5375 = vmatpush1.bf16.msra.mxu1 %v9510_v19  ;;  %v9552_v49 = vld [vmem:[#allocation6 + $0x168] ss:$16 sps:$4 sm:$0xff]   ;;  %v197_v50 = vpack.c.bf16 %v173_v47, %v149_v46  ;;  %v9555_v52 = vld [vmem:[#allocation6 + $0x18c] ss:$16 sps:$4 sm:$0xff]   ;;  %v9565_v59 = vld [vmem:[#allocation6 + $0x1c4] ss:$16 sps:$4 sm:$0xff]   ;;  %p11252_p3 = scmp.lt.s32.totalorder %s8219_s3, %s8219_s3 }
  0xb5   :  { %4860 = vmatprep.subr.bf16.mxu0 %v9511_v20  ;;  %5376 = vmatprep.subr.bf16.mxu1 %v9513_v21  ;;  %v9558_v54 = vld [vmem:[#allocation6 + $0x188] ss:$16 sps:$4 sm:$0xff]   ;;  %v9561_v56 = vld [vmem:[#allocation6 + $0x1ac] ss:$16 sps:$4 sm:$0xff]   ;;  %v9569_v61 = vld [vmem:[#allocation6 + $0x1c0] ss:$16 sps:$4 sm:$0xff]  }
  0xb6   :  { %4882 = vmatprep.mubr.bf16.mxu0 %v197_v50  ;;  %5398 = vmatprep.mubr.bf16.mxu1 %v197_v50  ;;  %v9564_v58 = vld [vmem:[#allocation6 + $0x1a8] ss:$16 sps:$4 sm:$0xff]   ;;  %v9567_v60 = vld [vmem:[#allocation6 + $0x1cc] ss:$16 sps:$4 sm:$0xff]   ;;  %v9571_v63 = vld [vmem:[#allocation6 + $0x1e4] ss:$16 sps:$4 sm:$0xff]  }
  0xb7   :  { %v9570_v62 = vld [vmem:[#allocation6 + $0x1c8] ss:$16 sps:$4 sm:$0xff]   ;;  %v9573_v0 = vld [vmem:[#allocation6 + $0x1ec] ss:$16 sps:$4 sm:$0xff]   ;;  %v9575_v1 = vld [vmem:[#allocation6 + $0x1e0] ss:$16 sps:$4 sm:$0xff]  }
  0xb8   :  { %4861 = vmatpush1.bf16.msra.mxu0 %v9515_v22  ;;  %5377 = vmatpush1.bf16.msra.mxu1 %v9516_v23  ;;  %v9576_v2 = vld [vmem:[#allocation6 + $0x1e8] ss:$16 sps:$4 sm:$0xff]   ;;  %v9579_v3 = vld [vmem:[#allocation6 + $0x204] ss:$16 sps:$4 sm:$0xff]   ;;  %v9582_v6 = vld [vmem:[#allocation6 + $0x20c] ss:$16 sps:$4 sm:$0xff]  }
  0xb9   :  { %4862 = vmatprep.subr.bf16.mxu0 %v9517_v24  ;;  %5378 = vmatprep.subr.bf16.mxu1 %v9519_v25  ;;  %v148_v4 = vld [vmem:[#allocation3] sm:$0xff]  ;;  %v9580_v8 = vld [vmem:[#allocation6 + $0x208] ss:$16 sps:$4 sm:$0xff]   ;;  %v9588_v11 = vld [vmem:[#allocation6 + $0x22c] ss:$16 sps:$4 sm:$0xff]   ;;  %s11247_s24 = scalar_lea.vmem %s8219_s3, 256 }
  0xba   :  { %v172_v5 = vld [vmem:[#allocation3 + $0xc0] sm:$0xff]  ;;  %v9586_v13 = vld [vmem:[#allocation6 + $0x228] ss:$16 sps:$4 sm:$0xff]   ;;  %v9594_v15 = vld [vmem:[#allocation6 + $0x24c] ss:$16 sps:$4 sm:$0xff]   ;;  %p11248_p2 = scmp.ne.s32.totalorder %s8219_s3, %s11247_s24  ;;  %p11253_p4 = scmp.lt.s32.totalorder %s11247_s24, %s11247_s24 }
  0xbb   :  { %v9577_v7 = vld [vmem:[#allocation6 + $0x200] ss:$16 sps:$4 sm:$0xff]   ;;  %v196_v9 = vpack.c.bf16 %v172_v5, %v148_v4  ;;  %v9585_v10 = vld [vmem:[#allocation6 + $0x224] ss:$16 sps:$4 sm:$0xff]   ;;  %v9592_v17 = vld [vmem:[#allocation6 + $0x248] ss:$16 sps:$4 sm:$0xff]  }
  0xbc   :  { %4863 = vmatpush1.bf16.msra.mxu0 %v9521_v26  ;;  %5379 = vmatpush1.bf16.msra.mxu1 %v9522_v27  ;;  %v9583_v12 = vld [vmem:[#allocation6 + $0x220] ss:$16 sps:$4 sm:$0xff]   ;;  %v9591_v14 = vld [vmem:[#allocation6 + $0x244] ss:$16 sps:$4 sm:$0xff]   ;;  %v9600_v19 = vld [vmem:[#allocation6 + $0x26c] ss:$16 sps:$4 sm:$0xff]   ;;  %p11254_p5 = por %p11253_p4, %p11252_p3 }
  0xbd   :  { %4864 = vmatprep.subr.bf16.mxu0 %v9523_v28  ;;  %5380 = vmatprep.subr.bf16.mxu1 %v9525_v29  ;;  %v9589_v16 = vld [vmem:[#allocation6 + $0x240] ss:$16 sps:$4 sm:$0xff]   ;;  %v9597_v18 = vld [vmem:[#allocation6 + $0x264] ss:$16 sps:$4 sm:$0xff]   ;;  %v9598_v21 = vld [vmem:[#allocation6 + $0x268] ss:$16 sps:$4 sm:$0xff]  }
  0xbe   :  { %v9595_v20 = vld [vmem:[#allocation6 + $0x260] ss:$16 sps:$4 sm:$0xff]   ;;  %v9603_v22 = vld [vmem:[#allocation6 + $0x284] ss:$16 sps:$4 sm:$0xff]   ;;  %v9606_v23 = vld [vmem:[#allocation6 + $0x28c] ss:$16 sps:$4 sm:$0xff]   ;;  %p11255_p6 = pnand %p11254_p5, %p11248_p2 }
  0xbf   :  { %v9601_v24 = vld [vmem:[#allocation6 + $0x280] ss:$16 sps:$4 sm:$0xff]   ;;  %v9604_v25 = vld [vmem:[#allocation6 + $0x288] ss:$16 sps:$4 sm:$0xff]   ;;  %v9609_v26 = vld [vmem:[#allocation6 + $0x2a4] ss:$16 sps:$4 sm:$0xff]  }
  0xc0   :  { %4865 = vmatpush1.bf16.msra.mxu0 %v9527_v30  ;;  %5381 = vmatpush1.bf16.msra.mxu1 %v9528_v31  ;;  %v9612_v27 = vld [vmem:[#allocation6 + $0x2ac] ss:$16 sps:$4 sm:$0xff]   ;;  %v9607_v28 = vld [vmem:[#allocation6 + $0x2a0] ss:$16 sps:$4 sm:$0xff]   ;;  %v9610_v29 = vld [vmem:[#allocation6 + $0x2a8] ss:$16 sps:$4 sm:$0xff]  }
  0xc1   :  { %4866 = vmatprep.subr.bf16.mxu0 %v9529_v32  ;;  %5382 = vmatprep.subr.bf16.mxu1 %v9531_v33  ;;  %v9615_v30 = vld [vmem:[#allocation6 + $0x2c4] ss:$16 sps:$4 sm:$0xff]   ;;  %v9618_v31 = vld [vmem:[#allocation6 + $0x2cc] ss:$16 sps:$4 sm:$0xff]   ;;  %v9631_v47 = vld [vmem:[#allocation6 + $0x320] ss:$16 sps:$4 sm:$0xff]  }
  0xc2   :  { %v151_v32 = vld [vmem:[#allocation3 + $0x18] sm:$0xff]  ;;  %v9669_v5 = vld [vmem:[#allocation6 + $0x3e4] ss:$16 sps:$4 sm:$0xff]  }
  0xc3   :  { %v175_v33 = vld [vmem:[#allocation3 + $0xd8] sm:$0xff] }
  0xc4   :  { %4867 = vmatpush1.bf16.msra.mxu0 %v9533_v34  ;;  %5383 = vmatpush1.bf16.msra.mxu1 %v9534_v35  ;;  %v9613_v34 = vld [vmem:[#allocation6 + $0x2c0] ss:$16 sps:$4 sm:$0xff]   ;;  %v9616_v35 = vld [vmem:[#allocation6 + $0x2c8] ss:$16 sps:$4 sm:$0xff]   ;;  %v9636_v46 = vld [vmem:[#allocation6 + $0x32c] ss:$16 sps:$4 sm:$0xff]  }
  0xc5   :  { %4868 = vmatprep.subr.bf16.mxu0 %v9535_v36  ;;  %5384 = vmatprep.subr.bf16.mxu1 %v9537_v37  ;;  %v199_v36 = vpack.c.bf16 %v175_v33, %v151_v32  ;;  %v9621_v37 = vld [vmem:[#allocation6 + $0x2e4] ss:$16 sps:$4 sm:$0xff]   ;;  %v9642_v50 = vld [vmem:[#allocation6 + $0x34c] ss:$16 sps:$4 sm:$0xff]   ;;  %v9664_v4 = vld [vmem:[#allocation6 + $0x3c8] ss:$16 sps:$4 sm:$0xff]  }
  0xc6   :  { %v9702_v32 = vld [vmem:[#allocation6 + $0x48c] ss:$16 sps:$4 sm:$0xff]   ;;  %v9697_v33 = vld [vmem:[#allocation6 + $0x480] ss:$16 sps:$4 sm:$0xff]  }
  0xc8   :  { %4869 = vmatpush1.bf16.msra.mxu0 %v9539_v38  ;;  %5385 = vmatpush1.bf16.msra.mxu1 %v9540_v39  ;;  %v9624_v38 = vld [vmem:[#allocation6 + $0x2ec] ss:$16 sps:$4 sm:$0xff]   ;;  %v9619_v39 = vld [vmem:[#allocation6 + $0x2e0] ss:$16 sps:$4 sm:$0xff]  }
  0xc9   :  { %4870 = vmatprep.subr.bf16.mxu0 %v9541_v40  ;;  %5386 = vmatprep.subr.bf16.mxu1 %v9543_v41  ;;  %v9622_v40 = vld [vmem:[#allocation6 + $0x2e8] ss:$16 sps:$4 sm:$0xff]   ;;  %v9627_v41 = vld [vmem:[#allocation6 + $0x304] ss:$16 sps:$4 sm:$0xff]  }
  0xcc   :  { %4871 = vmatpush1.bf16.msra.mxu0 %v9545_v42  ;;  %5387 = vmatpush1.bf16.msra.mxu1 %v9546_v43  ;;  %v9630_v42 = vld [vmem:[#allocation6 + $0x30c] ss:$16 sps:$4 sm:$0xff]   ;;  %v9625_v43 = vld [vmem:[#allocation6 + $0x300] ss:$16 sps:$4 sm:$0xff]  }
  0xcd   :  { %4872 = vmatprep.subr.bf16.mxu0 %v9547_v44  ;;  %5388 = vmatprep.subr.bf16.mxu1 %v9549_v45  ;;  %v9628_v44 = vld [vmem:[#allocation6 + $0x308] ss:$16 sps:$4 sm:$0xff]   ;;  %v9633_v45 = vld [vmem:[#allocation6 + $0x324] ss:$16 sps:$4 sm:$0xff]  }
  0xd0   :  { %4873 = vmatpush1.bf16.msra.mxu0 %v9551_v48  ;;  %5389 = vmatpush1.bf16.msra.mxu1 %v9552_v49  ;;  %v9634_v48 = vld [vmem:[#allocation6 + $0x328] ss:$16 sps:$4 sm:$0xff]   ;;  %v9639_v49 = vld [vmem:[#allocation6 + $0x344] ss:$16 sps:$4 sm:$0xff]  }
  0xd1   :  { %4874 = vmatprep.subr.bf16.mxu0 %v9553_v51  ;;  %5390 = vmatprep.subr.bf16.mxu1 %v9555_v52  ;;  %v9637_v51 = vld [vmem:[#allocation6 + $0x340] ss:$16 sps:$4 sm:$0xff]   ;;  %v9640_v52 = vld [vmem:[#allocation6 + $0x348] ss:$16 sps:$4 sm:$0xff]  }
  0xd4   :  { %4875 = vmatpush1.bf16.msra.mxu0 %v9557_v53  ;;  %5391 = vmatpush1.bf16.msra.mxu1 %v9558_v54  ;;  %v9645_v53 = vld [vmem:[#allocation6 + $0x364] ss:$16 sps:$4 sm:$0xff]   ;;  %v9648_v54 = vld [vmem:[#allocation6 + $0x36c] ss:$16 sps:$4 sm:$0xff]  }
  0xd5   :  { %4876 = vmatprep.subr.bf16.mxu0 %v9559_v55  ;;  %5392 = vmatprep.subr.bf16.mxu1 %v9561_v56  ;;  %v9643_v55 = vld [vmem:[#allocation6 + $0x360] ss:$16 sps:$4 sm:$0xff]   ;;  %v9646_v56 = vld [vmem:[#allocation6 + $0x368] ss:$16 sps:$4 sm:$0xff]  }
  0xd8   :  { %4877 = vmatpush1.bf16.msra.mxu0 %v9563_v57  ;;  %5393 = vmatpush1.bf16.msra.mxu1 %v9564_v58  ;;  %v9651_v57 = vld [vmem:[#allocation6 + $0x384] ss:$16 sps:$4 sm:$0xff]   ;;  %v9654_v58 = vld [vmem:[#allocation6 + $0x38c] ss:$16 sps:$4 sm:$0xff]  }
  0xd9   :  { %4878 = vmatprep.subr.bf16.mxu0 %v9565_v59  ;;  %5394 = vmatprep.subr.bf16.mxu1 %v9567_v60  ;;  %v9649_v59 = vld [vmem:[#allocation6 + $0x380] ss:$16 sps:$4 sm:$0xff]   ;;  %v9652_v60 = vld [vmem:[#allocation6 + $0x388] ss:$16 sps:$4 sm:$0xff]  }
  0xdc   :  { %4879 = vmatpush1.bf16.msra.mxu0 %v9569_v61  ;;  %5395 = vmatpush1.bf16.msra.mxu1 %v9570_v62  ;;  %v9657_v61 = vld [vmem:[#allocation6 + $0x3a4] ss:$16 sps:$4 sm:$0xff]   ;;  %v9660_v62 = vld [vmem:[#allocation6 + $0x3ac] ss:$16 sps:$4 sm:$0xff]  }
  0xdd   :  { %4880 = vmatprep.subr.bf16.mxu0 %v9571_v63  ;;  %5396 = vmatprep.subr.bf16.mxu1 %v9573_v0  ;;  %v9655_v63 = vld [vmem:[#allocation6 + $0x3a0] ss:$16 sps:$4 sm:$0xff]   ;;  %v9658_v0 = vld [vmem:[#allocation6 + $0x3a8] ss:$16 sps:$4 sm:$0xff]  }
  0xe0   :  { %4881 = vmatpush1.bf16.msra.mxu0 %v9575_v1  ;;  %5397 = vmatpush1.bf16.msra.mxu1 %v9576_v2  ;;  %v9663_v1 = vld [vmem:[#allocation6 + $0x3c4] ss:$16 sps:$4 sm:$0xff]   ;;  %v9666_v2 = vld [vmem:[#allocation6 + $0x3cc] ss:$16 sps:$4 sm:$0xff]  }
  0xe1   :  { %4893 = vmatprep.subr.bf16.mxu0 %v9579_v3  ;;  %5409 = vmatprep.subr.bf16.mxu1 %v9582_v6  ;;  %v9661_v3 = vld [vmem:[#allocation6 + $0x3c0] ss:$16 sps:$4 sm:$0xff]   ;;  %v9672_v6 = vld [vmem:[#allocation6 + $0x3ec] ss:$16 sps:$4 sm:$0xff]  }
  0xe3   :  { %4883 = vmatmul.mubr.bf16.vlgmr.msra.gmra.mrb[0].mxu0 %v196_v9  ;;  %5399 = vmatmul.mubr.bf16.vlgmr.msra.gmra.mrb[0].mxu1 %v196_v9  ;;  %v9675_v9 = vld [vmem:[#allocation6 + $0x404] ss:$16 sps:$4 sm:$0xff]  }
  0xe4   :  { %4894 = vmatpush1.bf16.msra.mxu0 %v9577_v7  ;;  %5410 = vmatpush1.bf16.msra.mxu1 %v9580_v8  ;;  %v9667_v7 = vld [vmem:[#allocation6 + $0x3e0] ss:$16 sps:$4 sm:$0xff]   ;;  %v9670_v8 = vld [vmem:[#allocation6 + $0x3e8] ss:$16 sps:$4 sm:$0xff]  }
  0xe5   :  { %4895 = vmatprep.subr.bf16.mxu0 %v9585_v10  ;;  %5411 = vmatprep.subr.bf16.mxu1 %v9588_v11  ;;  %v150_v10 = vld [vmem:[#allocation3 + $0x10] sm:$0xff] }
  0xe6   :  { %4925 = vmatprep.mubr.bf16.mxu0 %v199_v36  ;;  %5441 = vmatprep.mubr.bf16.mxu1 %v199_v36  ;;  %v174_v11 = vld [vmem:[#allocation3 + $0xd0] sm:$0xff]  ;;  %v9708_v36 = vld [vmem:[#allocation6 + $0x4ac] ss:$16 sps:$4 sm:$0xff]  }
  0xe8   :  { %4896 = vmatpush1.bf16.msra.mxu0 %v9583_v12  ;;  %5412 = vmatpush1.bf16.msra.mxu1 %v9586_v13  ;;  %v9678_v12 = vld [vmem:[#allocation6 + $0x40c] ss:$16 sps:$4 sm:$0xff]   ;;  %v9673_v13 = vld [vmem:[#allocation6 + $0x400] ss:$16 sps:$4 sm:$0xff]  }
  0xe9   :  { %4897 = vmatprep.subr.bf16.mxu0 %v9591_v14  ;;  %5413 = vmatprep.subr.bf16.mxu1 %v9594_v15  ;;  %v9676_v14 = vld [vmem:[#allocation6 + $0x408] ss:$16 sps:$4 sm:$0xff]   ;;  %v198_v15 = vpack.c.bf16 %v174_v11, %v150_v10  ;;  %v9765_v11 = vld [vmem:[#allocation6 + $0x5e4] ss:$16 sps:$4 sm:$0xff]  }
  0xea   :  { %v9760_v10 = vld [vmem:[#allocation6 + $0x5c8] ss:$16 sps:$4 sm:$0xff]  }
  0xec   :  { %4898 = vmatpush1.bf16.msra.mxu0 %v9589_v16  ;;  %5414 = vmatpush1.bf16.msra.mxu1 %v9592_v17  ;;  %v9681_v16 = vld [vmem:[#allocation6 + $0x424] ss:$16 sps:$4 sm:$0xff]   ;;  %v9684_v17 = vld [vmem:[#allocation6 + $0x42c] ss:$16 sps:$4 sm:$0xff]  }
  0xed   :  { %4899 = vmatprep.subr.bf16.mxu0 %v9597_v18  ;;  %5415 = vmatprep.subr.bf16.mxu1 %v9600_v19  ;;  %v153_v18 = vld [vmem:[#allocation3 + $0x28] sm:$0xff] }
  0xee   :  { %v177_v19 = vld [vmem:[#allocation3 + $0xe8] sm:$0xff] }
  0xf0   :  { %4900 = vmatpush1.bf16.msra.mxu0 %v9595_v20  ;;  %5416 = vmatpush1.bf16.msra.mxu1 %v9598_v21  ;;  %v9679_v20 = vld [vmem:[#allocation6 + $0x420] ss:$16 sps:$4 sm:$0xff]   ;;  %v9682_v21 = vld [vmem:[#allocation6 + $0x428] ss:$16 sps:$4 sm:$0xff]  }
  0xf1   :  { %4901 = vmatprep.subr.bf16.mxu0 %v9603_v22  ;;  %5417 = vmatprep.subr.bf16.mxu1 %v9606_v23  ;;  %v201_v22 = vpack.c.bf16 %v177_v19, %v153_v18  ;;  %v9687_v23 = vld [vmem:[#allocation6 + $0x444] ss:$16 sps:$4 sm:$0xff]   ;;  %v9774_v18 = vld [vmem:[#allocation6 + $0x60c] ss:$16 sps:$4 sm:$0xff]   ;;  %v9769_v19 = vld [vmem:[#allocation6 + $0x600] ss:$16 sps:$4 sm:$0xff]  }
  0xf4   :  { %4902 = vmatpush1.bf16.msra.mxu0 %v9601_v24  ;;  %5418 = vmatpush1.bf16.msra.mxu1 %v9604_v25  ;;  %v9690_v24 = vld [vmem:[#allocation6 + $0x44c] ss:$16 sps:$4 sm:$0xff]   ;;  %v9685_v25 = vld [vmem:[#allocation6 + $0x440] ss:$16 sps:$4 sm:$0xff]  }
  0xf5   :  { %4903 = vmatprep.subr.bf16.mxu0 %v9609_v26  ;;  %5419 = vmatprep.subr.bf16.mxu1 %v9612_v27  ;;  %v9688_v26 = vld [vmem:[#allocation6 + $0x448] ss:$16 sps:$4 sm:$0xff]   ;;  %v9693_v27 = vld [vmem:[#allocation6 + $0x464] ss:$16 sps:$4 sm:$0xff]  }
  0xf8   :  { %4904 = vmatpush1.bf16.msra.mxu0 %v9607_v28  ;;  %5420 = vmatpush1.bf16.msra.mxu1 %v9610_v29  ;;  %v9696_v28 = vld [vmem:[#allocation6 + $0x46c] ss:$16 sps:$4 sm:$0xff]   ;;  %v9691_v29 = vld [vmem:[#allocation6 + $0x460] ss:$16 sps:$4 sm:$0xff]  }
  0xf9   :  { %4905 = vmatprep.subr.bf16.mxu0 %v9615_v30  ;;  %5421 = vmatprep.subr.bf16.mxu1 %v9618_v31  ;;  %v9694_v30 = vld [vmem:[#allocation6 + $0x468] ss:$16 sps:$4 sm:$0xff]   ;;  %v9699_v31 = vld [vmem:[#allocation6 + $0x484] ss:$16 sps:$4 sm:$0xff]  }
  0xfc   :  { %4906 = vmatpush1.bf16.msra.mxu0 %v9613_v34  ;;  %5422 = vmatpush1.bf16.msra.mxu1 %v9616_v35  ;;  %v9700_v34 = vld [vmem:[#allocation6 + $0x488] ss:$16 sps:$4 sm:$0xff]   ;;  %v9705_v35 = vld [vmem:[#allocation6 + $0x4a4] ss:$16 sps:$4 sm:$0xff]  }
  0xfd   :  { %4907 = vmatprep.subr.bf16.mxu0 %v9621_v37  ;;  %5423 = vmatprep.subr.bf16.mxu1 %v9624_v38  ;;  %v9703_v37 = vld [vmem:[#allocation6 + $0x4a0] ss:$16 sps:$4 sm:$0xff]   ;;  %v9706_v38 = vld [vmem:[#allocation6 + $0x4a8] ss:$16 sps:$4 sm:$0xff]  }
 0x100   :  { %4908 = vmatpush1.bf16.msra.mxu0 %v9619_v39  ;;  %5424 = vmatpush1.bf16.msra.mxu1 %v9622_v40  ;;  %v9711_v39 = vld [vmem:[#allocation6 + $0x4c4] ss:$16 sps:$4 sm:$0xff]   ;;  %v9714_v40 = vld [vmem:[#allocation6 + $0x4cc] ss:$16 sps:$4 sm:$0xff]  }
 0x101   :  { %4909 = vmatprep.subr.bf16.mxu0 %v9627_v41  ;;  %5425 = vmatprep.subr.bf16.mxu1 %v9630_v42  ;;  %v9709_v41 = vld [vmem:[#allocation6 + $0x4c0] ss:$16 sps:$4 sm:$0xff]   ;;  %v9712_v42 = vld [vmem:[#allocation6 + $0x4c8] ss:$16 sps:$4 sm:$0xff]  }
 0x104   :  { %4910 = vmatpush1.bf16.msra.mxu0 %v9625_v43  ;;  %5426 = vmatpush1.bf16.msra.mxu1 %v9628_v44  ;;  %v9717_v43 = vld [vmem:[#allocation6 + $0x4e4] ss:$16 sps:$4 sm:$0xff]   ;;  %v9720_v44 = vld [vmem:[#allocation6 + $0x4ec] ss:$16 sps:$4 sm:$0xff]  }
 0x105   :  { %4911 = vmatprep.subr.bf16.mxu0 %v9633_v45  ;;  %5427 = vmatprep.subr.bf16.mxu1 %v9636_v46  ;;  %v9715_v45 = vld [vmem:[#allocation6 + $0x4e0] ss:$16 sps:$4 sm:$0xff]   ;;  %v9718_v46 = vld [vmem:[#allocation6 + $0x4e8] ss:$16 sps:$4 sm:$0xff]  }
 0x108   :  { %4912 = vmatpush1.bf16.msra.mxu0 %v9631_v47  ;;  %5428 = vmatpush1.bf16.msra.mxu1 %v9634_v48  ;;  %v9723_v47 = vld [vmem:[#allocation6 + $0x504] ss:$16 sps:$4 sm:$0xff]   ;;  %v9726_v48 = vld [vmem:[#allocation6 + $0x50c] ss:$16 sps:$4 sm:$0xff]  }
 0x109   :  { %4913 = vmatprep.subr.bf16.mxu0 %v9639_v49  ;;  %5429 = vmatprep.subr.bf16.mxu1 %v9642_v50  ;;  %v9721_v49 = vld [vmem:[#allocation6 + $0x500] ss:$16 sps:$4 sm:$0xff]   ;;  %v9724_v50 = vld [vmem:[#allocation6 + $0x508] ss:$16 sps:$4 sm:$0xff]  }
 0x10c   :  { %4914 = vmatpush1.bf16.msra.mxu0 %v9637_v51  ;;  %5430 = vmatpush1.bf16.msra.mxu1 %v9640_v52  ;;  %v9729_v51 = vld [vmem:[#allocation6 + $0x524] ss:$16 sps:$4 sm:$0xff]   ;;  %v9732_v52 = vld [vmem:[#allocation6 + $0x52c] ss:$16 sps:$4 sm:$0xff]  }
 0x10d   :  { %4915 = vmatprep.subr.bf16.mxu0 %v9645_v53  ;;  %5431 = vmatprep.subr.bf16.mxu1 %v9648_v54  ;;  %v9727_v53 = vld [vmem:[#allocation6 + $0x520] ss:$16 sps:$4 sm:$0xff]   ;;  %v9730_v54 = vld [vmem:[#allocation6 + $0x528] ss:$16 sps:$4 sm:$0xff]  }
 0x110   :  { %4916 = vmatpush1.bf16.msra.mxu0 %v9643_v55  ;;  %5432 = vmatpush1.bf16.msra.mxu1 %v9646_v56  ;;  %v9735_v55 = vld [vmem:[#allocation6 + $0x544] ss:$16 sps:$4 sm:$0xff]   ;;  %v9738_v56 = vld [vmem:[#allocation6 + $0x54c] ss:$16 sps:$4 sm:$0xff]  }
 0x111   :  { %4917 = vmatprep.subr.bf16.mxu0 %v9651_v57  ;;  %5433 = vmatprep.subr.bf16.mxu1 %v9654_v58  ;;  %v9733_v57 = vld [vmem:[#allocation6 + $0x540] ss:$16 sps:$4 sm:$0xff]   ;;  %v9736_v58 = vld [vmem:[#allocation6 + $0x548] ss:$16 sps:$4 sm:$0xff]  }
 0x114   :  { %4918 = vmatpush1.bf16.msra.mxu0 %v9649_v59  ;;  %5434 = vmatpush1.bf16.msra.mxu1 %v9652_v60  ;;  %v9741_v59 = vld [vmem:[#allocation6 + $0x564] ss:$16 sps:$4 sm:$0xff]   ;;  %v9744_v60 = vld [vmem:[#allocation6 + $0x56c] ss:$16 sps:$4 sm:$0xff]  }
 0x115   :  { %4919 = vmatprep.subr.bf16.mxu0 %v9657_v61  ;;  %5435 = vmatprep.subr.bf16.mxu1 %v9660_v62  ;;  %v9739_v61 = vld [vmem:[#allocation6 + $0x560] ss:$16 sps:$4 sm:$0xff]   ;;  %v9742_v62 = vld [vmem:[#allocation6 + $0x568] ss:$16 sps:$4 sm:$0xff]  }
 0x118   :  { %4920 = vmatpush1.bf16.msra.mxu0 %v9655_v63  ;;  %5436 = vmatpush1.bf16.msra.mxu1 %v9658_v0  ;;  %v9747_v63 = vld [vmem:[#allocation6 + $0x584] ss:$16 sps:$4 sm:$0xff]   ;;  %v9750_v0 = vld [vmem:[#allocation6 + $0x58c] ss:$16 sps:$4 sm:$0xff]  }
 0x119   :  { %4921 = vmatprep.subr.bf16.mxu0 %v9663_v1  ;;  %5437 = vmatprep.subr.bf16.mxu1 %v9666_v2  ;;  %v9745_v1 = vld [vmem:[#allocation6 + $0x580] ss:$16 sps:$4 sm:$0xff]   ;;  %v9748_v2 = vld [vmem:[#allocation6 + $0x588] ss:$16 sps:$4 sm:$0xff]  }
 0x11c   :  { %4922 = vmatpush1.bf16.msra.mxu0 %v9661_v3  ;;  %5438 = vmatpush1.bf16.msra.mxu1 %v9664_v4  ;;  %v9753_v3 = vld [vmem:[#allocation6 + $0x5a4] ss:$16 sps:$4 sm:$0xff]   ;;  %v9756_v4 = vld [vmem:[#allocation6 + $0x5ac] ss:$16 sps:$4 sm:$0xff]  }
 0x11d   :  { %4923 = vmatprep.subr.bf16.mxu0 %v9669_v5  ;;  %5439 = vmatprep.subr.bf16.mxu1 %v9672_v6  ;;  %v9751_v5 = vld [vmem:[#allocation6 + $0x5a0] ss:$16 sps:$4 sm:$0xff]   ;;  %v9754_v6 = vld [vmem:[#allocation6 + $0x5a8] ss:$16 sps:$4 sm:$0xff]  }
 0x120   :  { %4924 = vmatpush1.bf16.msra.mxu0 %v9667_v7  ;;  %5440 = vmatpush1.bf16.msra.mxu1 %v9670_v8  ;;  %v9759_v7 = vld [vmem:[#allocation6 + $0x5c4] ss:$16 sps:$4 sm:$0xff]   ;;  %v9762_v8 = vld [vmem:[#allocation6 + $0x5cc] ss:$16 sps:$4 sm:$0xff]  }
 0x121   :  { %4936 = vmatprep.subr.bf16.mxu0 %v9675_v9  ;;  %5452 = vmatprep.subr.bf16.mxu1 %v9678_v12  ;;  %v9757_v9 = vld [vmem:[#allocation6 + $0x5c0] ss:$16 sps:$4 sm:$0xff]   ;;  %v9768_v12 = vld [vmem:[#allocation6 + $0x5ec] ss:$16 sps:$4 sm:$0xff]  }
 0x123   :  { %4926 = vmatmul.mubr.bf16.vlgmr.msra.gmra.mrb[0].mxu0 %v198_v15  ;;  %5442 = vmatmul.mubr.bf16.vlgmr.msra.gmra.mrb[0].mxu1 %v198_v15  ;;  %v9771_v15 = vld [vmem:[#allocation6 + $0x604] ss:$16 sps:$4 sm:$0xff]  }
 0x124   :  { %4937 = vmatpush1.bf16.msra.mxu0 %v9673_v13  ;;  %5453 = vmatpush1.bf16.msra.mxu1 %v9676_v14  ;;  %v9763_v13 = vld [vmem:[#allocation6 + $0x5e0] ss:$16 sps:$4 sm:$0xff]   ;;  %v9766_v14 = vld [vmem:[#allocation6 + $0x5e8] ss:$16 sps:$4 sm:$0xff]  }
 0x125   :  { %4938 = vmatprep.subr.bf16.mxu0 %v9681_v16  ;;  %5454 = vmatprep.subr.bf16.mxu1 %v9684_v17  ;;  %v152_v16 = vld [vmem:[#allocation3 + $0x20] sm:$0xff] }
 0x126   :  { %4968 = vmatprep.mubr.bf16.mxu0 %v201_v22  ;;  %5484 = vmatprep.mubr.bf16.mxu1 %v201_v22  ;;  %v176_v17 = vld [vmem:[#allocation3 + $0xe0] sm:$0xff]  ;;  %v155_v22 = vld [vmem:[#allocation3 + $0x38] sm:$0xff] }
 0x128   :  { %4939 = vmatpush1.bf16.msra.mxu0 %v9679_v20  ;;  %5455 = vmatpush1.bf16.msra.mxu1 %v9682_v21  ;;  %v9772_v20 = vld [vmem:[#allocation6 + $0x608] ss:$16 sps:$4 sm:$0xff]   ;;  %v200_v21 = vpack.c.bf16 %v176_v17, %v152_v16  ;;  %v9861_v17 = vld [vmem:[#allocation6 + $0x7e4] ss:$16 sps:$4 sm:$0xff]  }
 0x129   :  { %4940 = vmatprep.subr.bf16.mxu0 %v9687_v23  ;;  %5456 = vmatprep.subr.bf16.mxu1 %v9690_v24  ;;  %v179_v23 = vld [vmem:[#allocation3 + $0xf8] sm:$0xff]  ;;  %v9777_v24 = vld [vmem:[#allocation6 + $0x624] ss:$16 sps:$4 sm:$0xff]  }
 0x12a   :  { %v9856_v16 = vld [vmem:[#allocation6 + $0x7c8] ss:$16 sps:$4 sm:$0xff]  }
 0x12c   :  { %4941 = vmatpush1.bf16.msra.mxu0 %v9685_v25  ;;  %5457 = vmatpush1.bf16.msra.mxu1 %v9688_v26  ;;  %v9780_v25 = vld [vmem:[#allocation6 + $0x62c] ss:$16 sps:$4 sm:$0xff]   ;;  %v203_v26 = vpack.c.bf16 %v179_v23, %v155_v22  ;;  %v154_v22 = vld [vmem:[#allocation3 + $0x30] sm:$0xff] }
 0x12d   :  { %4942 = vmatprep.subr.bf16.mxu0 %v9693_v27  ;;  %5458 = vmatprep.subr.bf16.mxu1 %v9696_v28  ;;  %v9775_v27 = vld [vmem:[#allocation6 + $0x620] ss:$16 sps:$4 sm:$0xff]   ;;  %v9778_v28 = vld [vmem:[#allocation6 + $0x628] ss:$16 sps:$4 sm:$0xff]  }
 0x12e   :  { %v178_v23 = vld [vmem:[#allocation3 + $0xf0] sm:$0xff] }
 0x130   :  { %4943 = vmatpush1.bf16.msra.mxu0 %v9691_v29  ;;  %5459 = vmatpush1.bf16.msra.mxu1 %v9694_v30  ;;  %v9783_v29 = vld [vmem:[#allocation6 + $0x644] ss:$16 sps:$4 sm:$0xff]   ;;  %v9786_v30 = vld [vmem:[#allocation6 + $0x64c] ss:$16 sps:$4 sm:$0xff]  }
 0x131   :  { %4944 = vmatprep.subr.bf16.mxu0 %v9699_v31  ;;  %5460 = vmatprep.subr.bf16.mxu1 %v9702_v32  ;;  %v9781_v31 = vld [vmem:[#allocation6 + $0x640] ss:$16 sps:$4 sm:$0xff]   ;;  %v9784_v32 = vld [vmem:[#allocation6 + $0x648] ss:$16 sps:$4 sm:$0xff]  }
 0x134   :  { %4945 = vmatpush1.bf16.msra.mxu0 %v9697_v33  ;;  %5461 = vmatpush1.bf16.msra.mxu1 %v9700_v34  ;;  %v9789_v33 = vld [vmem:[#allocation6 + $0x664] ss:$16 sps:$4 sm:$0xff]   ;;  %v9792_v34 = vld [vmem:[#allocation6 + $0x66c] ss:$16 sps:$4 sm:$0xff]  }
 0x135   :  { %4946 = vmatprep.subr.bf16.mxu0 %v9705_v35  ;;  %5462 = vmatprep.subr.bf16.mxu1 %v9708_v36  ;;  %v9787_v35 = vld [vmem:[#allocation6 + $0x660] ss:$16 sps:$4 sm:$0xff]   ;;  %v9790_v36 = vld [vmem:[#allocation6 + $0x668] ss:$16 sps:$4 sm:$0xff]  }
 0x138   :  { %4947 = vmatpush1.bf16.msra.mxu0 %v9703_v37  ;;  %5463 = vmatpush1.bf16.msra.mxu1 %v9706_v38  ;;  %v9795_v37 = vld [vmem:[#allocation6 + $0x684] ss:$16 sps:$4 sm:$0xff]   ;;  %v9798_v38 = vld [vmem:[#allocation6 + $0x68c] ss:$16 sps:$4 sm:$0xff]  }
 0x139   :  { %4948 = vmatprep.subr.bf16.mxu0 %v9711_v39  ;;  %5464 = vmatprep.subr.bf16.mxu1 %v9714_v40  ;;  %v9793_v39 = vld [vmem:[#allocation6 + $0x680] ss:$16 sps:$4 sm:$0xff]   ;;  %v9796_v40 = vld [vmem:[#allocation6 + $0x688] ss:$16 sps:$4 sm:$0xff]  }
 0x13c   :  { %4949 = vmatpush1.bf16.msra.mxu0 %v9709_v41  ;;  %5465 = vmatpush1.bf16.msra.mxu1 %v9712_v42  ;;  %v9801_v41 = vld [vmem:[#allocation6 + $0x6a4] ss:$16 sps:$4 sm:$0xff]   ;;  %v9804_v42 = vld [vmem:[#allocation6 + $0x6ac] ss:$16 sps:$4 sm:$0xff]  }
 0x13d   :  { %4950 = vmatprep.subr.bf16.mxu0 %v9717_v43  ;;  %5466 = vmatprep.subr.bf16.mxu1 %v9720_v44  ;;  %v9799_v43 = vld [vmem:[#allocation6 + $0x6a0] ss:$16 sps:$4 sm:$0xff]   ;;  %v9802_v44 = vld [vmem:[#allocation6 + $0x6a8] ss:$16 sps:$4 sm:$0xff]  }
 0x140   :  { %4951 = vmatpush1.bf16.msra.mxu0 %v9715_v45  ;;  %5467 = vmatpush1.bf16.msra.mxu1 %v9718_v46  ;;  %v9807_v45 = vld [vmem:[#allocation6 + $0x6c4] ss:$16 sps:$4 sm:$0xff]   ;;  %v9810_v46 = vld [vmem:[#allocation6 + $0x6cc] ss:$16 sps:$4 sm:$0xff]  }
 0x141   :  { %4952 = vmatprep.subr.bf16.mxu0 %v9723_v47  ;;  %5468 = vmatprep.subr.bf16.mxu1 %v9726_v48  ;;  %v9805_v47 = vld [vmem:[#allocation6 + $0x6c0] ss:$16 sps:$4 sm:$0xff]   ;;  %v9808_v48 = vld [vmem:[#allocation6 + $0x6c8] ss:$16 sps:$4 sm:$0xff]  }
 0x144   :  { %4953 = vmatpush1.bf16.msra.mxu0 %v9721_v49  ;;  %5469 = vmatpush1.bf16.msra.mxu1 %v9724_v50  ;;  %v9813_v49 = vld [vmem:[#allocation6 + $0x6e4] ss:$16 sps:$4 sm:$0xff]   ;;  %v9816_v50 = vld [vmem:[#allocation6 + $0x6ec] ss:$16 sps:$4 sm:$0xff]  }
 0x145   :  { %4954 = vmatprep.subr.bf16.mxu0 %v9729_v51  ;;  %5470 = vmatprep.subr.bf16.mxu1 %v9732_v52  ;;  %v9811_v51 = vld [vmem:[#allocation6 + $0x6e0] ss:$16 sps:$4 sm:$0xff]   ;;  %v9814_v52 = vld [vmem:[#allocation6 + $0x6e8] ss:$16 sps:$4 sm:$0xff]  }
 0x148   :  { %4955 = vmatpush1.bf16.msra.mxu0 %v9727_v53  ;;  %5471 = vmatpush1.bf16.msra.mxu1 %v9730_v54  ;;  %v9819_v53 = vld [vmem:[#allocation6 + $0x704] ss:$16 sps:$4 sm:$0xff]   ;;  %v9822_v54 = vld [vmem:[#allocation6 + $0x70c] ss:$16 sps:$4 sm:$0xff]  }
 0x149   :  { %4956 = vmatprep.subr.bf16.mxu0 %v9735_v55  ;;  %5472 = vmatprep.subr.bf16.mxu1 %v9738_v56  ;;  %v9817_v55 = vld [vmem:[#allocation6 + $0x700] ss:$16 sps:$4 sm:$0xff]   ;;  %v9820_v56 = vld [vmem:[#allocation6 + $0x708] ss:$16 sps:$4 sm:$0xff]  }
 0x14c   :  { %4957 = vmatpush1.bf16.msra.mxu0 %v9733_v57  ;;  %5473 = vmatpush1.bf16.msra.mxu1 %v9736_v58  ;;  %v9825_v57 = vld [vmem:[#allocation6 + $0x724] ss:$16 sps:$4 sm:$0xff]   ;;  %v9828_v58 = vld [vmem:[#allocation6 + $0x72c] ss:$16 sps:$4 sm:$0xff]  }
 0x14d   :  { %4958 = vmatprep.subr.bf16.mxu0 %v9741_v59  ;;  %5474 = vmatprep.subr.bf16.mxu1 %v9744_v60  ;;  %v9823_v59 = vld [vmem:[#allocation6 + $0x720] ss:$16 sps:$4 sm:$0xff]   ;;  %v9826_v60 = vld [vmem:[#allocation6 + $0x728] ss:$16 sps:$4 sm:$0xff]  }
 0x150   :  { %4959 = vmatpush1.bf16.msra.mxu0 %v9739_v61  ;;  %5475 = vmatpush1.bf16.msra.mxu1 %v9742_v62  ;;  %v9831_v61 = vld [vmem:[#allocation6 + $0x744] ss:$16 sps:$4 sm:$0xff]   ;;  %v9834_v62 = vld [vmem:[#allocation6 + $0x74c] ss:$16 sps:$4 sm:$0xff]  }
 0x151   :  { %4960 = vmatprep.subr.bf16.mxu0 %v9747_v63  ;;  %5476 = vmatprep.subr.bf16.mxu1 %v9750_v0  ;;  %v9829_v63 = vld [vmem:[#allocation6 + $0x740] ss:$16 sps:$4 sm:$0xff]   ;;  %v9832_v0 = vld [vmem:[#allocation6 + $0x748] ss:$16 sps:$4 sm:$0xff]  }
 0x154   :  { %4961 = vmatpush1.bf16.msra.mxu0 %v9745_v1  ;;  %5477 = vmatpush1.bf16.msra.mxu1 %v9748_v2  ;;  %v9837_v1 = vld [vmem:[#allocation6 + $0x764] ss:$16 sps:$4 sm:$0xff]   ;;  %v9840_v2 = vld [vmem:[#allocation6 + $0x76c] ss:$16 sps:$4 sm:$0xff]  }
 0x155   :  { %4962 = vmatprep.subr.bf16.mxu0 %v9753_v3  ;;  %5478 = vmatprep.subr.bf16.mxu1 %v9756_v4  ;;  %v9835_v3 = vld [vmem:[#allocation6 + $0x760] ss:$16 sps:$4 sm:$0xff]   ;;  %v9838_v4 = vld [vmem:[#allocation6 + $0x768] ss:$16 sps:$4 sm:$0xff]  }
 0x158   :  { %4963 = vmatpush1.bf16.msra.mxu0 %v9751_v5  ;;  %5479 = vmatpush1.bf16.msra.mxu1 %v9754_v6  ;;  %v9843_v5 = vld [vmem:[#allocation6 + $0x784] ss:$16 sps:$4 sm:$0xff]   ;;  %v9846_v6 = vld [vmem:[#allocation6 + $0x78c] ss:$16 sps:$4 sm:$0xff]  }
 0x159   :  { %4964 = vmatprep.subr.bf16.mxu0 %v9759_v7  ;;  %5480 = vmatprep.subr.bf16.mxu1 %v9762_v8  ;;  %v9841_v7 = vld [vmem:[#allocation6 + $0x780] ss:$16 sps:$4 sm:$0xff]   ;;  %v9844_v8 = vld [vmem:[#allocation6 + $0x788] ss:$16 sps:$4 sm:$0xff]  }
 0x15c   :  { %4965 = vmatpush1.bf16.msra.mxu0 %v9757_v9  ;;  %5481 = vmatpush1.bf16.msra.mxu1 %v9760_v10  ;;  %v9849_v9 = vld [vmem:[#allocation6 + $0x7a4] ss:$16 sps:$4 sm:$0xff]   ;;  %v9852_v10 = vld [vmem:[#allocation6 + $0x7ac] ss:$16 sps:$4 sm:$0xff]  }
 0x15d   :  { %4966 = vmatprep.subr.bf16.mxu0 %v9765_v11  ;;  %5482 = vmatprep.subr.bf16.mxu1 %v9768_v12  ;;  %v9847_v11 = vld [vmem:[#allocation6 + $0x7a0] ss:$16 sps:$4 sm:$0xff]   ;;  %v9850_v12 = vld [vmem:[#allocation6 + $0x7a8] ss:$16 sps:$4 sm:$0xff]  }
 0x160   :  { %4967 = vmatpush1.bf16.msra.mxu0 %v9763_v13  ;;  %5483 = vmatpush1.bf16.msra.mxu1 %v9766_v14  ;;  %v9855_v13 = vld [vmem:[#allocation6 + $0x7c4] ss:$16 sps:$4 sm:$0xff]   ;;  %v9858_v14 = vld [vmem:[#allocation6 + $0x7cc] ss:$16 sps:$4 sm:$0xff]  }
 0x161   :  { %4979 = vmatprep.subr.bf16.mxu0 %v9771_v15  ;;  %5495 = vmatprep.subr.bf16.mxu1 %v9774_v18  ;;  %v9853_v15 = vld [vmem:[#allocation6 + $0x7c0] ss:$16 sps:$4 sm:$0xff]   ;;  %v9864_v18 = vld [vmem:[#allocation6 + $0x7ec] ss:$16 sps:$4 sm:$0xff]  }
 0x163   :  { %4969 = vmatmul.mubr.bf16.vlgmr.msra.gmra.mrb[0].mxu0 %v200_v21  ;;  %5485 = vmatmul.mubr.bf16.vlgmr.msra.gmra.mrb[0].mxu1 %v200_v21  ;;  %v9867_v21 = vld [vmem:[#allocation6 + $0x804] ss:$16 sps:$4 sm:$0xff]  }
 0x164   :  { %4980 = vmatpush1.bf16.msra.mxu0 %v9769_v19  ;;  %5496 = vmatpush1.bf16.msra.mxu1 %v9772_v20  ;;  %v9859_v19 = vld [vmem:[#allocation6 + $0x7e0] ss:$16 sps:$4 sm:$0xff]   ;;  %v9862_v20 = vld [vmem:[#allocation6 + $0x7e8] ss:$16 sps:$4 sm:$0xff]  }
 0x165   :  { %4981 = vmatprep.subr.bf16.mxu0 %v9777_v24  ;;  %5497 = vmatprep.subr.bf16.mxu1 %v9780_v25  ;;  %v9870_v24 = vld [vmem:[#allocation6 + $0x80c] ss:$16 sps:$4 sm:$0xff]   ;;  %v9865_v25 = vld [vmem:[#allocation6 + $0x800] ss:$16 sps:$4 sm:$0xff]  }
 0x166   :  { %5011 = vmatprep.mubr.bf16.mxu0 %v203_v26  ;;  %5527 = vmatprep.mubr.bf16.mxu1 %v203_v26  ;;  %v9868_v26 = vld [vmem:[#allocation6 + $0x808] ss:$16 sps:$4 sm:$0xff]  }
 0x168   :  { %4982 = vmatpush1.bf16.msra.mxu0 %v9775_v27  ;;  %5498 = vmatpush1.bf16.msra.mxu1 %v9778_v28  ;;  %v202_v27 = vpack.c.bf16 %v178_v23, %v154_v22  ;;  %v157_v28 = vld [vmem:[#allocation3 + $0x48] sm:$0xff]  ;;  %v9957_v23 = vld [vmem:[#allocation6 + $0x9e4] ss:$16 sps:$4 sm:$0xff]  }
 0x169   :  { %4983 = vmatprep.subr.bf16.mxu0 %v9783_v29  ;;  %5499 = vmatprep.subr.bf16.mxu1 %v9786_v30  ;;  %v181_v29 = vld [vmem:[#allocation3 + $0x108] sm:$0xff]  ;;  %v9873_v30 = vld [vmem:[#allocation6 + $0x824] ss:$16 sps:$4 sm:$0xff]  }
 0x16a   :  { %v9952_v22 = vld [vmem:[#allocation6 + $0x9c8] ss:$16 sps:$4 sm:$0xff]  }
 0x16c   :  { %4984 = vmatpush1.bf16.msra.mxu0 %v9781_v31  ;;  %5500 = vmatpush1.bf16.msra.mxu1 %v9784_v32  ;;  %v9876_v31 = vld [vmem:[#allocation6 + $0x82c] ss:$16 sps:$4 sm:$0xff]   ;;  %v205_v32 = vpack.c.bf16 %v181_v29, %v157_v28  ;;  %v156_v29 = vld [vmem:[#allocation3 + $0x40] sm:$0xff] }
 0x16d   :  { %4985 = vmatprep.subr.bf16.mxu0 %v9789_v33  ;;  %5501 = vmatprep.subr.bf16.mxu1 %v9792_v34  ;;  %v9871_v33 = vld [vmem:[#allocation6 + $0x820] ss:$16 sps:$4 sm:$0xff]   ;;  %v9874_v34 = vld [vmem:[#allocation6 + $0x828] ss:$16 sps:$4 sm:$0xff]   ;;  %v9966_v28 = vld [vmem:[#allocation6 + $0xa0c] ss:$16 sps:$4 sm:$0xff]  }
 0x170   :  { %4986 = vmatpush1.bf16.msra.mxu0 %v9787_v35  ;;  %5502 = vmatpush1.bf16.msra.mxu1 %v9790_v36  ;;  %v9879_v35 = vld [vmem:[#allocation6 + $0x844] ss:$16 sps:$4 sm:$0xff]   ;;  %v9882_v36 = vld [vmem:[#allocation6 + $0x84c] ss:$16 sps:$4 sm:$0xff]  }
 0x171   :  { %4987 = vmatprep.subr.bf16.mxu0 %v9795_v37  ;;  %5503 = vmatprep.subr.bf16.mxu1 %v9798_v38  ;;  %v9877_v37 = vld [vmem:[#allocation6 + $0x840] ss:$16 sps:$4 sm:$0xff]   ;;  %v9880_v38 = vld [vmem:[#allocation6 + $0x848] ss:$16 sps:$4 sm:$0xff]  }
 0x174   :  { %4988 = vmatpush1.bf16.msra.mxu0 %v9793_v39  ;;  %5504 = vmatpush1.bf16.msra.mxu1 %v9796_v40  ;;  %v9885_v39 = vld [vmem:[#allocation6 + $0x864] ss:$16 sps:$4 sm:$0xff]   ;;  %v9888_v40 = vld [vmem:[#allocation6 + $0x86c] ss:$16 sps:$4 sm:$0xff]  }
 0x175   :  { %4989 = vmatprep.subr.bf16.mxu0 %v9801_v41  ;;  %5505 = vmatprep.subr.bf16.mxu1 %v9804_v42  ;;  %v9883_v41 = vld [vmem:[#allocation6 + $0x860] ss:$16 sps:$4 sm:$0xff]   ;;  %v9886_v42 = vld [vmem:[#allocation6 + $0x868] ss:$16 sps:$4 sm:$0xff]  }
 0x178   :  { %4990 = vmatpush1.bf16.msra.mxu0 %v9799_v43  ;;  %5506 = vmatpush1.bf16.msra.mxu1 %v9802_v44  ;;  %v9891_v43 = vld [vmem:[#allocation6 + $0x884] ss:$16 sps:$4 sm:$0xff]   ;;  %v9894_v44 = vld [vmem:[#allocation6 + $0x88c] ss:$16 sps:$4 sm:$0xff]  }
 0x179   :  { %4991 = vmatprep.subr.bf16.mxu0 %v9807_v45  ;;  %5507 = vmatprep.subr.bf16.mxu1 %v9810_v46  ;;  %v9889_v45 = vld [vmem:[#allocation6 + $0x880] ss:$16 sps:$4 sm:$0xff]   ;;  %v9892_v46 = vld [vmem:[#allocation6 + $0x888] ss:$16 sps:$4 sm:$0xff]  }
 0x17c   :  { %4992 = vmatpush1.bf16.msra.mxu0 %v9805_v47  ;;  %5508 = vmatpush1.bf16.msra.mxu1 %v9808_v48  ;;  %v9897_v47 = vld [vmem:[#allocation6 + $0x8a4] ss:$16 sps:$4 sm:$0xff]   ;;  %v9900_v48 = vld [vmem:[#allocation6 + $0x8ac] ss:$16 sps:$4 sm:$0xff]  }
 0x17d   :  { %4993 = vmatprep.subr.bf16.mxu0 %v9813_v49  ;;  %5509 = vmatprep.subr.bf16.mxu1 %v9816_v50  ;;  %v9895_v49 = vld [vmem:[#allocation6 + $0x8a0] ss:$16 sps:$4 sm:$0xff]   ;;  %v9898_v50 = vld [vmem:[#allocation6 + $0x8a8] ss:$16 sps:$4 sm:$0xff]  }
 0x180   :  { %4994 = vmatpush1.bf16.msra.mxu0 %v9811_v51  ;;  %5510 = vmatpush1.bf16.msra.mxu1 %v9814_v52  ;;  %v9903_v51 = vld [vmem:[#allocation6 + $0x8c4] ss:$16 sps:$4 sm:$0xff]   ;;  %v9906_v52 = vld [vmem:[#allocation6 + $0x8cc] ss:$16 sps:$4 sm:$0xff]  }
 0x181   :  { %4995 = vmatprep.subr.bf16.mxu0 %v9819_v53  ;;  %5511 = vmatprep.subr.bf16.mxu1 %v9822_v54  ;;  %v9901_v53 = vld [vmem:[#allocation6 + $0x8c0] ss:$16 sps:$4 sm:$0xff]   ;;  %v9904_v54 = vld [vmem:[#allocation6 + $0x8c8] ss:$16 sps:$4 sm:$0xff]  }
 0x184   :  { %4996 = vmatpush1.bf16.msra.mxu0 %v9817_v55  ;;  %5512 = vmatpush1.bf16.msra.mxu1 %v9820_v56  ;;  %v9909_v55 = vld [vmem:[#allocation6 + $0x8e4] ss:$16 sps:$4 sm:$0xff]   ;;  %v9912_v56 = vld [vmem:[#allocation6 + $0x8ec] ss:$16 sps:$4 sm:$0xff]  }
 0x185   :  { %4997 = vmatprep.subr.bf16.mxu0 %v9825_v57  ;;  %5513 = vmatprep.subr.bf16.mxu1 %v9828_v58  ;;  %v9907_v57 = vld [vmem:[#allocation6 + $0x8e0] ss:$16 sps:$4 sm:$0xff]   ;;  %v9910_v58 = vld [vmem:[#allocation6 + $0x8e8] ss:$16 sps:$4 sm:$0xff]  }
 0x188   :  { %4998 = vmatpush1.bf16.msra.mxu0 %v9823_v59  ;;  %5514 = vmatpush1.bf16.msra.mxu1 %v9826_v60  ;;  %v9915_v59 = vld [vmem:[#allocation6 + $0x904] ss:$16 sps:$4 sm:$0xff]   ;;  %v9918_v60 = vld [vmem:[#allocation6 + $0x90c] ss:$16 sps:$4 sm:$0xff]  }
 0x189   :  { %4999 = vmatprep.subr.bf16.mxu0 %v9831_v61  ;;  %5515 = vmatprep.subr.bf16.mxu1 %v9834_v62  ;;  %v9913_v61 = vld [vmem:[#allocation6 + $0x900] ss:$16 sps:$4 sm:$0xff]   ;;  %v9916_v62 = vld [vmem:[#allocation6 + $0x908] ss:$16 sps:$4 sm:$0xff]  }
 0x18c   :  { %5000 = vmatpush1.bf16.msra.mxu0 %v9829_v63  ;;  %5516 = vmatpush1.bf16.msra.mxu1 %v9832_v0  ;;  %v9921_v63 = vld [vmem:[#allocation6 + $0x924] ss:$16 sps:$4 sm:$0xff]   ;;  %v9924_v0 = vld [vmem:[#allocation6 + $0x92c] ss:$16 sps:$4 sm:$0xff]  }
 0x18d   :  { %5001 = vmatprep.subr.bf16.mxu0 %v9837_v1  ;;  %5517 = vmatprep.subr.bf16.mxu1 %v9840_v2  ;;  %v9919_v1 = vld [vmem:[#allocation6 + $0x920] ss:$16 sps:$4 sm:$0xff]   ;;  %v9922_v2 = vld [vmem:[#allocation6 + $0x928] ss:$16 sps:$4 sm:$0xff]  }
 0x190   :  { %5002 = vmatpush1.bf16.msra.mxu0 %v9835_v3  ;;  %5518 = vmatpush1.bf16.msra.mxu1 %v9838_v4  ;;  %v9927_v3 = vld [vmem:[#allocation6 + $0x944] ss:$16 sps:$4 sm:$0xff]   ;;  %v9930_v4 = vld [vmem:[#allocation6 + $0x94c] ss:$16 sps:$4 sm:$0xff]  }
 0x191   :  { %5003 = vmatprep.subr.bf16.mxu0 %v9843_v5  ;;  %5519 = vmatprep.subr.bf16.mxu1 %v9846_v6  ;;  %v9925_v5 = vld [vmem:[#allocation6 + $0x940] ss:$16 sps:$4 sm:$0xff]   ;;  %v9928_v6 = vld [vmem:[#allocation6 + $0x948] ss:$16 sps:$4 sm:$0xff]  }
 0x194   :  { %5004 = vmatpush1.bf16.msra.mxu0 %v9841_v7  ;;  %5520 = vmatpush1.bf16.msra.mxu1 %v9844_v8  ;;  %v9933_v7 = vld [vmem:[#allocation6 + $0x964] ss:$16 sps:$4 sm:$0xff]   ;;  %v9936_v8 = vld [vmem:[#allocation6 + $0x96c] ss:$16 sps:$4 sm:$0xff]  }
 0x195   :  { %5005 = vmatprep.subr.bf16.mxu0 %v9849_v9  ;;  %5521 = vmatprep.subr.bf16.mxu1 %v9852_v10  ;;  %v9931_v9 = vld [vmem:[#allocation6 + $0x960] ss:$16 sps:$4 sm:$0xff]   ;;  %v9934_v10 = vld [vmem:[#allocation6 + $0x968] ss:$16 sps:$4 sm:$0xff]  }
 0x198   :  { %5006 = vmatpush1.bf16.msra.mxu0 %v9847_v11  ;;  %5522 = vmatpush1.bf16.msra.mxu1 %v9850_v12  ;;  %v9939_v11 = vld [vmem:[#allocation6 + $0x984] ss:$16 sps:$4 sm:$0xff]   ;;  %v9942_v12 = vld [vmem:[#allocation6 + $0x98c] ss:$16 sps:$4 sm:$0xff]  }
 0x199   :  { %5007 = vmatprep.subr.bf16.mxu0 %v9855_v13  ;;  %5523 = vmatprep.subr.bf16.mxu1 %v9858_v14  ;;  %v9937_v13 = vld [vmem:[#allocation6 + $0x980] ss:$16 sps:$4 sm:$0xff]   ;;  %v9940_v14 = vld [vmem:[#allocation6 + $0x988] ss:$16 sps:$4 sm:$0xff]  }
 0x19c   :  { %5008 = vmatpush1.bf16.msra.mxu0 %v9853_v15  ;;  %5524 = vmatpush1.bf16.msra.mxu1 %v9856_v16  ;;  %v9945_v15 = vld [vmem:[#allocation6 + $0x9a4] ss:$16 sps:$4 sm:$0xff]   ;;  %v9948_v16 = vld [vmem:[#allocation6 + $0x9ac] ss:$16 sps:$4 sm:$0xff]  }
 0x19d   :  { %5009 = vmatprep.subr.bf16.mxu0 %v9861_v17  ;;  %5525 = vmatprep.subr.bf16.mxu1 %v9864_v18  ;;  %v9943_v17 = vld [vmem:[#allocation6 + $0x9a0] ss:$16 sps:$4 sm:$0xff]   ;;  %v9946_v18 = vld [vmem:[#allocation6 + $0x9a8] ss:$16 sps:$4 sm:$0xff]  }
 0x1a0   :  { %5010 = vmatpush1.bf16.msra.mxu0 %v9859_v19  ;;  %5526 = vmatpush1.bf16.msra.mxu1 %v9862_v20  ;;  %v9951_v19 = vld [vmem:[#allocation6 + $0x9c4] ss:$16 sps:$4 sm:$0xff]   ;;  %v9954_v20 = vld [vmem:[#allocation6 + $0x9cc] ss:$16 sps:$4 sm:$0xff]  }
 0x1a1   :  { %5022 = vmatprep.subr.bf16.mxu0 %v9867_v21  ;;  %5538 = vmatprep.subr.bf16.mxu1 %v9870_v24  ;;  %v9949_v21 = vld [vmem:[#allocation6 + $0x9c0] ss:$16 sps:$4 sm:$0xff]   ;;  %v9960_v24 = vld [vmem:[#allocation6 + $0x9ec] ss:$16 sps:$4 sm:$0xff]  }
 0x1a3   :  { %5012 = vmatmul.mubr.bf16.vlgmr.msra.gmra.mrb[0].mxu0 %v202_v27  ;;  %5528 = vmatmul.mubr.bf16.vlgmr.msra.gmra.mrb[0].mxu1 %v202_v27  ;;  %v9963_v27 = vld [vmem:[#allocation6 + $0xa04] ss:$16 sps:$4 sm:$0xff]  }
 0x1a4   :  { %5023 = vmatpush1.bf16.msra.mxu0 %v9865_v25  ;;  %5539 = vmatpush1.bf16.msra.mxu1 %v9868_v26  ;;  %v9955_v25 = vld [vmem:[#allocation6 + $0x9e0] ss:$16 sps:$4 sm:$0xff]   ;;  %v9958_v26 = vld [vmem:[#allocation6 + $0x9e8] ss:$16 sps:$4 sm:$0xff]  }
 0x1a5   :  { %5024 = vmatprep.subr.bf16.mxu0 %v9873_v30  ;;  %5540 = vmatprep.subr.bf16.mxu1 %v9876_v31  ;;  %v180_v30 = vld [vmem:[#allocation3 + $0x100] sm:$0xff]  ;;  %v159_v31 = vld [vmem:[#allocation3 + $0x58] sm:$0xff] }
 0x1a6   :  { %5054 = vmatprep.mubr.bf16.mxu0 %v205_v32  ;;  %5570 = vmatprep.mubr.bf16.mxu1 %v205_v32  ;;  %v183_v32 = vld [vmem:[#allocation3 + $0x118] sm:$0xff] }
 0x1a8   :  { %5025 = vmatpush1.bf16.msra.mxu0 %v9871_v33  ;;  %5541 = vmatpush1.bf16.msra.mxu1 %v9874_v34  ;;  %v204_v33 = vpack.c.bf16 %v180_v30, %v156_v29  ;;  %v9961_v34 = vld [vmem:[#allocation6 + $0xa00] ss:$16 sps:$4 sm:$0xff]   ;;  %v10053_v29 = vld [vmem:[#allocation6 + $0xbe4] ss:$16 sps:$4 sm:$0xff]   ;;  %v10056_v30 = vld [vmem:[#allocation6 + $0xbec] ss:$16 sps:$4 sm:$0xff]  }
 0x1a9   :  { %5026 = vmatprep.subr.bf16.mxu0 %v9879_v35  ;;  %5542 = vmatprep.subr.bf16.mxu1 %v9882_v36  ;;  %v9964_v35 = vld [vmem:[#allocation6 + $0xa08] ss:$16 sps:$4 sm:$0xff]   ;;  %v9969_v36 = vld [vmem:[#allocation6 + $0xa24] ss:$16 sps:$4 sm:$0xff]  }
 0x1ac   :  { %5027 = vmatpush1.bf16.msra.mxu0 %v9877_v37  ;;  %5543 = vmatpush1.bf16.msra.mxu1 %v9880_v38  ;;  %v9972_v37 = vld [vmem:[#allocation6 + $0xa2c] ss:$16 sps:$4 sm:$0xff]   ;;  %v207_v38 = vpack.c.bf16 %v183_v32, %v159_v31  ;;  %v10051_v31 = vld [vmem:[#allocation6 + $0xbe0] ss:$16 sps:$4 sm:$0xff]   ;;  %v10054_v32 = vld [vmem:[#allocation6 + $0xbe8] ss:$16 sps:$4 sm:$0xff]  }
 0x1ad   :  { %5028 = vmatprep.subr.bf16.mxu0 %v9885_v39  ;;  %5544 = vmatprep.subr.bf16.mxu1 %v9888_v40  ;;  %v9967_v39 = vld [vmem:[#allocation6 + $0xa20] ss:$16 sps:$4 sm:$0xff]   ;;  %v9970_v40 = vld [vmem:[#allocation6 + $0xa28] ss:$16 sps:$4 sm:$0xff]  }
 0x1b0   :  { %5029 = vmatpush1.bf16.msra.mxu0 %v9883_v41  ;;  %5545 = vmatpush1.bf16.msra.mxu1 %v9886_v42  ;;  %v9975_v41 = vld [vmem:[#allocation6 + $0xa44] ss:$16 sps:$4 sm:$0xff]   ;;  %v9978_v42 = vld [vmem:[#allocation6 + $0xa4c] ss:$16 sps:$4 sm:$0xff]  }
 0x1b1   :  { %5030 = vmatprep.subr.bf16.mxu0 %v9891_v43  ;;  %5546 = vmatprep.subr.bf16.mxu1 %v9894_v44  ;;  %v9973_v43 = vld [vmem:[#allocation6 + $0xa40] ss:$16 sps:$4 sm:$0xff]   ;;  %v9976_v44 = vld [vmem:[#allocation6 + $0xa48] ss:$16 sps:$4 sm:$0xff]  }
 0x1b4   :  { %5031 = vmatpush1.bf16.msra.mxu0 %v9889_v45  ;;  %5547 = vmatpush1.bf16.msra.mxu1 %v9892_v46  ;;  %v9981_v45 = vld [vmem:[#allocation6 + $0xa64] ss:$16 sps:$4 sm:$0xff]   ;;  %v9984_v46 = vld [vmem:[#allocation6 + $0xa6c] ss:$16 sps:$4 sm:$0xff]  }
 0x1b5   :  { %5032 = vmatprep.subr.bf16.mxu0 %v9897_v47  ;;  %5548 = vmatprep.subr.bf16.mxu1 %v9900_v48  ;;  %v9979_v47 = vld [vmem:[#allocation6 + $0xa60] ss:$16 sps:$4 sm:$0xff]   ;;  %v9982_v48 = vld [vmem:[#allocation6 + $0xa68] ss:$16 sps:$4 sm:$0xff]  }
 0x1b8   :  { %5033 = vmatpush1.bf16.msra.mxu0 %v9895_v49  ;;  %5549 = vmatpush1.bf16.msra.mxu1 %v9898_v50  ;;  %v9987_v49 = vld [vmem:[#allocation6 + $0xa84] ss:$16 sps:$4 sm:$0xff]   ;;  %v9990_v50 = vld [vmem:[#allocation6 + $0xa8c] ss:$16 sps:$4 sm:$0xff]  }
 0x1b9   :  { %5034 = vmatprep.subr.bf16.mxu0 %v9903_v51  ;;  %5550 = vmatprep.subr.bf16.mxu1 %v9906_v52  ;;  %v9985_v51 = vld [vmem:[#allocation6 + $0xa80] ss:$16 sps:$4 sm:$0xff]   ;;  %v9988_v52 = vld [vmem:[#allocation6 + $0xa88] ss:$16 sps:$4 sm:$0xff]  }
 0x1bc   :  { %5035 = vmatpush1.bf16.msra.mxu0 %v9901_v53  ;;  %5551 = vmatpush1.bf16.msra.mxu1 %v9904_v54  ;;  %v9993_v53 = vld [vmem:[#allocation6 + $0xaa4] ss:$16 sps:$4 sm:$0xff]   ;;  %v9996_v54 = vld [vmem:[#allocation6 + $0xaac] ss:$16 sps:$4 sm:$0xff]  }
 0x1bd   :  { %5036 = vmatprep.subr.bf16.mxu0 %v9909_v55  ;;  %5552 = vmatprep.subr.bf16.mxu1 %v9912_v56  ;;  %v9991_v55 = vld [vmem:[#allocation6 + $0xaa0] ss:$16 sps:$4 sm:$0xff]   ;;  %v9994_v56 = vld [vmem:[#allocation6 + $0xaa8] ss:$16 sps:$4 sm:$0xff]  }
 0x1c0   :  { %5037 = vmatpush1.bf16.msra.mxu0 %v9907_v57  ;;  %5553 = vmatpush1.bf16.msra.mxu1 %v9910_v58  ;;  %v9999_v57 = vld [vmem:[#allocation6 + $0xac4] ss:$16 sps:$4 sm:$0xff]   ;;  %v10002_v58 = vld [vmem:[#allocation6 + $0xacc] ss:$16 sps:$4 sm:$0xff]  }
 0x1c1   :  { %5038 = vmatprep.subr.bf16.mxu0 %v9915_v59  ;;  %5554 = vmatprep.subr.bf16.mxu1 %v9918_v60  ;;  %v9997_v59 = vld [vmem:[#allocation6 + $0xac0] ss:$16 sps:$4 sm:$0xff]   ;;  %v10000_v60 = vld [vmem:[#allocation6 + $0xac8] ss:$16 sps:$4 sm:$0xff]  }
 0x1c4   :  { %5039 = vmatpush1.bf16.msra.mxu0 %v9913_v61  ;;  %5555 = vmatpush1.bf16.msra.mxu1 %v9916_v62  ;;  %v10005_v61 = vld [vmem:[#allocation6 + $0xae4] ss:$16 sps:$4 sm:$0xff]   ;;  %v10008_v62 = vld [vmem:[#allocation6 + $0xaec] ss:$16 sps:$4 sm:$0xff]  }
 0x1c5   :  { %5040 = vmatprep.subr.bf16.mxu0 %v9921_v63  ;;  %5556 = vmatprep.subr.bf16.mxu1 %v9924_v0  ;;  %v10003_v63 = vld [vmem:[#allocation6 + $0xae0] ss:$16 sps:$4 sm:$0xff]   ;;  %v10006_v0 = vld [vmem:[#allocation6 + $0xae8] ss:$16 sps:$4 sm:$0xff]  }
 0x1c8   :  { %5041 = vmatpush1.bf16.msra.mxu0 %v9919_v1  ;;  %5557 = vmatpush1.bf16.msra.mxu1 %v9922_v2  ;;  %v10011_v1 = vld [vmem:[#allocation6 + $0xb04] ss:$16 sps:$4 sm:$0xff]   ;;  %v10014_v2 = vld [vmem:[#allocation6 + $0xb0c] ss:$16 sps:$4 sm:$0xff]  }
 0x1c9   :  { %5042 = vmatprep.subr.bf16.mxu0 %v9927_v3  ;;  %5558 = vmatprep.subr.bf16.mxu1 %v9930_v4  ;;  %v10009_v3 = vld [vmem:[#allocation6 + $0xb00] ss:$16 sps:$4 sm:$0xff]   ;;  %v10012_v4 = vld [vmem:[#allocation6 + $0xb08] ss:$16 sps:$4 sm:$0xff]  }
 0x1cc   :  { %5043 = vmatpush1.bf16.msra.mxu0 %v9925_v5  ;;  %5559 = vmatpush1.bf16.msra.mxu1 %v9928_v6  ;;  %v10017_v5 = vld [vmem:[#allocation6 + $0xb24] ss:$16 sps:$4 sm:$0xff]   ;;  %v10020_v6 = vld [vmem:[#allocation6 + $0xb2c] ss:$16 sps:$4 sm:$0xff]  }
 0x1cd   :  { %5044 = vmatprep.subr.bf16.mxu0 %v9933_v7  ;;  %5560 = vmatprep.subr.bf16.mxu1 %v9936_v8  ;;  %v10015_v7 = vld [vmem:[#allocation6 + $0xb20] ss:$16 sps:$4 sm:$0xff]   ;;  %v10018_v8 = vld [vmem:[#allocation6 + $0xb28] ss:$16 sps:$4 sm:$0xff]  }
 0x1d0   :  { %5045 = vmatpush1.bf16.msra.mxu0 %v9931_v9  ;;  %5561 = vmatpush1.bf16.msra.mxu1 %v9934_v10  ;;  %v10023_v9 = vld [vmem:[#allocation6 + $0xb44] ss:$16 sps:$4 sm:$0xff]   ;;  %v10026_v10 = vld [vmem:[#allocation6 + $0xb4c] ss:$16 sps:$4 sm:$0xff]  }
 0x1d1   :  { %5046 = vmatprep.subr.bf16.mxu0 %v9939_v11  ;;  %5562 = vmatprep.subr.bf16.mxu1 %v9942_v12  ;;  %v10021_v11 = vld [vmem:[#allocation6 + $0xb40] ss:$16 sps:$4 sm:$0xff]   ;;  %v10024_v12 = vld [vmem:[#allocation6 + $0xb48] ss:$16 sps:$4 sm:$0xff]  }
 0x1d4   :  { %5047 = vmatpush1.bf16.msra.mxu0 %v9937_v13  ;;  %5563 = vmatpush1.bf16.msra.mxu1 %v9940_v14  ;;  %v10029_v13 = vld [vmem:[#allocation6 + $0xb64] ss:$16 sps:$4 sm:$0xff]   ;;  %v10032_v14 = vld [vmem:[#allocation6 + $0xb6c] ss:$16 sps:$4 sm:$0xff]  }
 0x1d5   :  { %5048 = vmatprep.subr.bf16.mxu0 %v9945_v15  ;;  %5564 = vmatprep.subr.bf16.mxu1 %v9948_v16  ;;  %v10027_v15 = vld [vmem:[#allocation6 + $0xb60] ss:$16 sps:$4 sm:$0xff]   ;;  %v10030_v16 = vld [vmem:[#allocation6 + $0xb68] ss:$16 sps:$4 sm:$0xff]  }
 0x1d8   :  { %5049 = vmatpush1.bf16.msra.mxu0 %v9943_v17  ;;  %5565 = vmatpush1.bf16.msra.mxu1 %v9946_v18  ;;  %v10035_v17 = vld [vmem:[#allocation6 + $0xb84] ss:$16 sps:$4 sm:$0xff]   ;;  %v10038_v18 = vld [vmem:[#allocation6 + $0xb8c] ss:$16 sps:$4 sm:$0xff]  }
 0x1d9   :  { %5050 = vmatprep.subr.bf16.mxu0 %v9951_v19  ;;  %5566 = vmatprep.subr.bf16.mxu1 %v9954_v20  ;;  %v10033_v19 = vld [vmem:[#allocation6 + $0xb80] ss:$16 sps:$4 sm:$0xff]   ;;  %v10036_v20 = vld [vmem:[#allocation6 + $0xb88] ss:$16 sps:$4 sm:$0xff]  }
 0x1dc   :  { %5051 = vmatpush1.bf16.msra.mxu0 %v9949_v21  ;;  %5567 = vmatpush1.bf16.msra.mxu1 %v9952_v22  ;;  %v10041_v21 = vld [vmem:[#allocation6 + $0xba4] ss:$16 sps:$4 sm:$0xff]   ;;  %v10044_v22 = vld [vmem:[#allocation6 + $0xbac] ss:$16 sps:$4 sm:$0xff]  }
 0x1dd   :  { %5052 = vmatprep.subr.bf16.mxu0 %v9957_v23  ;;  %5568 = vmatprep.subr.bf16.mxu1 %v9960_v24  ;;  %v10039_v23 = vld [vmem:[#allocation6 + $0xba0] ss:$16 sps:$4 sm:$0xff]   ;;  %v10042_v24 = vld [vmem:[#allocation6 + $0xba8] ss:$16 sps:$4 sm:$0xff]  }
 0x1e0   :  { %5053 = vmatpush1.bf16.msra.mxu0 %v9955_v25  ;;  %5569 = vmatpush1.bf16.msra.mxu1 %v9958_v26  ;;  %v10047_v25 = vld [vmem:[#allocation6 + $0xbc4] ss:$16 sps:$4 sm:$0xff]   ;;  %v10050_v26 = vld [vmem:[#allocation6 + $0xbcc] ss:$16 sps:$4 sm:$0xff]  }
 0x1e1   :  { %5065 = vmatprep.subr.bf16.mxu0 %v9963_v27  ;;  %5581 = vmatprep.subr.bf16.mxu1 %v9966_v28  ;;  %v10045_v27 = vld [vmem:[#allocation6 + $0xbc0] ss:$16 sps:$4 sm:$0xff]   ;;  %v10048_v28 = vld [vmem:[#allocation6 + $0xbc8] ss:$16 sps:$4 sm:$0xff]  }
 0x1e3   :  { %5055 = vmatmul.mubr.bf16.vlgmr.msra.gmra.mrb[0].mxu0 %v204_v33  ;;  %5571 = vmatmul.mubr.bf16.vlgmr.msra.gmra.mrb[0].mxu1 %v204_v33  ;;  %v10059_v33 = vld [vmem:[#allocation6 + $0xc04] ss:$16 sps:$4 sm:$0xff]  }
 0x1e4   :  { %5066 = vmatpush1.bf16.msra.mxu0 %v9961_v34  ;;  %5582 = vmatpush1.bf16.msra.mxu1 %v9964_v35  ;;  %v10062_v34 = vld [vmem:[#allocation6 + $0xc0c] ss:$16 sps:$4 sm:$0xff]   ;;  %v158_v35 = vld [vmem:[#allocation3 + $0x50] sm:$0xff] }
 0x1e5   :  { %5067 = vmatprep.subr.bf16.mxu0 %v9969_v36  ;;  %5583 = vmatprep.subr.bf16.mxu1 %v9972_v37  ;;  %v182_v36 = vld [vmem:[#allocation3 + $0x110] sm:$0xff]  ;;  %v161_v37 = vld [vmem:[#allocation3 + $0x68] sm:$0xff] }
 0x1e6   :  { %5097 = vmatprep.mubr.bf16.mxu0 %v207_v38  ;;  %5613 = vmatprep.mubr.bf16.mxu1 %v207_v38  ;;  %v185_v38 = vld [vmem:[#allocation3 + $0x128] sm:$0xff] }
 0x1e8   :  { %5068 = vmatpush1.bf16.msra.mxu0 %v9967_v39  ;;  %5584 = vmatpush1.bf16.msra.mxu1 %v9970_v40  ;;  %v206_v39 = vpack.c.bf16 %v182_v36, %v158_v35  ;;  %v10057_v40 = vld [vmem:[#allocation6 + $0xc00] ss:$16 sps:$4 sm:$0xff]   ;;  %v10149_v35 = vld [vmem:[#allocation6 + $0xde4] ss:$16 sps:$4 sm:$0xff]   ;;  %v10152_v36 = vld [vmem:[#allocation6 + $0xdec] ss:$16 sps:$4 sm:$0xff]  }
 0x1e9   :  { %5069 = vmatprep.subr.bf16.mxu0 %v9975_v41  ;;  %5585 = vmatprep.subr.bf16.mxu1 %v9978_v42  ;;  %v10060_v41 = vld [vmem:[#allocation6 + $0xc08] ss:$16 sps:$4 sm:$0xff]   ;;  %v10065_v42 = vld [vmem:[#allocation6 + $0xc24] ss:$16 sps:$4 sm:$0xff]  }
 0x1ec   :  { %5070 = vmatpush1.bf16.msra.mxu0 %v9973_v43  ;;  %5586 = vmatpush1.bf16.msra.mxu1 %v9976_v44  ;;  %v10068_v43 = vld [vmem:[#allocation6 + $0xc2c] ss:$16 sps:$4 sm:$0xff]   ;;  %v209_v44 = vpack.c.bf16 %v185_v38, %v161_v37  ;;  %v10147_v37 = vld [vmem:[#allocation6 + $0xde0] ss:$16 sps:$4 sm:$0xff]   ;;  %v10150_v38 = vld [vmem:[#allocation6 + $0xde8] ss:$16 sps:$4 sm:$0xff]  }
 0x1ed   :  { %5071 = vmatprep.subr.bf16.mxu0 %v9981_v45  ;;  %5587 = vmatprep.subr.bf16.mxu1 %v9984_v46  ;;  %v10063_v45 = vld [vmem:[#allocation6 + $0xc20] ss:$16 sps:$4 sm:$0xff]   ;;  %v10066_v46 = vld [vmem:[#allocation6 + $0xc28] ss:$16 sps:$4 sm:$0xff]  }
 0x1f0   :  { %5072 = vmatpush1.bf16.msra.mxu0 %v9979_v47  ;;  %5588 = vmatpush1.bf16.msra.mxu1 %v9982_v48  ;;  %v10071_v47 = vld [vmem:[#allocation6 + $0xc44] ss:$16 sps:$4 sm:$0xff]   ;;  %v10074_v48 = vld [vmem:[#allocation6 + $0xc4c] ss:$16 sps:$4 sm:$0xff]  }
 0x1f1   :  { %5073 = vmatprep.subr.bf16.mxu0 %v9987_v49  ;;  %5589 = vmatprep.subr.bf16.mxu1 %v9990_v50  ;;  %v10069_v49 = vld [vmem:[#allocation6 + $0xc40] ss:$16 sps:$4 sm:$0xff]   ;;  %v10072_v50 = vld [vmem:[#allocation6 + $0xc48] ss:$16 sps:$4 sm:$0xff]  }
 0x1f4   :  { %5074 = vmatpush1.bf16.msra.mxu0 %v9985_v51  ;;  %5590 = vmatpush1.bf16.msra.mxu1 %v9988_v52  ;;  %v10077_v51 = vld [vmem:[#allocation6 + $0xc64] ss:$16 sps:$4 sm:$0xff]   ;;  %v10080_v52 = vld [vmem:[#allocation6 + $0xc6c] ss:$16 sps:$4 sm:$0xff]  }
 0x1f5   :  { %5075 = vmatprep.subr.bf16.mxu0 %v9993_v53  ;;  %5591 = vmatprep.subr.bf16.mxu1 %v9996_v54  ;;  %v10075_v53 = vld [vmem:[#allocation6 + $0xc60] ss:$16 sps:$4 sm:$0xff]   ;;  %v10078_v54 = vld [vmem:[#allocation6 + $0xc68] ss:$16 sps:$4 sm:$0xff]  }
 0x1f8   :  { %5076 = vmatpush1.bf16.msra.mxu0 %v9991_v55  ;;  %5592 = vmatpush1.bf16.msra.mxu1 %v9994_v56  ;;  %v10083_v55 = vld [vmem:[#allocation6 + $0xc84] ss:$16 sps:$4 sm:$0xff]   ;;  %v10086_v56 = vld [vmem:[#allocation6 + $0xc8c] ss:$16 sps:$4 sm:$0xff]  }
 0x1f9   :  { %5077 = vmatprep.subr.bf16.mxu0 %v9999_v57  ;;  %5593 = vmatprep.subr.bf16.mxu1 %v10002_v58  ;;  %v10081_v57 = vld [vmem:[#allocation6 + $0xc80] ss:$16 sps:$4 sm:$0xff]   ;;  %v10084_v58 = vld [vmem:[#allocation6 + $0xc88] ss:$16 sps:$4 sm:$0xff]  }
 0x1fc   :  { %5078 = vmatpush1.bf16.msra.mxu0 %v9997_v59  ;;  %5594 = vmatpush1.bf16.msra.mxu1 %v10000_v60  ;;  %v10089_v59 = vld [vmem:[#allocation6 + $0xca4] ss:$16 sps:$4 sm:$0xff]   ;;  %v10092_v60 = vld [vmem:[#allocation6 + $0xcac] ss:$16 sps:$4 sm:$0xff]  }
 0x1fd   :  { %5079 = vmatprep.subr.bf16.mxu0 %v10005_v61  ;;  %5595 = vmatprep.subr.bf16.mxu1 %v10008_v62  ;;  %v10087_v61 = vld [vmem:[#allocation6 + $0xca0] ss:$16 sps:$4 sm:$0xff]   ;;  %v10090_v62 = vld [vmem:[#allocation6 + $0xca8] ss:$16 sps:$4 sm:$0xff]  }
 0x200   :  { %5080 = vmatpush1.bf16.msra.mxu0 %v10003_v63  ;;  %5596 = vmatpush1.bf16.msra.mxu1 %v10006_v0  ;;  %v10095_v63 = vld [vmem:[#allocation6 + $0xcc4] ss:$16 sps:$4 sm:$0xff]   ;;  %v10098_v0 = vld [vmem:[#allocation6 + $0xccc] ss:$16 sps:$4 sm:$0xff]  }
 0x201   :  { %5081 = vmatprep.subr.bf16.mxu0 %v10011_v1  ;;  %5597 = vmatprep.subr.bf16.mxu1 %v10014_v2  ;;  %v10093_v1 = vld [vmem:[#allocation6 + $0xcc0] ss:$16 sps:$4 sm:$0xff]   ;;  %v10096_v2 = vld [vmem:[#allocation6 + $0xcc8] ss:$16 sps:$4 sm:$0xff]  }
 0x204   :  { %5082 = vmatpush1.bf16.msra.mxu0 %v10009_v3  ;;  %5598 = vmatpush1.bf16.msra.mxu1 %v10012_v4  ;;  %v10101_v3 = vld [vmem:[#allocation6 + $0xce4] ss:$16 sps:$4 sm:$0xff]   ;;  %v10104_v4 = vld [vmem:[#allocation6 + $0xcec] ss:$16 sps:$4 sm:$0xff]  }
 0x205   :  { %5083 = vmatprep.subr.bf16.mxu0 %v10017_v5  ;;  %5599 = vmatprep.subr.bf16.mxu1 %v10020_v6  ;;  %v10099_v5 = vld [vmem:[#allocation6 + $0xce0] ss:$16 sps:$4 sm:$0xff]   ;;  %v10102_v6 = vld [vmem:[#allocation6 + $0xce8] ss:$16 sps:$4 sm:$0xff]  }
 0x208   :  { %5084 = vmatpush1.bf16.msra.mxu0 %v10015_v7  ;;  %5600 = vmatpush1.bf16.msra.mxu1 %v10018_v8  ;;  %v10107_v7 = vld [vmem:[#allocation6 + $0xd04] ss:$16 sps:$4 sm:$0xff]   ;;  %v10110_v8 = vld [vmem:[#allocation6 + $0xd0c] ss:$16 sps:$4 sm:$0xff]  }
 0x209   :  { %5085 = vmatprep.subr.bf16.mxu0 %v10023_v9  ;;  %5601 = vmatprep.subr.bf16.mxu1 %v10026_v10  ;;  %v10105_v9 = vld [vmem:[#allocation6 + $0xd00] ss:$16 sps:$4 sm:$0xff]   ;;  %v10108_v10 = vld [vmem:[#allocation6 + $0xd08] ss:$16 sps:$4 sm:$0xff]  }
 0x20c   :  { %5086 = vmatpush1.bf16.msra.mxu0 %v10021_v11  ;;  %5602 = vmatpush1.bf16.msra.mxu1 %v10024_v12  ;;  %v10113_v11 = vld [vmem:[#allocation6 + $0xd24] ss:$16 sps:$4 sm:$0xff]   ;;  %v10116_v12 = vld [vmem:[#allocation6 + $0xd2c] ss:$16 sps:$4 sm:$0xff]  }
 0x20d   :  { %5087 = vmatprep.subr.bf16.mxu0 %v10029_v13  ;;  %5603 = vmatprep.subr.bf16.mxu1 %v10032_v14  ;;  %v10111_v13 = vld [vmem:[#allocation6 + $0xd20] ss:$16 sps:$4 sm:$0xff]   ;;  %v10114_v14 = vld [vmem:[#allocation6 + $0xd28] ss:$16 sps:$4 sm:$0xff]  }
 0x210   :  { %5088 = vmatpush1.bf16.msra.mxu0 %v10027_v15  ;;  %5604 = vmatpush1.bf16.msra.mxu1 %v10030_v16  ;;  %v10119_v15 = vld [vmem:[#allocation6 + $0xd44] ss:$16 sps:$4 sm:$0xff]   ;;  %v10122_v16 = vld [vmem:[#allocation6 + $0xd4c] ss:$16 sps:$4 sm:$0xff]  }
 0x211   :  { %5089 = vmatprep.subr.bf16.mxu0 %v10035_v17  ;;  %5605 = vmatprep.subr.bf16.mxu1 %v10038_v18  ;;  %v10117_v17 = vld [vmem:[#allocation6 + $0xd40] ss:$16 sps:$4 sm:$0xff]   ;;  %v10120_v18 = vld [vmem:[#allocation6 + $0xd48] ss:$16 sps:$4 sm:$0xff]  }
 0x214   :  { %5090 = vmatpush1.bf16.msra.mxu0 %v10033_v19  ;;  %5606 = vmatpush1.bf16.msra.mxu1 %v10036_v20  ;;  %v10125_v19 = vld [vmem:[#allocation6 + $0xd64] ss:$16 sps:$4 sm:$0xff]   ;;  %v10128_v20 = vld [vmem:[#allocation6 + $0xd6c] ss:$16 sps:$4 sm:$0xff]  }
 0x215   :  { %5091 = vmatprep.subr.bf16.mxu0 %v10041_v21  ;;  %5607 = vmatprep.subr.bf16.mxu1 %v10044_v22  ;;  %v10123_v21 = vld [vmem:[#allocation6 + $0xd60] ss:$16 sps:$4 sm:$0xff]   ;;  %v10126_v22 = vld [vmem:[#allocation6 + $0xd68] ss:$16 sps:$4 sm:$0xff]  }
 0x218   :  { %5092 = vmatpush1.bf16.msra.mxu0 %v10039_v23  ;;  %5608 = vmatpush1.bf16.msra.mxu1 %v10042_v24  ;;  %v10131_v23 = vld [vmem:[#allocation6 + $0xd84] ss:$16 sps:$4 sm:$0xff]   ;;  %v10134_v24 = vld [vmem:[#allocation6 + $0xd8c] ss:$16 sps:$4 sm:$0xff]  }
 0x219   :  { %5093 = vmatprep.subr.bf16.mxu0 %v10047_v25  ;;  %5609 = vmatprep.subr.bf16.mxu1 %v10050_v26  ;;  %v10129_v25 = vld [vmem:[#allocation6 + $0xd80] ss:$16 sps:$4 sm:$0xff]   ;;  %v10132_v26 = vld [vmem:[#allocation6 + $0xd88] ss:$16 sps:$4 sm:$0xff]  }
 0x21c   :  { %5094 = vmatpush1.bf16.msra.mxu0 %v10045_v27  ;;  %5610 = vmatpush1.bf16.msra.mxu1 %v10048_v28  ;;  %v10137_v27 = vld [vmem:[#allocation6 + $0xda4] ss:$16 sps:$4 sm:$0xff]   ;;  %v10140_v28 = vld [vmem:[#allocation6 + $0xdac] ss:$16 sps:$4 sm:$0xff]  }
 0x21d   :  { %5095 = vmatprep.subr.bf16.mxu0 %v10053_v29  ;;  %5611 = vmatprep.subr.bf16.mxu1 %v10056_v30  ;;  %v10135_v29 = vld [vmem:[#allocation6 + $0xda0] ss:$16 sps:$4 sm:$0xff]   ;;  %v10138_v30 = vld [vmem:[#allocation6 + $0xda8] ss:$16 sps:$4 sm:$0xff]  }
 0x220   :  { %5096 = vmatpush1.bf16.msra.mxu0 %v10051_v31  ;;  %5612 = vmatpush1.bf16.msra.mxu1 %v10054_v32  ;;  %v10143_v31 = vld [vmem:[#allocation6 + $0xdc4] ss:$16 sps:$4 sm:$0xff]   ;;  %v10146_v32 = vld [vmem:[#allocation6 + $0xdcc] ss:$16 sps:$4 sm:$0xff]  }
 0x221   :  { %5108 = vmatprep.subr.bf16.mxu0 %v10059_v33  ;;  %5624 = vmatprep.subr.bf16.mxu1 %v10062_v34  ;;  %v10141_v33 = vld [vmem:[#allocation6 + $0xdc0] ss:$16 sps:$4 sm:$0xff]   ;;  %v10144_v34 = vld [vmem:[#allocation6 + $0xdc8] ss:$16 sps:$4 sm:$0xff]  }
 0x223   :  { %5098 = vmatmul.mubr.bf16.vlgmr.msra.gmra.mrb[0].mxu0 %v206_v39  ;;  %5614 = vmatmul.mubr.bf16.vlgmr.msra.gmra.mrb[0].mxu1 %v206_v39  ;;  %v10155_v39 = vld [vmem:[#allocation6 + $0xe04] ss:$16 sps:$4 sm:$0xff]  }
 0x224   :  { %5109 = vmatpush1.bf16.msra.mxu0 %v10057_v40  ;;  %5625 = vmatpush1.bf16.msra.mxu1 %v10060_v41  ;;  %v10158_v40 = vld [vmem:[#allocation6 + $0xe0c] ss:$16 sps:$4 sm:$0xff]   ;;  %v160_v41 = vld [vmem:[#allocation3 + $0x60] sm:$0xff] }
 0x225   :  { %5110 = vmatprep.subr.bf16.mxu0 %v10065_v42  ;;  %5626 = vmatprep.subr.bf16.mxu1 %v10068_v43  ;;  %v184_v42 = vld [vmem:[#allocation3 + $0x120] sm:$0xff]  ;;  %v163_v43 = vld [vmem:[#allocation3 + $0x78] sm:$0xff] }
 0x226   :  { %5140 = vmatprep.mubr.bf16.mxu0 %v209_v44  ;;  %5656 = vmatprep.mubr.bf16.mxu1 %v209_v44  ;;  %v187_v44 = vld [vmem:[#allocation3 + $0x138] sm:$0xff] }
 0x228   :  { %5111 = vmatpush1.bf16.msra.mxu0 %v10063_v45  ;;  %5627 = vmatpush1.bf16.msra.mxu1 %v10066_v46  ;;  %v208_v45 = vpack.c.bf16 %v184_v42, %v160_v41  ;;  %v10153_v46 = vld [vmem:[#allocation6 + $0xe00] ss:$16 sps:$4 sm:$0xff]   ;;  %v10245_v41 = vld [vmem:[#allocation6 + $0xfe4] ss:$16 sps:$4 sm:$0xff]   ;;  %v10248_v42 = vld [vmem:[#allocation6 + $0xfec] ss:$16 sps:$4 sm:$0xff]  }
 0x229   :  { %5112 = vmatprep.subr.bf16.mxu0 %v10071_v47  ;;  %5628 = vmatprep.subr.bf16.mxu1 %v10074_v48  ;;  %v10156_v47 = vld [vmem:[#allocation6 + $0xe08] ss:$16 sps:$4 sm:$0xff]   ;;  %v10161_v48 = vld [vmem:[#allocation6 + $0xe24] ss:$16 sps:$4 sm:$0xff]  }
 0x22c   :  { %5113 = vmatpush1.bf16.msra.mxu0 %v10069_v49  ;;  %5629 = vmatpush1.bf16.msra.mxu1 %v10072_v50  ;;  %v10164_v49 = vld [vmem:[#allocation6 + $0xe2c] ss:$16 sps:$4 sm:$0xff]   ;;  %v211_v50 = vpack.c.bf16 %v187_v44, %v163_v43  ;;  %v10243_v43 = vld [vmem:[#allocation6 + $0xfe0] ss:$16 sps:$4 sm:$0xff]   ;;  %v10246_v44 = vld [vmem:[#allocation6 + $0xfe8] ss:$16 sps:$4 sm:$0xff]  }
 0x22d   :  { %5114 = vmatprep.subr.bf16.mxu0 %v10077_v51  ;;  %5630 = vmatprep.subr.bf16.mxu1 %v10080_v52  ;;  %v10159_v51 = vld [vmem:[#allocation6 + $0xe20] ss:$16 sps:$4 sm:$0xff]   ;;  %v10162_v52 = vld [vmem:[#allocation6 + $0xe28] ss:$16 sps:$4 sm:$0xff]  }
 0x230   :  { %5115 = vmatpush1.bf16.msra.mxu0 %v10075_v53  ;;  %5631 = vmatpush1.bf16.msra.mxu1 %v10078_v54  ;;  %v10167_v53 = vld [vmem:[#allocation6 + $0xe44] ss:$16 sps:$4 sm:$0xff]   ;;  %v10170_v54 = vld [vmem:[#allocation6 + $0xe4c] ss:$16 sps:$4 sm:$0xff]  }
 0x231   :  { %5116 = vmatprep.subr.bf16.mxu0 %v10083_v55  ;;  %5632 = vmatprep.subr.bf16.mxu1 %v10086_v56  ;;  %v10165_v55 = vld [vmem:[#allocation6 + $0xe40] ss:$16 sps:$4 sm:$0xff]   ;;  %v10168_v56 = vld [vmem:[#allocation6 + $0xe48] ss:$16 sps:$4 sm:$0xff]  }
 0x234   :  { %5117 = vmatpush1.bf16.msra.mxu0 %v10081_v57  ;;  %5633 = vmatpush1.bf16.msra.mxu1 %v10084_v58  ;;  %v10173_v57 = vld [vmem:[#allocation6 + $0xe64] ss:$16 sps:$4 sm:$0xff]   ;;  %v10176_v58 = vld [vmem:[#allocation6 + $0xe6c] ss:$16 sps:$4 sm:$0xff]  }
 0x235   :  { %5118 = vmatprep.subr.bf16.mxu0 %v10089_v59  ;;  %5634 = vmatprep.subr.bf16.mxu1 %v10092_v60  ;;  %v10171_v59 = vld [vmem:[#allocation6 + $0xe60] ss:$16 sps:$4 sm:$0xff]   ;;  %v10174_v60 = vld [vmem:[#allocation6 + $0xe68] ss:$16 sps:$4 sm:$0xff]  }
 0x238   :  { %5119 = vmatpush1.bf16.msra.mxu0 %v10087_v61  ;;  %5635 = vmatpush1.bf16.msra.mxu1 %v10090_v62  ;;  %v10179_v61 = vld [vmem:[#allocation6 + $0xe84] ss:$16 sps:$4 sm:$0xff]   ;;  %v10182_v62 = vld [vmem:[#allocation6 + $0xe8c] ss:$16 sps:$4 sm:$0xff]  }
 0x239   :  { %5120 = vmatprep.subr.bf16.mxu0 %v10095_v63  ;;  %5636 = vmatprep.subr.bf16.mxu1 %v10098_v0  ;;  %v10177_v63 = vld [vmem:[#allocation6 + $0xe80] ss:$16 sps:$4 sm:$0xff]   ;;  %v10180_v0 = vld [vmem:[#allocation6 + $0xe88] ss:$16 sps:$4 sm:$0xff]  }
 0x23c   :  { %5121 = vmatpush1.bf16.msra.mxu0 %v10093_v1  ;;  %5637 = vmatpush1.bf16.msra.mxu1 %v10096_v2  ;;  %v10185_v1 = vld [vmem:[#allocation6 + $0xea4] ss:$16 sps:$4 sm:$0xff]   ;;  %v10188_v2 = vld [vmem:[#allocation6 + $0xeac] ss:$16 sps:$4 sm:$0xff]  }
 0x23d   :  { %5122 = vmatprep.subr.bf16.mxu0 %v10101_v3  ;;  %5638 = vmatprep.subr.bf16.mxu1 %v10104_v4  ;;  %v10183_v3 = vld [vmem:[#allocation6 + $0xea0] ss:$16 sps:$4 sm:$0xff]   ;;  %v10186_v4 = vld [vmem:[#allocation6 + $0xea8] ss:$16 sps:$4 sm:$0xff]  }
 0x240   :  { %5123 = vmatpush1.bf16.msra.mxu0 %v10099_v5  ;;  %5639 = vmatpush1.bf16.msra.mxu1 %v10102_v6  ;;  %v10191_v5 = vld [vmem:[#allocation6 + $0xec4] ss:$16 sps:$4 sm:$0xff]   ;;  %v10194_v6 = vld [vmem:[#allocation6 + $0xecc] ss:$16 sps:$4 sm:$0xff]  }
 0x241   :  { %5124 = vmatprep.subr.bf16.mxu0 %v10107_v7  ;;  %5640 = vmatprep.subr.bf16.mxu1 %v10110_v8  ;;  %v10189_v7 = vld [vmem:[#allocation6 + $0xec0] ss:$16 sps:$4 sm:$0xff]   ;;  %v10192_v8 = vld [vmem:[#allocation6 + $0xec8] ss:$16 sps:$4 sm:$0xff]  }
 0x244   :  { %5125 = vmatpush1.bf16.msra.mxu0 %v10105_v9  ;;  %5641 = vmatpush1.bf16.msra.mxu1 %v10108_v10  ;;  %v10197_v9 = vld [vmem:[#allocation6 + $0xee4] ss:$16 sps:$4 sm:$0xff]   ;;  %v10200_v10 = vld [vmem:[#allocation6 + $0xeec] ss:$16 sps:$4 sm:$0xff]  }
 0x245   :  { %5126 = vmatprep.subr.bf16.mxu0 %v10113_v11  ;;  %5642 = vmatprep.subr.bf16.mxu1 %v10116_v12  ;;  %v10195_v11 = vld [vmem:[#allocation6 + $0xee0] ss:$16 sps:$4 sm:$0xff]   ;;  %v10198_v12 = vld [vmem:[#allocation6 + $0xee8] ss:$16 sps:$4 sm:$0xff]  }
 0x248   :  { %5127 = vmatpush1.bf16.msra.mxu0 %v10111_v13  ;;  %5643 = vmatpush1.bf16.msra.mxu1 %v10114_v14  ;;  %v10203_v13 = vld [vmem:[#allocation6 + $0xf04] ss:$16 sps:$4 sm:$0xff]   ;;  %v10206_v14 = vld [vmem:[#allocation6 + $0xf0c] ss:$16 sps:$4 sm:$0xff]  }
 0x249   :  { %5128 = vmatprep.subr.bf16.mxu0 %v10119_v15  ;;  %5644 = vmatprep.subr.bf16.mxu1 %v10122_v16  ;;  %v10201_v15 = vld [vmem:[#allocation6 + $0xf00] ss:$16 sps:$4 sm:$0xff]   ;;  %v10204_v16 = vld [vmem:[#allocation6 + $0xf08] ss:$16 sps:$4 sm:$0xff]  }
 0x24c   :  { %5129 = vmatpush1.bf16.msra.mxu0 %v10117_v17  ;;  %5645 = vmatpush1.bf16.msra.mxu1 %v10120_v18  ;;  %v10209_v17 = vld [vmem:[#allocation6 + $0xf24] ss:$16 sps:$4 sm:$0xff]   ;;  %v10212_v18 = vld [vmem:[#allocation6 + $0xf2c] ss:$16 sps:$4 sm:$0xff]  }
 0x24d   :  { %5130 = vmatprep.subr.bf16.mxu0 %v10125_v19  ;;  %5646 = vmatprep.subr.bf16.mxu1 %v10128_v20  ;;  %v10207_v19 = vld [vmem:[#allocation6 + $0xf20] ss:$16 sps:$4 sm:$0xff]   ;;  %v10210_v20 = vld [vmem:[#allocation6 + $0xf28] ss:$16 sps:$4 sm:$0xff]  }
 0x250   :  { %5131 = vmatpush1.bf16.msra.mxu0 %v10123_v21  ;;  %5647 = vmatpush1.bf16.msra.mxu1 %v10126_v22  ;;  %v10215_v21 = vld [vmem:[#allocation6 + $0xf44] ss:$16 sps:$4 sm:$0xff]   ;;  %v10218_v22 = vld [vmem:[#allocation6 + $0xf4c] ss:$16 sps:$4 sm:$0xff]  }
 0x251   :  { %5132 = vmatprep.subr.bf16.mxu0 %v10131_v23  ;;  %5648 = vmatprep.subr.bf16.mxu1 %v10134_v24  ;;  %v10213_v23 = vld [vmem:[#allocation6 + $0xf40] ss:$16 sps:$4 sm:$0xff]   ;;  %v10216_v24 = vld [vmem:[#allocation6 + $0xf48] ss:$16 sps:$4 sm:$0xff]  }
 0x254   :  { %5133 = vmatpush1.bf16.msra.mxu0 %v10129_v25  ;;  %5649 = vmatpush1.bf16.msra.mxu1 %v10132_v26  ;;  %v10221_v25 = vld [vmem:[#allocation6 + $0xf64] ss:$16 sps:$4 sm:$0xff]   ;;  %v10224_v26 = vld [vmem:[#allocation6 + $0xf6c] ss:$16 sps:$4 sm:$0xff]  }
 0x255   :  { %5134 = vmatprep.subr.bf16.mxu0 %v10137_v27  ;;  %5650 = vmatprep.subr.bf16.mxu1 %v10140_v28  ;;  %v10219_v27 = vld [vmem:[#allocation6 + $0xf60] ss:$16 sps:$4 sm:$0xff]   ;;  %v10222_v28 = vld [vmem:[#allocation6 + $0xf68] ss:$16 sps:$4 sm:$0xff]  }
 0x258   :  { %5135 = vmatpush1.bf16.msra.mxu0 %v10135_v29  ;;  %5651 = vmatpush1.bf16.msra.mxu1 %v10138_v30  ;;  %v10227_v29 = vld [vmem:[#allocation6 + $0xf84] ss:$16 sps:$4 sm:$0xff]   ;;  %v10230_v30 = vld [vmem:[#allocation6 + $0xf8c] ss:$16 sps:$4 sm:$0xff]  }
 0x259   :  { %5136 = vmatprep.subr.bf16.mxu0 %v10143_v31  ;;  %5652 = vmatprep.subr.bf16.mxu1 %v10146_v32  ;;  %v10225_v31 = vld [vmem:[#allocation6 + $0xf80] ss:$16 sps:$4 sm:$0xff]   ;;  %v10228_v32 = vld [vmem:[#allocation6 + $0xf88] ss:$16 sps:$4 sm:$0xff]  }
 0x25c   :  { %5137 = vmatpush1.bf16.msra.mxu0 %v10141_v33  ;;  %5653 = vmatpush1.bf16.msra.mxu1 %v10144_v34  ;;  %v10233_v33 = vld [vmem:[#allocation6 + $0xfa4] ss:$16 sps:$4 sm:$0xff]   ;;  %v10236_v34 = vld [vmem:[#allocation6 + $0xfac] ss:$16 sps:$4 sm:$0xff]  }
 0x25d   :  { %5138 = vmatprep.subr.bf16.mxu0 %v10149_v35  ;;  %5654 = vmatprep.subr.bf16.mxu1 %v10152_v36  ;;  %v10231_v35 = vld [vmem:[#allocation6 + $0xfa0] ss:$16 sps:$4 sm:$0xff]   ;;  %v10234_v36 = vld [vmem:[#allocation6 + $0xfa8] ss:$16 sps:$4 sm:$0xff]  }
 0x260   :  { %5139 = vmatpush1.bf16.msra.mxu0 %v10147_v37  ;;  %5655 = vmatpush1.bf16.msra.mxu1 %v10150_v38  ;;  %v10239_v37 = vld [vmem:[#allocation6 + $0xfc4] ss:$16 sps:$4 sm:$0xff]   ;;  %v10242_v38 = vld [vmem:[#allocation6 + $0xfcc] ss:$16 sps:$4 sm:$0xff]  }
 0x261   :  { %5151 = vmatprep.subr.bf16.mxu0 %v10155_v39  ;;  %5667 = vmatprep.subr.bf16.mxu1 %v10158_v40  ;;  %v10237_v39 = vld [vmem:[#allocation6 + $0xfc0] ss:$16 sps:$4 sm:$0xff]   ;;  %v10240_v40 = vld [vmem:[#allocation6 + $0xfc8] ss:$16 sps:$4 sm:$0xff]  }
 0x263   :  { %5141 = vmatmul.mubr.bf16.vlgmr.msra.gmra.mrb[0].mxu0 %v208_v45  ;;  %5657 = vmatmul.mubr.bf16.vlgmr.msra.gmra.mrb[0].mxu1 %v208_v45  ;;  %v10251_v45 = vld [vmem:[#allocation6 + $0x1004] ss:$16 sps:$4 sm:$0xff]  }
 0x264   :  { %5152 = vmatpush1.bf16.msra.mxu0 %v10153_v46  ;;  %5668 = vmatpush1.bf16.msra.mxu1 %v10156_v47  ;;  %v10254_v46 = vld [vmem:[#allocation6 + $0x100c] ss:$16 sps:$4 sm:$0xff]   ;;  %v162_v47 = vld [vmem:[#allocation3 + $0x70] sm:$0xff] }
 0x265   :  { %5153 = vmatprep.subr.bf16.mxu0 %v10161_v48  ;;  %5669 = vmatprep.subr.bf16.mxu1 %v10164_v49  ;;  %v186_v48 = vld [vmem:[#allocation3 + $0x130] sm:$0xff]  ;;  %v165_v49 = vld [vmem:[#allocation3 + $0x88] sm:$0xff] }
 0x266   :  { %5183 = vmatprep.mubr.bf16.mxu0 %v211_v50  ;;  %5699 = vmatprep.mubr.bf16.mxu1 %v211_v50  ;;  %v189_v50 = vld [vmem:[#allocation3 + $0x148] sm:$0xff] }
 0x268   :  { %5154 = vmatpush1.bf16.msra.mxu0 %v10159_v51  ;;  %5670 = vmatpush1.bf16.msra.mxu1 %v10162_v52  ;;  %v210_v51 = vpack.c.bf16 %v186_v48, %v162_v47  ;;  %v10249_v52 = vld [vmem:[#allocation6 + $0x1000] ss:$16 sps:$4 sm:$0xff]   ;;  %v10341_v47 = vld [vmem:[#allocation6 + $0x11e4] ss:$16 sps:$4 sm:$0xff]   ;;  %v10344_v48 = vld [vmem:[#allocation6 + $0x11ec] ss:$16 sps:$4 sm:$0xff]  }
 0x269   :  { %5155 = vmatprep.subr.bf16.mxu0 %v10167_v53  ;;  %5671 = vmatprep.subr.bf16.mxu1 %v10170_v54  ;;  %v10252_v53 = vld [vmem:[#allocation6 + $0x1008] ss:$16 sps:$4 sm:$0xff]   ;;  %v10257_v54 = vld [vmem:[#allocation6 + $0x1024] ss:$16 sps:$4 sm:$0xff]  }
 0x26c   :  { %5156 = vmatpush1.bf16.msra.mxu0 %v10165_v55  ;;  %5672 = vmatpush1.bf16.msra.mxu1 %v10168_v56  ;;  %v10260_v55 = vld [vmem:[#allocation6 + $0x102c] ss:$16 sps:$4 sm:$0xff]   ;;  %v213_v56 = vpack.c.bf16 %v189_v50, %v165_v49  ;;  %v10339_v49 = vld [vmem:[#allocation6 + $0x11e0] ss:$16 sps:$4 sm:$0xff]   ;;  %v10342_v50 = vld [vmem:[#allocation6 + $0x11e8] ss:$16 sps:$4 sm:$0xff]  }
 0x26d   :  { %5157 = vmatprep.subr.bf16.mxu0 %v10173_v57  ;;  %5673 = vmatprep.subr.bf16.mxu1 %v10176_v58  ;;  %v10255_v57 = vld [vmem:[#allocation6 + $0x1020] ss:$16 sps:$4 sm:$0xff]   ;;  %v10258_v58 = vld [vmem:[#allocation6 + $0x1028] ss:$16 sps:$4 sm:$0xff]  }
 0x270   :  { %5158 = vmatpush1.bf16.msra.mxu0 %v10171_v59  ;;  %5674 = vmatpush1.bf16.msra.mxu1 %v10174_v60  ;;  %v10263_v59 = vld [vmem:[#allocation6 + $0x1044] ss:$16 sps:$4 sm:$0xff]   ;;  %v10266_v60 = vld [vmem:[#allocation6 + $0x104c] ss:$16 sps:$4 sm:$0xff]  }
 0x271   :  { %5159 = vmatprep.subr.bf16.mxu0 %v10179_v61  ;;  %5675 = vmatprep.subr.bf16.mxu1 %v10182_v62  ;;  %v10261_v61 = vld [vmem:[#allocation6 + $0x1040] ss:$16 sps:$4 sm:$0xff]   ;;  %v10264_v62 = vld [vmem:[#allocation6 + $0x1048] ss:$16 sps:$4 sm:$0xff]  }
 0x274   :  { %5160 = vmatpush1.bf16.msra.mxu0 %v10177_v63  ;;  %5676 = vmatpush1.bf16.msra.mxu1 %v10180_v0  ;;  %v10269_v63 = vld [vmem:[#allocation6 + $0x1064] ss:$16 sps:$4 sm:$0xff]   ;;  %v10272_v0 = vld [vmem:[#allocation6 + $0x106c] ss:$16 sps:$4 sm:$0xff]  }
 0x275   :  { %5161 = vmatprep.subr.bf16.mxu0 %v10185_v1  ;;  %5677 = vmatprep.subr.bf16.mxu1 %v10188_v2  ;;  %v10267_v1 = vld [vmem:[#allocation6 + $0x1060] ss:$16 sps:$4 sm:$0xff]   ;;  %v10270_v2 = vld [vmem:[#allocation6 + $0x1068] ss:$16 sps:$4 sm:$0xff]  }
 0x278   :  { %5162 = vmatpush1.bf16.msra.mxu0 %v10183_v3  ;;  %5678 = vmatpush1.bf16.msra.mxu1 %v10186_v4  ;;  %v10275_v3 = vld [vmem:[#allocation6 + $0x1084] ss:$16 sps:$4 sm:$0xff]   ;;  %v10278_v4 = vld [vmem:[#allocation6 + $0x108c] ss:$16 sps:$4 sm:$0xff]  }
 0x279   :  { %5163 = vmatprep.subr.bf16.mxu0 %v10191_v5  ;;  %5679 = vmatprep.subr.bf16.mxu1 %v10194_v6  ;;  %v10273_v5 = vld [vmem:[#allocation6 + $0x1080] ss:$16 sps:$4 sm:$0xff]   ;;  %v10276_v6 = vld [vmem:[#allocation6 + $0x1088] ss:$16 sps:$4 sm:$0xff]  }
 0x27c   :  { %5164 = vmatpush1.bf16.msra.mxu0 %v10189_v7  ;;  %5680 = vmatpush1.bf16.msra.mxu1 %v10192_v8  ;;  %v10281_v7 = vld [vmem:[#allocation6 + $0x10a4] ss:$16 sps:$4 sm:$0xff]   ;;  %v10284_v8 = vld [vmem:[#allocation6 + $0x10ac] ss:$16 sps:$4 sm:$0xff]  }
 0x27d   :  { %5165 = vmatprep.subr.bf16.mxu0 %v10197_v9  ;;  %5681 = vmatprep.subr.bf16.mxu1 %v10200_v10  ;;  %v10279_v9 = vld [vmem:[#allocation6 + $0x10a0] ss:$16 sps:$4 sm:$0xff]   ;;  %v10282_v10 = vld [vmem:[#allocation6 + $0x10a8] ss:$16 sps:$4 sm:$0xff]  }
 0x280   :  { %5166 = vmatpush1.bf16.msra.mxu0 %v10195_v11  ;;  %5682 = vmatpush1.bf16.msra.mxu1 %v10198_v12  ;;  %v10287_v11 = vld [vmem:[#allocation6 + $0x10c4] ss:$16 sps:$4 sm:$0xff]   ;;  %v10290_v12 = vld [vmem:[#allocation6 + $0x10cc] ss:$16 sps:$4 sm:$0xff]  }
 0x281   :  { %5167 = vmatprep.subr.bf16.mxu0 %v10203_v13  ;;  %5683 = vmatprep.subr.bf16.mxu1 %v10206_v14  ;;  %v10285_v13 = vld [vmem:[#allocation6 + $0x10c0] ss:$16 sps:$4 sm:$0xff]   ;;  %v10288_v14 = vld [vmem:[#allocation6 + $0x10c8] ss:$16 sps:$4 sm:$0xff]  }
 0x284   :  { %5168 = vmatpush1.bf16.msra.mxu0 %v10201_v15  ;;  %5684 = vmatpush1.bf16.msra.mxu1 %v10204_v16  ;;  %v10293_v15 = vld [vmem:[#allocation6 + $0x10e4] ss:$16 sps:$4 sm:$0xff]   ;;  %v10296_v16 = vld [vmem:[#allocation6 + $0x10ec] ss:$16 sps:$4 sm:$0xff]  }
 0x285   :  { %5169 = vmatprep.subr.bf16.mxu0 %v10209_v17  ;;  %5685 = vmatprep.subr.bf16.mxu1 %v10212_v18  ;;  %v10291_v17 = vld [vmem:[#allocation6 + $0x10e0] ss:$16 sps:$4 sm:$0xff]   ;;  %v10294_v18 = vld [vmem:[#allocation6 + $0x10e8] ss:$16 sps:$4 sm:$0xff]  }
 0x288   :  { %5170 = vmatpush1.bf16.msra.mxu0 %v10207_v19  ;;  %5686 = vmatpush1.bf16.msra.mxu1 %v10210_v20  ;;  %v10299_v19 = vld [vmem:[#allocation6 + $0x1104] ss:$16 sps:$4 sm:$0xff]   ;;  %v10302_v20 = vld [vmem:[#allocation6 + $0x110c] ss:$16 sps:$4 sm:$0xff]  }
 0x289   :  { %5171 = vmatprep.subr.bf16.mxu0 %v10215_v21  ;;  %5687 = vmatprep.subr.bf16.mxu1 %v10218_v22  ;;  %v10297_v21 = vld [vmem:[#allocation6 + $0x1100] ss:$16 sps:$4 sm:$0xff]   ;;  %v10300_v22 = vld [vmem:[#allocation6 + $0x1108] ss:$16 sps:$4 sm:$0xff]  }
 0x28c   :  { %5172 = vmatpush1.bf16.msra.mxu0 %v10213_v23  ;;  %5688 = vmatpush1.bf16.msra.mxu1 %v10216_v24  ;;  %v10305_v23 = vld [vmem:[#allocation6 + $0x1124] ss:$16 sps:$4 sm:$0xff]   ;;  %v10308_v24 = vld [vmem:[#allocation6 + $0x112c] ss:$16 sps:$4 sm:$0xff]  }
 0x28d   :  { %5173 = vmatprep.subr.bf16.mxu0 %v10221_v25  ;;  %5689 = vmatprep.subr.bf16.mxu1 %v10224_v26  ;;  %v10303_v25 = vld [vmem:[#allocation6 + $0x1120] ss:$16 sps:$4 sm:$0xff]   ;;  %v10306_v26 = vld [vmem:[#allocation6 + $0x1128] ss:$16 sps:$4 sm:$0xff]  }
 0x290   :  { %5174 = vmatpush1.bf16.msra.mxu0 %v10219_v27  ;;  %5690 = vmatpush1.bf16.msra.mxu1 %v10222_v28  ;;  %v10311_v27 = vld [vmem:[#allocation6 + $0x1144] ss:$16 sps:$4 sm:$0xff]   ;;  %v10314_v28 = vld [vmem:[#allocation6 + $0x114c] ss:$16 sps:$4 sm:$0xff]  }
 0x291   :  { %5175 = vmatprep.subr.bf16.mxu0 %v10227_v29  ;;  %5691 = vmatprep.subr.bf16.mxu1 %v10230_v30  ;;  %v10309_v29 = vld [vmem:[#allocation6 + $0x1140] ss:$16 sps:$4 sm:$0xff]   ;;  %v10312_v30 = vld [vmem:[#allocation6 + $0x1148] ss:$16 sps:$4 sm:$0xff]  }
 0x294   :  { %5176 = vmatpush1.bf16.msra.mxu0 %v10225_v31  ;;  %5692 = vmatpush1.bf16.msra.mxu1 %v10228_v32  ;;  %v10317_v31 = vld [vmem:[#allocation6 + $0x1164] ss:$16 sps:$4 sm:$0xff]   ;;  %v10320_v32 = vld [vmem:[#allocation6 + $0x116c] ss:$16 sps:$4 sm:$0xff]  }
 0x295   :  { %5177 = vmatprep.subr.bf16.mxu0 %v10233_v33  ;;  %5693 = vmatprep.subr.bf16.mxu1 %v10236_v34  ;;  %v10315_v33 = vld [vmem:[#allocation6 + $0x1160] ss:$16 sps:$4 sm:$0xff]   ;;  %v10318_v34 = vld [vmem:[#allocation6 + $0x1168] ss:$16 sps:$4 sm:$0xff]  }
 0x298   :  { %5178 = vmatpush1.bf16.msra.mxu0 %v10231_v35  ;;  %5694 = vmatpush1.bf16.msra.mxu1 %v10234_v36  ;;  %v10323_v35 = vld [vmem:[#allocation6 + $0x1184] ss:$16 sps:$4 sm:$0xff]   ;;  %v10326_v36 = vld [vmem:[#allocation6 + $0x118c] ss:$16 sps:$4 sm:$0xff]  }
 0x299   :  { %5179 = vmatprep.subr.bf16.mxu0 %v10239_v37  ;;  %5695 = vmatprep.subr.bf16.mxu1 %v10242_v38  ;;  %v10321_v37 = vld [vmem:[#allocation6 + $0x1180] ss:$16 sps:$4 sm:$0xff]   ;;  %v10324_v38 = vld [vmem:[#allocation6 + $0x1188] ss:$16 sps:$4 sm:$0xff]  }
 0x29c   :  { %5180 = vmatpush1.bf16.msra.mxu0 %v10237_v39  ;;  %5696 = vmatpush1.bf16.msra.mxu1 %v10240_v40  ;;  %v10329_v39 = vld [vmem:[#allocation6 + $0x11a4] ss:$16 sps:$4 sm:$0xff]   ;;  %v10332_v40 = vld [vmem:[#allocation6 + $0x11ac] ss:$16 sps:$4 sm:$0xff]  }
 0x29d   :  { %5181 = vmatprep.subr.bf16.mxu0 %v10245_v41  ;;  %5697 = vmatprep.subr.bf16.mxu1 %v10248_v42  ;;  %v10327_v41 = vld [vmem:[#allocation6 + $0x11a0] ss:$16 sps:$4 sm:$0xff]   ;;  %v10330_v42 = vld [vmem:[#allocation6 + $0x11a8] ss:$16 sps:$4 sm:$0xff]  }
 0x2a0   :  { %5182 = vmatpush1.bf16.msra.mxu0 %v10243_v43  ;;  %5698 = vmatpush1.bf16.msra.mxu1 %v10246_v44  ;;  %v10335_v43 = vld [vmem:[#allocation6 + $0x11c4] ss:$16 sps:$4 sm:$0xff]   ;;  %v10338_v44 = vld [vmem:[#allocation6 + $0x11cc] ss:$16 sps:$4 sm:$0xff]  }
 0x2a1   :  { %5194 = vmatprep.subr.bf16.mxu0 %v10251_v45  ;;  %5710 = vmatprep.subr.bf16.mxu1 %v10254_v46  ;;  %v10333_v45 = vld [vmem:[#allocation6 + $0x11c0] ss:$16 sps:$4 sm:$0xff]   ;;  %v10336_v46 = vld [vmem:[#allocation6 + $0x11c8] ss:$16 sps:$4 sm:$0xff]  }
 0x2a3   :  { %5184 = vmatmul.mubr.bf16.vlgmr.msra.gmra.mrb[0].mxu0 %v210_v51  ;;  %5700 = vmatmul.mubr.bf16.vlgmr.msra.gmra.mrb[0].mxu1 %v210_v51  ;;  %v10347_v51 = vld [vmem:[#allocation6 + $0x1204] ss:$16 sps:$4 sm:$0xff]  }
 0x2a4   :  { %5195 = vmatpush1.bf16.msra.mxu0 %v10249_v52  ;;  %5711 = vmatpush1.bf16.msra.mxu1 %v10252_v53  ;;  %v10350_v52 = vld [vmem:[#allocation6 + $0x120c] ss:$16 sps:$4 sm:$0xff]   ;;  %v164_v53 = vld [vmem:[#allocation3 + $0x80] sm:$0xff] }
 0x2a5   :  { %5196 = vmatprep.subr.bf16.mxu0 %v10257_v54  ;;  %5712 = vmatprep.subr.bf16.mxu1 %v10260_v55  ;;  %v188_v54 = vld [vmem:[#allocation3 + $0x140] sm:$0xff]  ;;  %v167_v55 = vld [vmem:[#allocation3 + $0x98] sm:$0xff] }
 0x2a6   :  { %5226 = vmatprep.mubr.bf16.mxu0 %v213_v56  ;;  %5742 = vmatprep.mubr.bf16.mxu1 %v213_v56  ;;  %v191_v56 = vld [vmem:[#allocation3 + $0x158] sm:$0xff] }
 0x2a8   :  { %5197 = vmatpush1.bf16.msra.mxu0 %v10255_v57  ;;  %5713 = vmatpush1.bf16.msra.mxu1 %v10258_v58  ;;  %v212_v57 = vpack.c.bf16 %v188_v54, %v164_v53  ;;  %v10345_v58 = vld [vmem:[#allocation6 + $0x1200] ss:$16 sps:$4 sm:$0xff]   ;;  %v10437_v53 = vld [vmem:[#allocation6 + $0x13e4] ss:$16 sps:$4 sm:$0xff]   ;;  %v10440_v54 = vld [vmem:[#allocation6 + $0x13ec] ss:$16 sps:$4 sm:$0xff]  }
 0x2a9   :  { %5198 = vmatprep.subr.bf16.mxu0 %v10263_v59  ;;  %5714 = vmatprep.subr.bf16.mxu1 %v10266_v60  ;;  %v10348_v59 = vld [vmem:[#allocation6 + $0x1208] ss:$16 sps:$4 sm:$0xff]   ;;  %v10353_v60 = vld [vmem:[#allocation6 + $0x1224] ss:$16 sps:$4 sm:$0xff]  }
 0x2ac   :  { %5199 = vmatpush1.bf16.msra.mxu0 %v10261_v61  ;;  %5715 = vmatpush1.bf16.msra.mxu1 %v10264_v62  ;;  %v10356_v61 = vld [vmem:[#allocation6 + $0x122c] ss:$16 sps:$4 sm:$0xff]   ;;  %v215_v62 = vpack.c.bf16 %v191_v56, %v167_v55  ;;  %v10435_v55 = vld [vmem:[#allocation6 + $0x13e0] ss:$16 sps:$4 sm:$0xff]   ;;  %v10438_v56 = vld [vmem:[#allocation6 + $0x13e8] ss:$16 sps:$4 sm:$0xff]  }
 0x2ad   :  { %5200 = vmatprep.subr.bf16.mxu0 %v10269_v63  ;;  %5716 = vmatprep.subr.bf16.mxu1 %v10272_v0  ;;  %v10351_v63 = vld [vmem:[#allocation6 + $0x1220] ss:$16 sps:$4 sm:$0xff]   ;;  %v10354_v0 = vld [vmem:[#allocation6 + $0x1228] ss:$16 sps:$4 sm:$0xff]  }
 0x2b0   :  { %5201 = vmatpush1.bf16.msra.mxu0 %v10267_v1  ;;  %5717 = vmatpush1.bf16.msra.mxu1 %v10270_v2  ;;  %v10359_v1 = vld [vmem:[#allocation6 + $0x1244] ss:$16 sps:$4 sm:$0xff]   ;;  %v10362_v2 = vld [vmem:[#allocation6 + $0x124c] ss:$16 sps:$4 sm:$0xff]  }
 0x2b1   :  { %5202 = vmatprep.subr.bf16.mxu0 %v10275_v3  ;;  %5718 = vmatprep.subr.bf16.mxu1 %v10278_v4  ;;  %v10357_v3 = vld [vmem:[#allocation6 + $0x1240] ss:$16 sps:$4 sm:$0xff]   ;;  %v10360_v4 = vld [vmem:[#allocation6 + $0x1248] ss:$16 sps:$4 sm:$0xff]  }
 0x2b4   :  { %5203 = vmatpush1.bf16.msra.mxu0 %v10273_v5  ;;  %5719 = vmatpush1.bf16.msra.mxu1 %v10276_v6  ;;  %v10365_v5 = vld [vmem:[#allocation6 + $0x1264] ss:$16 sps:$4 sm:$0xff]   ;;  %v10368_v6 = vld [vmem:[#allocation6 + $0x126c] ss:$16 sps:$4 sm:$0xff]  }
 0x2b5   :  { %5204 = vmatprep.subr.bf16.mxu0 %v10281_v7  ;;  %5720 = vmatprep.subr.bf16.mxu1 %v10284_v8  ;;  %v10363_v7 = vld [vmem:[#allocation6 + $0x1260] ss:$16 sps:$4 sm:$0xff]   ;;  %v10366_v8 = vld [vmem:[#allocation6 + $0x1268] ss:$16 sps:$4 sm:$0xff]  }
 0x2b8   :  { %5205 = vmatpush1.bf16.msra.mxu0 %v10279_v9  ;;  %5721 = vmatpush1.bf16.msra.mxu1 %v10282_v10  ;;  %v10371_v9 = vld [vmem:[#allocation6 + $0x1284] ss:$16 sps:$4 sm:$0xff]   ;;  %v10374_v10 = vld [vmem:[#allocation6 + $0x128c] ss:$16 sps:$4 sm:$0xff]  }
 0x2b9   :  { %5206 = vmatprep.subr.bf16.mxu0 %v10287_v11  ;;  %5722 = vmatprep.subr.bf16.mxu1 %v10290_v12  ;;  %v10369_v11 = vld [vmem:[#allocation6 + $0x1280] ss:$16 sps:$4 sm:$0xff]   ;;  %v10372_v12 = vld [vmem:[#allocation6 + $0x1288] ss:$16 sps:$4 sm:$0xff]  }
 0x2bc   :  { %5207 = vmatpush1.bf16.msra.mxu0 %v10285_v13  ;;  %5723 = vmatpush1.bf16.msra.mxu1 %v10288_v14  ;;  %v10377_v13 = vld [vmem:[#allocation6 + $0x12a4] ss:$16 sps:$4 sm:$0xff]   ;;  %v10380_v14 = vld [vmem:[#allocation6 + $0x12ac] ss:$16 sps:$4 sm:$0xff]  }
 0x2bd   :  { %5208 = vmatprep.subr.bf16.mxu0 %v10293_v15  ;;  %5724 = vmatprep.subr.bf16.mxu1 %v10296_v16  ;;  %v10375_v15 = vld [vmem:[#allocation6 + $0x12a0] ss:$16 sps:$4 sm:$0xff]   ;;  %v10378_v16 = vld [vmem:[#allocation6 + $0x12a8] ss:$16 sps:$4 sm:$0xff]  }
 0x2c0   :  { %5209 = vmatpush1.bf16.msra.mxu0 %v10291_v17  ;;  %5725 = vmatpush1.bf16.msra.mxu1 %v10294_v18  ;;  %v10383_v17 = vld [vmem:[#allocation6 + $0x12c4] ss:$16 sps:$4 sm:$0xff]   ;;  %v10386_v18 = vld [vmem:[#allocation6 + $0x12cc] ss:$16 sps:$4 sm:$0xff]  }
 0x2c1   :  { %5210 = vmatprep.subr.bf16.mxu0 %v10299_v19  ;;  %5726 = vmatprep.subr.bf16.mxu1 %v10302_v20  ;;  %v10381_v19 = vld [vmem:[#allocation6 + $0x12c0] ss:$16 sps:$4 sm:$0xff]   ;;  %v10384_v20 = vld [vmem:[#allocation6 + $0x12c8] ss:$16 sps:$4 sm:$0xff]  }
 0x2c4   :  { %5211 = vmatpush1.bf16.msra.mxu0 %v10297_v21  ;;  %5727 = vmatpush1.bf16.msra.mxu1 %v10300_v22  ;;  %v10389_v21 = vld [vmem:[#allocation6 + $0x12e4] ss:$16 sps:$4 sm:$0xff]   ;;  %v10392_v22 = vld [vmem:[#allocation6 + $0x12ec] ss:$16 sps:$4 sm:$0xff]  }
 0x2c5   :  { %5212 = vmatprep.subr.bf16.mxu0 %v10305_v23  ;;  %5728 = vmatprep.subr.bf16.mxu1 %v10308_v24  ;;  %v10387_v23 = vld [vmem:[#allocation6 + $0x12e0] ss:$16 sps:$4 sm:$0xff]   ;;  %v10390_v24 = vld [vmem:[#allocation6 + $0x12e8] ss:$16 sps:$4 sm:$0xff]  }
 0x2c8   :  { %5213 = vmatpush1.bf16.msra.mxu0 %v10303_v25  ;;  %5729 = vmatpush1.bf16.msra.mxu1 %v10306_v26  ;;  %v10395_v25 = vld [vmem:[#allocation6 + $0x1304] ss:$16 sps:$4 sm:$0xff]   ;;  %v10398_v26 = vld [vmem:[#allocation6 + $0x130c] ss:$16 sps:$4 sm:$0xff]  }
 0x2c9   :  { %5214 = vmatprep.subr.bf16.mxu0 %v10311_v27  ;;  %5730 = vmatprep.subr.bf16.mxu1 %v10314_v28  ;;  %v10393_v27 = vld [vmem:[#allocation6 + $0x1300] ss:$16 sps:$4 sm:$0xff]   ;;  %v10396_v28 = vld [vmem:[#allocation6 + $0x1308] ss:$16 sps:$4 sm:$0xff]  }
 0x2cc   :  { %5215 = vmatpush1.bf16.msra.mxu0 %v10309_v29  ;;  %5731 = vmatpush1.bf16.msra.mxu1 %v10312_v30  ;;  %v10401_v29 = vld [vmem:[#allocation6 + $0x1324] ss:$16 sps:$4 sm:$0xff]   ;;  %v10404_v30 = vld [vmem:[#allocation6 + $0x132c] ss:$16 sps:$4 sm:$0xff]  }
 0x2cd   :  { %5216 = vmatprep.subr.bf16.mxu0 %v10317_v31  ;;  %5732 = vmatprep.subr.bf16.mxu1 %v10320_v32  ;;  %v10399_v31 = vld [vmem:[#allocation6 + $0x1320] ss:$16 sps:$4 sm:$0xff]   ;;  %v10402_v32 = vld [vmem:[#allocation6 + $0x1328] ss:$16 sps:$4 sm:$0xff]  }
 0x2d0   :  { %5217 = vmatpush1.bf16.msra.mxu0 %v10315_v33  ;;  %5733 = vmatpush1.bf16.msra.mxu1 %v10318_v34  ;;  %v10407_v33 = vld [vmem:[#allocation6 + $0x1344] ss:$16 sps:$4 sm:$0xff]   ;;  %v10410_v34 = vld [vmem:[#allocation6 + $0x134c] ss:$16 sps:$4 sm:$0xff]  }
 0x2d1   :  { %5218 = vmatprep.subr.bf16.mxu0 %v10323_v35  ;;  %5734 = vmatprep.subr.bf16.mxu1 %v10326_v36  ;;  %v10405_v35 = vld [vmem:[#allocation6 + $0x1340] ss:$16 sps:$4 sm:$0xff]   ;;  %v10408_v36 = vld [vmem:[#allocation6 + $0x1348] ss:$16 sps:$4 sm:$0xff]  }
 0x2d4   :  { %5219 = vmatpush1.bf16.msra.mxu0 %v10321_v37  ;;  %5735 = vmatpush1.bf16.msra.mxu1 %v10324_v38  ;;  %v10413_v37 = vld [vmem:[#allocation6 + $0x1364] ss:$16 sps:$4 sm:$0xff]   ;;  %v10416_v38 = vld [vmem:[#allocation6 + $0x136c] ss:$16 sps:$4 sm:$0xff]  }
 0x2d5   :  { %5220 = vmatprep.subr.bf16.mxu0 %v10329_v39  ;;  %5736 = vmatprep.subr.bf16.mxu1 %v10332_v40  ;;  %v10411_v39 = vld [vmem:[#allocation6 + $0x1360] ss:$16 sps:$4 sm:$0xff]   ;;  %v10414_v40 = vld [vmem:[#allocation6 + $0x1368] ss:$16 sps:$4 sm:$0xff]  }
 0x2d8   :  { %5221 = vmatpush1.bf16.msra.mxu0 %v10327_v41  ;;  %5737 = vmatpush1.bf16.msra.mxu1 %v10330_v42  ;;  %v10419_v41 = vld [vmem:[#allocation6 + $0x1384] ss:$16 sps:$4 sm:$0xff]   ;;  %v10422_v42 = vld [vmem:[#allocation6 + $0x138c] ss:$16 sps:$4 sm:$0xff]  }
 0x2d9   :  { %5222 = vmatprep.subr.bf16.mxu0 %v10335_v43  ;;  %5738 = vmatprep.subr.bf16.mxu1 %v10338_v44  ;;  %v10417_v43 = vld [vmem:[#allocation6 + $0x1380] ss:$16 sps:$4 sm:$0xff]   ;;  %v10420_v44 = vld [vmem:[#allocation6 + $0x1388] ss:$16 sps:$4 sm:$0xff]  }
 0x2dc   :  { %5223 = vmatpush1.bf16.msra.mxu0 %v10333_v45  ;;  %5739 = vmatpush1.bf16.msra.mxu1 %v10336_v46  ;;  %v10425_v45 = vld [vmem:[#allocation6 + $0x13a4] ss:$16 sps:$4 sm:$0xff]   ;;  %v10428_v46 = vld [vmem:[#allocation6 + $0x13ac] ss:$16 sps:$4 sm:$0xff]  }
 0x2dd   :  { %5224 = vmatprep.subr.bf16.mxu0 %v10341_v47  ;;  %5740 = vmatprep.subr.bf16.mxu1 %v10344_v48  ;;  %v10423_v47 = vld [vmem:[#allocation6 + $0x13a0] ss:$16 sps:$4 sm:$0xff]   ;;  %v10426_v48 = vld [vmem:[#allocation6 + $0x13a8] ss:$16 sps:$4 sm:$0xff]  }
 0x2e0   :  { %5225 = vmatpush1.bf16.msra.mxu0 %v10339_v49  ;;  %5741 = vmatpush1.bf16.msra.mxu1 %v10342_v50  ;;  %v10431_v49 = vld [vmem:[#allocation6 + $0x13c4] ss:$16 sps:$4 sm:$0xff]   ;;  %v10434_v50 = vld [vmem:[#allocation6 + $0x13cc] ss:$16 sps:$4 sm:$0xff]  }
 0x2e1   :  { %5237 = vmatprep.subr.bf16.mxu0 %v10347_v51  ;;  %5753 = vmatprep.subr.bf16.mxu1 %v10350_v52  ;;  %v10429_v51 = vld [vmem:[#allocation6 + $0x13c0] ss:$16 sps:$4 sm:$0xff]   ;;  %v10432_v52 = vld [vmem:[#allocation6 + $0x13c8] ss:$16 sps:$4 sm:$0xff]  }
 0x2e3   :  { %5227 = vmatmul.mubr.bf16.vlgmr.msra.gmra.mrb[0].mxu0 %v212_v57  ;;  %5743 = vmatmul.mubr.bf16.vlgmr.msra.gmra.mrb[0].mxu1 %v212_v57  ;;  %v166_v57 = vld [vmem:[#allocation3 + $0x90] sm:$0xff] }
 0x2e4   :  { %5238 = vmatpush1.bf16.msra.mxu0 %v10345_v58  ;;  %5754 = vmatpush1.bf16.msra.mxu1 %v10348_v59  ;;  %v190_v58 = vld [vmem:[#allocation3 + $0x150] sm:$0xff] }
 0x2e5   :  { %5239 = vmatprep.subr.bf16.mxu0 %v10353_v60  ;;  %5755 = vmatprep.subr.bf16.mxu1 %v10356_v61  ;;  %v10443_v59 = vld [vmem:[#allocation6 + $0x1404] ss:$16 sps:$4 sm:$0xff]   ;;  %v10446_v60 = vld [vmem:[#allocation6 + $0x140c] ss:$16 sps:$4 sm:$0xff]   ;;  %v214_v61 = vpack.c.bf16 %v190_v58, %v166_v57  ;;  %v10525_v57 = vld [vmem:[#allocation6 + $0x15c0] ss:$16 sps:$4 sm:$0xff]  }
 0x2e6   :  { %5269 = vmatprep.mubr.bf16.mxu0 %v215_v62  ;;  %5785 = vmatprep.mubr.bf16.mxu1 %v215_v62  ;;  %v169_v62 = vld [vmem:[#allocation3 + $0xa8] sm:$0xff] }
 0x2e7   :  { %v10528_v58 = vld [vmem:[#allocation6 + $0x15c8] ss:$16 sps:$4 sm:$0xff]  }
 0x2e8   :  { %5240 = vmatpush1.bf16.msra.mxu0 %v10351_v63  ;;  %5756 = vmatpush1.bf16.msra.mxu1 %v10354_v0  ;;  %v193_v63 = vld [vmem:[#allocation3 + $0x168] sm:$0xff]  ;;  %v10441_v0 = vld [vmem:[#allocation6 + $0x1400] ss:$16 sps:$4 sm:$0xff]  }
 0x2e9   :  { %5241 = vmatprep.subr.bf16.mxu0 %v10359_v1  ;;  %5757 = vmatprep.subr.bf16.mxu1 %v10362_v2  ;;  %v10444_v1 = vld [vmem:[#allocation6 + $0x1408] ss:$16 sps:$4 sm:$0xff]   ;;  %v10449_v2 = vld [vmem:[#allocation6 + $0x1424] ss:$16 sps:$4 sm:$0xff]  }
 0x2ec   :  { %5242 = vmatpush1.bf16.msra.mxu0 %v10357_v3  ;;  %5758 = vmatpush1.bf16.msra.mxu1 %v10360_v4  ;;  %v10452_v3 = vld [vmem:[#allocation6 + $0x142c] ss:$16 sps:$4 sm:$0xff]   ;;  %v217_v4 = vpack.c.bf16 %v193_v63, %v169_v62  ;;  %v10534_v62 = vld [vmem:[#allocation6 + $0x15e8] ss:$16 sps:$4 sm:$0xff]   ;;  %v168_v63 = vld [vmem:[#allocation3 + $0xa0] sm:$0xff] }
 0x2ed   :  { %5243 = vmatprep.subr.bf16.mxu0 %v10365_v5  ;;  %5759 = vmatprep.subr.bf16.mxu1 %v10368_v6  ;;  %v10447_v5 = vld [vmem:[#allocation6 + $0x1420] ss:$16 sps:$4 sm:$0xff]   ;;  %v10450_v6 = vld [vmem:[#allocation6 + $0x1428] ss:$16 sps:$4 sm:$0xff]  }
 0x2f0   :  { %5244 = vmatpush1.bf16.msra.mxu0 %v10363_v7  ;;  %5760 = vmatpush1.bf16.msra.mxu1 %v10366_v8  ;;  %v10455_v7 = vld [vmem:[#allocation6 + $0x1444] ss:$16 sps:$4 sm:$0xff]   ;;  %v10458_v8 = vld [vmem:[#allocation6 + $0x144c] ss:$16 sps:$4 sm:$0xff]  }
 0x2f1   :  { %5245 = vmatprep.subr.bf16.mxu0 %v10371_v9  ;;  %5761 = vmatprep.subr.bf16.mxu1 %v10374_v10  ;;  %v10453_v9 = vld [vmem:[#allocation6 + $0x1440] ss:$16 sps:$4 sm:$0xff]   ;;  %v10456_v10 = vld [vmem:[#allocation6 + $0x1448] ss:$16 sps:$4 sm:$0xff]  }
 0x2f4   :  { %5246 = vmatpush1.bf16.msra.mxu0 %v10369_v11  ;;  %5762 = vmatpush1.bf16.msra.mxu1 %v10372_v12  ;;  %v10461_v11 = vld [vmem:[#allocation6 + $0x1464] ss:$16 sps:$4 sm:$0xff]   ;;  %v10464_v12 = vld [vmem:[#allocation6 + $0x146c] ss:$16 sps:$4 sm:$0xff]  }
 0x2f5   :  { %5247 = vmatprep.subr.bf16.mxu0 %v10377_v13  ;;  %5763 = vmatprep.subr.bf16.mxu1 %v10380_v14  ;;  %v10459_v13 = vld [vmem:[#allocation6 + $0x1460] ss:$16 sps:$4 sm:$0xff]   ;;  %v10462_v14 = vld [vmem:[#allocation6 + $0x1468] ss:$16 sps:$4 sm:$0xff]  }
 0x2f8   :  { %5248 = vmatpush1.bf16.msra.mxu0 %v10375_v15  ;;  %5764 = vmatpush1.bf16.msra.mxu1 %v10378_v16  ;;  %v10467_v15 = vld [vmem:[#allocation6 + $0x1484] ss:$16 sps:$4 sm:$0xff]   ;;  %v10470_v16 = vld [vmem:[#allocation6 + $0x148c] ss:$16 sps:$4 sm:$0xff]  }
 0x2f9   :  { %5249 = vmatprep.subr.bf16.mxu0 %v10383_v17  ;;  %5765 = vmatprep.subr.bf16.mxu1 %v10386_v18  ;;  %v10465_v17 = vld [vmem:[#allocation6 + $0x1480] ss:$16 sps:$4 sm:$0xff]   ;;  %v10468_v18 = vld [vmem:[#allocation6 + $0x1488] ss:$16 sps:$4 sm:$0xff]  }
 0x2fc   :  { %5250 = vmatpush1.bf16.msra.mxu0 %v10381_v19  ;;  %5766 = vmatpush1.bf16.msra.mxu1 %v10384_v20  ;;  %v10473_v19 = vld [vmem:[#allocation6 + $0x14a4] ss:$16 sps:$4 sm:$0xff]   ;;  %v10476_v20 = vld [vmem:[#allocation6 + $0x14ac] ss:$16 sps:$4 sm:$0xff]  }
 0x2fd   :  { %5251 = vmatprep.subr.bf16.mxu0 %v10389_v21  ;;  %5767 = vmatprep.subr.bf16.mxu1 %v10392_v22  ;;  %v10471_v21 = vld [vmem:[#allocation6 + $0x14a0] ss:$16 sps:$4 sm:$0xff]   ;;  %v10474_v22 = vld [vmem:[#allocation6 + $0x14a8] ss:$16 sps:$4 sm:$0xff]  }
 0x300   :  { %5252 = vmatpush1.bf16.msra.mxu0 %v10387_v23  ;;  %5768 = vmatpush1.bf16.msra.mxu1 %v10390_v24  ;;  %v10479_v23 = vld [vmem:[#allocation6 + $0x14c4] ss:$16 sps:$4 sm:$0xff]   ;;  %v10482_v24 = vld [vmem:[#allocation6 + $0x14cc] ss:$16 sps:$4 sm:$0xff]  }
 0x301   :  { %5253 = vmatprep.subr.bf16.mxu0 %v10395_v25  ;;  %5769 = vmatprep.subr.bf16.mxu1 %v10398_v26  ;;  %v10477_v25 = vld [vmem:[#allocation6 + $0x14c0] ss:$16 sps:$4 sm:$0xff]   ;;  %v10480_v26 = vld [vmem:[#allocation6 + $0x14c8] ss:$16 sps:$4 sm:$0xff]  }
 0x304   :  { %5254 = vmatpush1.bf16.msra.mxu0 %v10393_v27  ;;  %5770 = vmatpush1.bf16.msra.mxu1 %v10396_v28  ;;  %v10485_v27 = vld [vmem:[#allocation6 + $0x14e4] ss:$16 sps:$4 sm:$0xff]   ;;  %v10488_v28 = vld [vmem:[#allocation6 + $0x14ec] ss:$16 sps:$4 sm:$0xff]  }
 0x305   :  { %5255 = vmatprep.subr.bf16.mxu0 %v10401_v29  ;;  %5771 = vmatprep.subr.bf16.mxu1 %v10404_v30  ;;  %v10483_v29 = vld [vmem:[#allocation6 + $0x14e0] ss:$16 sps:$4 sm:$0xff]   ;;  %v10486_v30 = vld [vmem:[#allocation6 + $0x14e8] ss:$16 sps:$4 sm:$0xff]  }
 0x308   :  { %5256 = vmatpush1.bf16.msra.mxu0 %v10399_v31  ;;  %5772 = vmatpush1.bf16.msra.mxu1 %v10402_v32  ;;  %v10491_v31 = vld [vmem:[#allocation6 + $0x1504] ss:$16 sps:$4 sm:$0xff]   ;;  %v10494_v32 = vld [vmem:[#allocation6 + $0x150c] ss:$16 sps:$4 sm:$0xff]  }
 0x309   :  { %5257 = vmatprep.subr.bf16.mxu0 %v10407_v33  ;;  %5773 = vmatprep.subr.bf16.mxu1 %v10410_v34  ;;  %v10489_v33 = vld [vmem:[#allocation6 + $0x1500] ss:$16 sps:$4 sm:$0xff]   ;;  %v10492_v34 = vld [vmem:[#allocation6 + $0x1508] ss:$16 sps:$4 sm:$0xff]  }
 0x30c   :  { %5258 = vmatpush1.bf16.msra.mxu0 %v10405_v35  ;;  %5774 = vmatpush1.bf16.msra.mxu1 %v10408_v36  ;;  %v10497_v35 = vld [vmem:[#allocation6 + $0x1524] ss:$16 sps:$4 sm:$0xff]   ;;  %v10500_v36 = vld [vmem:[#allocation6 + $0x152c] ss:$16 sps:$4 sm:$0xff]  }
 0x30d   :  { %5259 = vmatprep.subr.bf16.mxu0 %v10413_v37  ;;  %5775 = vmatprep.subr.bf16.mxu1 %v10416_v38  ;;  %v10495_v37 = vld [vmem:[#allocation6 + $0x1520] ss:$16 sps:$4 sm:$0xff]   ;;  %v10498_v38 = vld [vmem:[#allocation6 + $0x1528] ss:$16 sps:$4 sm:$0xff]  }
 0x310   :  { %5260 = vmatpush1.bf16.msra.mxu0 %v10411_v39  ;;  %5776 = vmatpush1.bf16.msra.mxu1 %v10414_v40  ;;  %v10503_v39 = vld [vmem:[#allocation6 + $0x1544] ss:$16 sps:$4 sm:$0xff]   ;;  %v10506_v40 = vld [vmem:[#allocation6 + $0x154c] ss:$16 sps:$4 sm:$0xff]  }
 0x311   :  { %5261 = vmatprep.subr.bf16.mxu0 %v10419_v41  ;;  %5777 = vmatprep.subr.bf16.mxu1 %v10422_v42  ;;  %v10501_v41 = vld [vmem:[#allocation6 + $0x1540] ss:$16 sps:$4 sm:$0xff]   ;;  %v10504_v42 = vld [vmem:[#allocation6 + $0x1548] ss:$16 sps:$4 sm:$0xff]  }
 0x314   :  { %5262 = vmatpush1.bf16.msra.mxu0 %v10417_v43  ;;  %5778 = vmatpush1.bf16.msra.mxu1 %v10420_v44  ;;  %v10509_v43 = vld [vmem:[#allocation6 + $0x1564] ss:$16 sps:$4 sm:$0xff]   ;;  %v10512_v44 = vld [vmem:[#allocation6 + $0x156c] ss:$16 sps:$4 sm:$0xff]  }
 0x315   :  { %5263 = vmatprep.subr.bf16.mxu0 %v10425_v45  ;;  %5779 = vmatprep.subr.bf16.mxu1 %v10428_v46  ;;  %v10507_v45 = vld [vmem:[#allocation6 + $0x1560] ss:$16 sps:$4 sm:$0xff]   ;;  %v10510_v46 = vld [vmem:[#allocation6 + $0x1568] ss:$16 sps:$4 sm:$0xff]  }
 0x318   :  { %5264 = vmatpush1.bf16.msra.mxu0 %v10423_v47  ;;  %5780 = vmatpush1.bf16.msra.mxu1 %v10426_v48  ;;  %v10515_v47 = vld [vmem:[#allocation6 + $0x1584] ss:$16 sps:$4 sm:$0xff]   ;;  %v10518_v48 = vld [vmem:[#allocation6 + $0x158c] ss:$16 sps:$4 sm:$0xff]  }
 0x319   :  { %5265 = vmatprep.subr.bf16.mxu0 %v10431_v49  ;;  %5781 = vmatprep.subr.bf16.mxu1 %v10434_v50  ;;  %v10513_v49 = vld [vmem:[#allocation6 + $0x1580] ss:$16 sps:$4 sm:$0xff]   ;;  %v10516_v50 = vld [vmem:[#allocation6 + $0x1588] ss:$16 sps:$4 sm:$0xff]  }
 0x31c   :  { %5266 = vmatpush1.bf16.msra.mxu0 %v10429_v51  ;;  %5782 = vmatpush1.bf16.msra.mxu1 %v10432_v52  ;;  %v10521_v51 = vld [vmem:[#allocation6 + $0x15a4] ss:$16 sps:$4 sm:$0xff]   ;;  %v10524_v52 = vld [vmem:[#allocation6 + $0x15ac] ss:$16 sps:$4 sm:$0xff]  }
 0x31d   :  { %5267 = vmatprep.subr.bf16.mxu0 %v10437_v53  ;;  %5783 = vmatprep.subr.bf16.mxu1 %v10440_v54  ;;  %v10519_v53 = vld [vmem:[#allocation6 + $0x15a0] ss:$16 sps:$4 sm:$0xff]   ;;  %v10522_v54 = vld [vmem:[#allocation6 + $0x15a8] ss:$16 sps:$4 sm:$0xff]  }
 0x320   :  { %5268 = vmatpush1.bf16.msra.mxu0 %v10435_v55  ;;  %5784 = vmatpush1.bf16.msra.mxu1 %v10438_v56  ;;  %v10527_v55 = vld [vmem:[#allocation6 + $0x15c4] ss:$16 sps:$4 sm:$0xff]   ;;  %v10530_v56 = vld [vmem:[#allocation6 + $0x15cc] ss:$16 sps:$4 sm:$0xff]  }
 0x321   :  { %5280 = vmatprep.subr.bf16.mxu0 %v10443_v59  ;;  %5796 = vmatprep.subr.bf16.mxu1 %v10446_v60  ;;  %v10533_v59 = vld [vmem:[#allocation6 + $0x15e4] ss:$16 sps:$4 sm:$0xff]   ;;  %v10536_v60 = vld [vmem:[#allocation6 + $0x15ec] ss:$16 sps:$4 sm:$0xff]  }
 0x323   :  { %5270 = vmatmul.mubr.bf16.vlgmr.msra.gmra.mrb[0].mxu0 %v214_v61  ;;  %5786 = vmatmul.mubr.bf16.vlgmr.msra.gmra.mrb[0].mxu1 %v214_v61  ;;  %v10531_v61 = vld [vmem:[#allocation6 + $0x15e0] ss:$16 sps:$4 sm:$0xff]  }
 0x324   :  { %5281 = vmatpush1.bf16.msra.mxu0 %v10441_v0  ;;  %5797 = vmatpush1.bf16.msra.mxu1 %v10444_v1  ;;  %v192_v0 = vld [vmem:[#allocation3 + $0x160] sm:$0xff] }
 0x325   :  { %5282 = vmatprep.subr.bf16.mxu0 %v10449_v2  ;;  %5798 = vmatprep.subr.bf16.mxu1 %v10452_v3  ;;  %v10539_v1 = vld [vmem:[#allocation6 + $0x1604] ss:$16 sps:$4 sm:$0xff]   ;;  %v10542_v2 = vld [vmem:[#allocation6 + $0x160c] ss:$16 sps:$4 sm:$0xff]   ;;  %v216_v3 = vpack.c.bf16 %v192_v0, %v168_v63  ;;  %v10621_v63 = vld [vmem:[#allocation6 + $0x17c0] ss:$16 sps:$4 sm:$0xff]  }
 0x326   :  { %5312 = vmatprep.mubr.bf16.mxu0 %v217_v4  ;;  %5828 = vmatprep.mubr.bf16.mxu1 %v217_v4  ;;  %v171_v4 = vld [vmem:[#allocation3 + $0xb8] sm:$0xff] }
 0x327   :  { %v10624_v0 = vld [vmem:[#allocation6 + $0x17c8] ss:$16 sps:$4 sm:$0xff]  }
 0x328   :  { %5283 = vmatpush1.bf16.msra.mxu0 %v10447_v5  ;;  %5799 = vmatpush1.bf16.msra.mxu1 %v10450_v6  ;;  %v195_v5 = vld [vmem:[#allocation3 + $0x178] sm:$0xff]  ;;  %v10537_v6 = vld [vmem:[#allocation6 + $0x1600] ss:$16 sps:$4 sm:$0xff]  }
 0x329   :  { %5284 = vmatprep.subr.bf16.mxu0 %v10455_v7  ;;  %5800 = vmatprep.subr.bf16.mxu1 %v10458_v8  ;;  %v10540_v7 = vld [vmem:[#allocation6 + $0x1608] ss:$16 sps:$4 sm:$0xff]   ;;  %v10545_v8 = vld [vmem:[#allocation6 + $0x1624] ss:$16 sps:$4 sm:$0xff]  }
 0x32c   :  { %5285 = vmatpush1.bf16.msra.mxu0 %v10453_v9  ;;  %5801 = vmatpush1.bf16.msra.mxu1 %v10456_v10  ;;  %v10548_v9 = vld [vmem:[#allocation6 + $0x162c] ss:$16 sps:$4 sm:$0xff]   ;;  %v219_v10 = vpack.c.bf16 %v195_v5, %v171_v4  ;;  %v10630_v4 = vld [vmem:[#allocation6 + $0x17e8] ss:$16 sps:$4 sm:$0xff]   ;;  %v170_v5 = vld [vmem:[#allocation3 + $0xb0] sm:$0xff] }
 0x32d   :  { %5286 = vmatprep.subr.bf16.mxu0 %v10461_v11  ;;  %5802 = vmatprep.subr.bf16.mxu1 %v10464_v12  ;;  %v10543_v11 = vld [vmem:[#allocation6 + $0x1620] ss:$16 sps:$4 sm:$0xff]   ;;  %v10546_v12 = vld [vmem:[#allocation6 + $0x1628] ss:$16 sps:$4 sm:$0xff]  }
 0x330   :  { %5287 = vmatpush1.bf16.msra.mxu0 %v10459_v13  ;;  %5803 = vmatpush1.bf16.msra.mxu1 %v10462_v14  ;;  %v10551_v13 = vld [vmem:[#allocation6 + $0x1644] ss:$16 sps:$4 sm:$0xff]   ;;  %v10554_v14 = vld [vmem:[#allocation6 + $0x164c] ss:$16 sps:$4 sm:$0xff]  }
 0x331   :  { %5288 = vmatprep.subr.bf16.mxu0 %v10467_v15  ;;  %5804 = vmatprep.subr.bf16.mxu1 %v10470_v16  ;;  %v10549_v15 = vld [vmem:[#allocation6 + $0x1640] ss:$16 sps:$4 sm:$0xff]   ;;  %v10552_v16 = vld [vmem:[#allocation6 + $0x1648] ss:$16 sps:$4 sm:$0xff]  }
 0x334   :  { %5289 = vmatpush1.bf16.msra.mxu0 %v10465_v17  ;;  %5805 = vmatpush1.bf16.msra.mxu1 %v10468_v18  ;;  %v10557_v17 = vld [vmem:[#allocation6 + $0x1664] ss:$16 sps:$4 sm:$0xff]   ;;  %v10560_v18 = vld [vmem:[#allocation6 + $0x166c] ss:$16 sps:$4 sm:$0xff]  }
 0x335   :  { %5290 = vmatprep.subr.bf16.mxu0 %v10473_v19  ;;  %5806 = vmatprep.subr.bf16.mxu1 %v10476_v20  ;;  %v10555_v19 = vld [vmem:[#allocation6 + $0x1660] ss:$16 sps:$4 sm:$0xff]   ;;  %v10558_v20 = vld [vmem:[#allocation6 + $0x1668] ss:$16 sps:$4 sm:$0xff]  }
 0x338   :  { %5291 = vmatpush1.bf16.msra.mxu0 %v10471_v21  ;;  %5807 = vmatpush1.bf16.msra.mxu1 %v10474_v22  ;;  %v10563_v21 = vld [vmem:[#allocation6 + $0x1684] ss:$16 sps:$4 sm:$0xff]   ;;  %v10566_v22 = vld [vmem:[#allocation6 + $0x168c] ss:$16 sps:$4 sm:$0xff]  }
 0x339   :  { %5292 = vmatprep.subr.bf16.mxu0 %v10479_v23  ;;  %5808 = vmatprep.subr.bf16.mxu1 %v10482_v24  ;;  %v10561_v23 = vld [vmem:[#allocation6 + $0x1680] ss:$16 sps:$4 sm:$0xff]   ;;  %v10564_v24 = vld [vmem:[#allocation6 + $0x1688] ss:$16 sps:$4 sm:$0xff]  }
 0x33c   :  { %5293 = vmatpush1.bf16.msra.mxu0 %v10477_v25  ;;  %5809 = vmatpush1.bf16.msra.mxu1 %v10480_v26  ;;  %v10569_v25 = vld [vmem:[#allocation6 + $0x16a4] ss:$16 sps:$4 sm:$0xff]   ;;  %v10572_v26 = vld [vmem:[#allocation6 + $0x16ac] ss:$16 sps:$4 sm:$0xff]  }
 0x33d   :  { %5294 = vmatprep.subr.bf16.mxu0 %v10485_v27  ;;  %5810 = vmatprep.subr.bf16.mxu1 %v10488_v28  ;;  %v10567_v27 = vld [vmem:[#allocation6 + $0x16a0] ss:$16 sps:$4 sm:$0xff]   ;;  %v10570_v28 = vld [vmem:[#allocation6 + $0x16a8] ss:$16 sps:$4 sm:$0xff]  }
 0x340   :  { %5295 = vmatpush1.bf16.msra.mxu0 %v10483_v29  ;;  %5811 = vmatpush1.bf16.msra.mxu1 %v10486_v30  ;;  %v10575_v29 = vld [vmem:[#allocation6 + $0x16c4] ss:$16 sps:$4 sm:$0xff]   ;;  %v10578_v30 = vld [vmem:[#allocation6 + $0x16cc] ss:$16 sps:$4 sm:$0xff]  }
 0x341   :  { %5296 = vmatprep.subr.bf16.mxu0 %v10491_v31  ;;  %5812 = vmatprep.subr.bf16.mxu1 %v10494_v32  ;;  %v10573_v31 = vld [vmem:[#allocation6 + $0x16c0] ss:$16 sps:$4 sm:$0xff]   ;;  %v10576_v32 = vld [vmem:[#allocation6 + $0x16c8] ss:$16 sps:$4 sm:$0xff]  }
 0x344   :  { %5297 = vmatpush1.bf16.msra.mxu0 %v10489_v33  ;;  %5813 = vmatpush1.bf16.msra.mxu1 %v10492_v34  ;;  %v10581_v33 = vld [vmem:[#allocation6 + $0x16e4] ss:$16 sps:$4 sm:$0xff]   ;;  %v10584_v34 = vld [vmem:[#allocation6 + $0x16ec] ss:$16 sps:$4 sm:$0xff]  }
 0x345   :  { %5298 = vmatprep.subr.bf16.mxu0 %v10497_v35  ;;  %5814 = vmatprep.subr.bf16.mxu1 %v10500_v36  ;;  %v10579_v35 = vld [vmem:[#allocation6 + $0x16e0] ss:$16 sps:$4 sm:$0xff]   ;;  %v10582_v36 = vld [vmem:[#allocation6 + $0x16e8] ss:$16 sps:$4 sm:$0xff]  }
 0x348   :  { %5299 = vmatpush1.bf16.msra.mxu0 %v10495_v37  ;;  %5815 = vmatpush1.bf16.msra.mxu1 %v10498_v38  ;;  %v10587_v37 = vld [vmem:[#allocation6 + $0x1704] ss:$16 sps:$4 sm:$0xff]   ;;  %v10590_v38 = vld [vmem:[#allocation6 + $0x170c] ss:$16 sps:$4 sm:$0xff]  }
 0x349   :  { %5300 = vmatprep.subr.bf16.mxu0 %v10503_v39  ;;  %5816 = vmatprep.subr.bf16.mxu1 %v10506_v40  ;;  %v10585_v39 = vld [vmem:[#allocation6 + $0x1700] ss:$16 sps:$4 sm:$0xff]   ;;  %v10588_v40 = vld [vmem:[#allocation6 + $0x1708] ss:$16 sps:$4 sm:$0xff]  }
 0x34c   :  { %5301 = vmatpush1.bf16.msra.mxu0 %v10501_v41  ;;  %5817 = vmatpush1.bf16.msra.mxu1 %v10504_v42  ;;  %v10593_v41 = vld [vmem:[#allocation6 + $0x1724] ss:$16 sps:$4 sm:$0xff]   ;;  %v10596_v42 = vld [vmem:[#allocation6 + $0x172c] ss:$16 sps:$4 sm:$0xff]  }
 0x34d   :  { %5302 = vmatprep.subr.bf16.mxu0 %v10509_v43  ;;  %5818 = vmatprep.subr.bf16.mxu1 %v10512_v44  ;;  %v10591_v43 = vld [vmem:[#allocation6 + $0x1720] ss:$16 sps:$4 sm:$0xff]   ;;  %v10594_v44 = vld [vmem:[#allocation6 + $0x1728] ss:$16 sps:$4 sm:$0xff]  }
 0x350   :  { %5303 = vmatpush1.bf16.msra.mxu0 %v10507_v45  ;;  %5819 = vmatpush1.bf16.msra.mxu1 %v10510_v46  ;;  %v10599_v45 = vld [vmem:[#allocation6 + $0x1744] ss:$16 sps:$4 sm:$0xff]   ;;  %v10602_v46 = vld [vmem:[#allocation6 + $0x174c] ss:$16 sps:$4 sm:$0xff]  }
 0x351   :  { %5304 = vmatprep.subr.bf16.mxu0 %v10515_v47  ;;  %5820 = vmatprep.subr.bf16.mxu1 %v10518_v48  ;;  %v10597_v47 = vld [vmem:[#allocation6 + $0x1740] ss:$16 sps:$4 sm:$0xff]   ;;  %v10600_v48 = vld [vmem:[#allocation6 + $0x1748] ss:$16 sps:$4 sm:$0xff]  }
 0x354   :  { %5305 = vmatpush1.bf16.msra.mxu0 %v10513_v49  ;;  %5821 = vmatpush1.bf16.msra.mxu1 %v10516_v50  ;;  %v10605_v49 = vld [vmem:[#allocation6 + $0x1764] ss:$16 sps:$4 sm:$0xff]   ;;  %v10608_v50 = vld [vmem:[#allocation6 + $0x176c] ss:$16 sps:$4 sm:$0xff]  }
 0x355   :  { %5306 = vmatprep.subr.bf16.mxu0 %v10521_v51  ;;  %5822 = vmatprep.subr.bf16.mxu1 %v10524_v52  ;;  %v10603_v51 = vld [vmem:[#allocation6 + $0x1760] ss:$16 sps:$4 sm:$0xff]   ;;  %v10606_v52 = vld [vmem:[#allocation6 + $0x1768] ss:$16 sps:$4 sm:$0xff]  }
 0x358   :  { %5307 = vmatpush1.bf16.msra.mxu0 %v10519_v53  ;;  %5823 = vmatpush1.bf16.msra.mxu1 %v10522_v54  ;;  %v10611_v53 = vld [vmem:[#allocation6 + $0x1784] ss:$16 sps:$4 sm:$0xff]   ;;  %v10614_v54 = vld [vmem:[#allocation6 + $0x178c] ss:$16 sps:$4 sm:$0xff]  }
 0x359   :  { %5308 = vmatprep.subr.bf16.mxu0 %v10527_v55  ;;  %5824 = vmatprep.subr.bf16.mxu1 %v10530_v56  ;;  %v10609_v55 = vld [vmem:[#allocation6 + $0x1780] ss:$16 sps:$4 sm:$0xff]   ;;  %v10612_v56 = vld [vmem:[#allocation6 + $0x1788] ss:$16 sps:$4 sm:$0xff]  }
 0x35c   :  { %5309 = vmatpush1.bf16.msra.mxu0 %v10525_v57  ;;  %5825 = vmatpush1.bf16.msra.mxu1 %v10528_v58  ;;  %v10617_v57 = vld [vmem:[#allocation6 + $0x17a4] ss:$16 sps:$4 sm:$0xff]   ;;  %v10620_v58 = vld [vmem:[#allocation6 + $0x17ac] ss:$16 sps:$4 sm:$0xff]  }
 0x35d   :  { %5310 = vmatprep.subr.bf16.mxu0 %v10533_v59  ;;  %5826 = vmatprep.subr.bf16.mxu1 %v10536_v60  ;;  %v10615_v59 = vld [vmem:[#allocation6 + $0x17a0] ss:$16 sps:$4 sm:$0xff]   ;;  %v10618_v60 = vld [vmem:[#allocation6 + $0x17a8] ss:$16 sps:$4 sm:$0xff]  }
 0x360   :  { %5311 = vmatpush1.bf16.msra.mxu0 %v10531_v61  ;;  %5827 = vmatpush1.bf16.msra.mxu1 %v10534_v62  ;;  %v10623_v61 = vld [vmem:[#allocation6 + $0x17c4] ss:$16 sps:$4 sm:$0xff]   ;;  %v10626_v62 = vld [vmem:[#allocation6 + $0x17cc] ss:$16 sps:$4 sm:$0xff]  }
 0x361   :  { %5323 = vmatprep.subr.bf16.mxu0 %v10539_v1  ;;  %5839 = vmatprep.subr.bf16.mxu1 %v10542_v2  ;;  %v10629_v1 = vld [vmem:[#allocation6 + $0x17e4] ss:$16 sps:$4 sm:$0xff]   ;;  %v10632_v2 = vld [vmem:[#allocation6 + $0x17ec] ss:$16 sps:$4 sm:$0xff]  }
 0x363   :  { %5313 = vmatmul.mubr.bf16.vlgmr.msra.gmra.mrb[0].mxu0 %v216_v3  ;;  %5829 = vmatmul.mubr.bf16.vlgmr.msra.gmra.mrb[0].mxu1 %v216_v3  ;;  %v10627_v3 = vld [vmem:[#allocation6 + $0x17e0] ss:$16 sps:$4 sm:$0xff]  }
 0x364   :  { %5324 = vmatpush1.bf16.msra.mxu0 %v10537_v6  ;;  %5840 = vmatpush1.bf16.msra.mxu1 %v10540_v7  ;;  %v194_v6 = vld [vmem:[#allocation3 + $0x170] sm:$0xff]  ;;  %v10635_v7 = vld [vmem:[#allocation9 + $0x4] ss:$16 sps:$4 sm:$0xff]  }
 0x365   :  { %5325 = vmatprep.subr.bf16.mxu0 %v10545_v8  ;;  %5841 = vmatprep.subr.bf16.mxu1 %v10548_v9  ;;  %v10638_v8 = vld [vmem:[#allocation9 + $0xc] ss:$16 sps:$4 sm:$0xff]   ;;  %v218_v9 = vpack.c.bf16 %v194_v6, %v170_v5  ;;  %v10723_v6 = vld [vmem:[#allocation9 + $0x1e0] ss:$16 sps:$4 sm:$0xff]  }
 0x366   :  { %5355 = vmatprep.mubr.bf16.mxu0 %v219_v10  ;;  %5871 = vmatprep.mubr.bf16.mxu1 %v219_v10  ;;  %v10633_v10 = vld [vmem:[#allocation9] ss:$16 sps:$4 sm:$0xff]   ;;  %v10728_v5 = vld [vmem:[#allocation9 + $0x1ec] ss:$16 sps:$4 sm:$0xff]  }
 0x368   :  { %5326 = vmatpush1.bf16.msra.mxu0 %v10543_v11  ;;  %5842 = vmatpush1.bf16.msra.mxu1 %v10546_v12  ;;  %v10636_v11 = vld [vmem:[#allocation9 + $0x8] ss:$16 sps:$4 sm:$0xff]   ;;  %v10641_v12 = vld [vmem:[#allocation9 + $0x24] ss:$16 sps:$4 sm:$0xff]  }
 0x369   :  { %5327 = vmatprep.subr.bf16.mxu0 %v10551_v13  ;;  %5843 = vmatprep.subr.bf16.mxu1 %v10554_v14  ;;  %v10644_v13 = vld [vmem:[#allocation9 + $0x2c] ss:$16 sps:$4 sm:$0xff]   ;;  %v10639_v14 = vld [vmem:[#allocation9 + $0x20] ss:$16 sps:$4 sm:$0xff]  }
 0x36c   :  { %5328 = vmatpush1.bf16.msra.mxu0 %v10549_v15  ;;  %5844 = vmatpush1.bf16.msra.mxu1 %v10552_v16  ;;  %v10642_v15 = vld [vmem:[#allocation9 + $0x28] ss:$16 sps:$4 sm:$0xff]   ;;  %v10647_v16 = vld [vmem:[#allocation9 + $0x44] ss:$16 sps:$4 sm:$0xff]  }
 0x36d   :  { %5329 = vmatprep.subr.bf16.mxu0 %v10557_v17  ;;  %5845 = vmatprep.subr.bf16.mxu1 %v10560_v18  ;;  %v10650_v17 = vld [vmem:[#allocation9 + $0x4c] ss:$16 sps:$4 sm:$0xff]   ;;  %v10645_v18 = vld [vmem:[#allocation9 + $0x40] ss:$16 sps:$4 sm:$0xff]  }
 0x370   :  { %5330 = vmatpush1.bf16.msra.mxu0 %v10555_v19  ;;  %5846 = vmatpush1.bf16.msra.mxu1 %v10558_v20  ;;  %v10648_v19 = vld [vmem:[#allocation9 + $0x48] ss:$16 sps:$4 sm:$0xff]   ;;  %v10653_v20 = vld [vmem:[#allocation9 + $0x64] ss:$16 sps:$4 sm:$0xff]  }
 0x371   :  { %5331 = vmatprep.subr.bf16.mxu0 %v10563_v21  ;;  %5847 = vmatprep.subr.bf16.mxu1 %v10566_v22  ;;  %v10656_v21 = vld [vmem:[#allocation9 + $0x6c] ss:$16 sps:$4 sm:$0xff]   ;;  %v10651_v22 = vld [vmem:[#allocation9 + $0x60] ss:$16 sps:$4 sm:$0xff]  }
 0x374   :  { %5332 = vmatpush1.bf16.msra.mxu0 %v10561_v23  ;;  %5848 = vmatpush1.bf16.msra.mxu1 %v10564_v24  ;;  %v10654_v23 = vld [vmem:[#allocation9 + $0x68] ss:$16 sps:$4 sm:$0xff]   ;;  %v10659_v24 = vld [vmem:[#allocation9 + $0x84] ss:$16 sps:$4 sm:$0xff]  }
 0x375   :  { %5333 = vmatprep.subr.bf16.mxu0 %v10569_v25  ;;  %5849 = vmatprep.subr.bf16.mxu1 %v10572_v26  ;;  %v10662_v25 = vld [vmem:[#allocation9 + $0x8c] ss:$16 sps:$4 sm:$0xff]   ;;  %v10657_v26 = vld [vmem:[#allocation9 + $0x80] ss:$16 sps:$4 sm:$0xff]  }
 0x378   :  { %5334 = vmatpush1.bf16.msra.mxu0 %v10567_v27  ;;  %5850 = vmatpush1.bf16.msra.mxu1 %v10570_v28  ;;  %v10660_v27 = vld [vmem:[#allocation9 + $0x88] ss:$16 sps:$4 sm:$0xff]   ;;  %v10665_v28 = vld [vmem:[#allocation9 + $0xa4] ss:$16 sps:$4 sm:$0xff]  }
 0x379   :  { %5335 = vmatprep.subr.bf16.mxu0 %v10575_v29  ;;  %5851 = vmatprep.subr.bf16.mxu1 %v10578_v30  ;;  %v10668_v29 = vld [vmem:[#allocation9 + $0xac] ss:$16 sps:$4 sm:$0xff]   ;;  %v10663_v30 = vld [vmem:[#allocation9 + $0xa0] ss:$16 sps:$4 sm:$0xff]  }
 0x37c   :  { %5336 = vmatpush1.bf16.msra.mxu0 %v10573_v31  ;;  %5852 = vmatpush1.bf16.msra.mxu1 %v10576_v32  ;;  %v10666_v31 = vld [vmem:[#allocation9 + $0xa8] ss:$16 sps:$4 sm:$0xff]   ;;  %v10671_v32 = vld [vmem:[#allocation9 + $0xc4] ss:$16 sps:$4 sm:$0xff]  }
 0x37d   :  { %5337 = vmatprep.subr.bf16.mxu0 %v10581_v33  ;;  %5853 = vmatprep.subr.bf16.mxu1 %v10584_v34  ;;  %v10674_v33 = vld [vmem:[#allocation9 + $0xcc] ss:$16 sps:$4 sm:$0xff]   ;;  %v10669_v34 = vld [vmem:[#allocation9 + $0xc0] ss:$16 sps:$4 sm:$0xff]  }
 0x380   :  { %5338 = vmatpush1.bf16.msra.mxu0 %v10579_v35  ;;  %5854 = vmatpush1.bf16.msra.mxu1 %v10582_v36  ;;  %v10672_v35 = vld [vmem:[#allocation9 + $0xc8] ss:$16 sps:$4 sm:$0xff]   ;;  %v10677_v36 = vld [vmem:[#allocation9 + $0xe4] ss:$16 sps:$4 sm:$0xff]  }
 0x381   :  { %5339 = vmatprep.subr.bf16.mxu0 %v10587_v37  ;;  %5855 = vmatprep.subr.bf16.mxu1 %v10590_v38  ;;  %v10680_v37 = vld [vmem:[#allocation9 + $0xec] ss:$16 sps:$4 sm:$0xff]   ;;  %v10675_v38 = vld [vmem:[#allocation9 + $0xe0] ss:$16 sps:$4 sm:$0xff]  }
 0x384   :  { %5340 = vmatpush1.bf16.msra.mxu0 %v10585_v39  ;;  %5856 = vmatpush1.bf16.msra.mxu1 %v10588_v40  ;;  %v10678_v39 = vld [vmem:[#allocation9 + $0xe8] ss:$16 sps:$4 sm:$0xff]   ;;  %v10683_v40 = vld [vmem:[#allocation9 + $0x104] ss:$16 sps:$4 sm:$0xff]  }
 0x385   :  { %5341 = vmatprep.subr.bf16.mxu0 %v10593_v41  ;;  %5857 = vmatprep.subr.bf16.mxu1 %v10596_v42  ;;  %v10686_v41 = vld [vmem:[#allocation9 + $0x10c] ss:$16 sps:$4 sm:$0xff]   ;;  %v10681_v42 = vld [vmem:[#allocation9 + $0x100] ss:$16 sps:$4 sm:$0xff]  }
 0x388   :  { %5342 = vmatpush1.bf16.msra.mxu0 %v10591_v43  ;;  %5858 = vmatpush1.bf16.msra.mxu1 %v10594_v44  ;;  %v10684_v43 = vld [vmem:[#allocation9 + $0x108] ss:$16 sps:$4 sm:$0xff]   ;;  %v10689_v44 = vld [vmem:[#allocation9 + $0x124] ss:$16 sps:$4 sm:$0xff]  }
 0x389   :  { %5343 = vmatprep.subr.bf16.mxu0 %v10599_v45  ;;  %5859 = vmatprep.subr.bf16.mxu1 %v10602_v46  ;;  %v10692_v45 = vld [vmem:[#allocation9 + $0x12c] ss:$16 sps:$4 sm:$0xff]   ;;  %v10687_v46 = vld [vmem:[#allocation9 + $0x120] ss:$16 sps:$4 sm:$0xff]  }
 0x38c   :  { %5344 = vmatpush1.bf16.msra.mxu0 %v10597_v47  ;;  %5860 = vmatpush1.bf16.msra.mxu1 %v10600_v48  ;;  %v10690_v47 = vld [vmem:[#allocation9 + $0x128] ss:$16 sps:$4 sm:$0xff]   ;;  %v10695_v48 = vld [vmem:[#allocation9 + $0x144] ss:$16 sps:$4 sm:$0xff]  }
 0x38d   :  { %5345 = vmatprep.subr.bf16.mxu0 %v10605_v49  ;;  %5861 = vmatprep.subr.bf16.mxu1 %v10608_v50  ;;  %v10698_v49 = vld [vmem:[#allocation9 + $0x14c] ss:$16 sps:$4 sm:$0xff]   ;;  %v10693_v50 = vld [vmem:[#allocation9 + $0x140] ss:$16 sps:$4 sm:$0xff]  }
 0x390   :  { %5346 = vmatpush1.bf16.msra.mxu0 %v10603_v51  ;;  %5862 = vmatpush1.bf16.msra.mxu1 %v10606_v52  ;;  %v10696_v51 = vld [vmem:[#allocation9 + $0x148] ss:$16 sps:$4 sm:$0xff]   ;;  %v10701_v52 = vld [vmem:[#allocation9 + $0x164] ss:$16 sps:$4 sm:$0xff]  }
 0x391   :  { %5347 = vmatprep.subr.bf16.mxu0 %v10611_v53  ;;  %5863 = vmatprep.subr.bf16.mxu1 %v10614_v54  ;;  %v10704_v53 = vld [vmem:[#allocation9 + $0x16c] ss:$16 sps:$4 sm:$0xff]   ;;  %v10699_v54 = vld [vmem:[#allocation9 + $0x160] ss:$16 sps:$4 sm:$0xff]  }
 0x394   :  { %5348 = vmatpush1.bf16.msra.mxu0 %v10609_v55  ;;  %5864 = vmatpush1.bf16.msra.mxu1 %v10612_v56  ;;  %v10702_v55 = vld [vmem:[#allocation9 + $0x168] ss:$16 sps:$4 sm:$0xff]   ;;  %v10707_v56 = vld [vmem:[#allocation9 + $0x184] ss:$16 sps:$4 sm:$0xff]  }
 0x395   :  { %5349 = vmatprep.subr.bf16.mxu0 %v10617_v57  ;;  %5865 = vmatprep.subr.bf16.mxu1 %v10620_v58  ;;  %v10710_v57 = vld [vmem:[#allocation9 + $0x18c] ss:$16 sps:$4 sm:$0xff]   ;;  %v10705_v58 = vld [vmem:[#allocation9 + $0x180] ss:$16 sps:$4 sm:$0xff]  }
 0x398   :  { %5350 = vmatpush1.bf16.msra.mxu0 %v10615_v59  ;;  %5866 = vmatpush1.bf16.msra.mxu1 %v10618_v60  ;;  %v10708_v59 = vld [vmem:[#allocation9 + $0x188] ss:$16 sps:$4 sm:$0xff]   ;;  %v10713_v60 = vld [vmem:[#allocation9 + $0x1a4] ss:$16 sps:$4 sm:$0xff]  }
 0x399   :  { %5351 = vmatprep.subr.bf16.mxu0 %v10623_v61  ;;  %5867 = vmatprep.subr.bf16.mxu1 %v10626_v62  ;;  %v10716_v61 = vld [vmem:[#allocation9 + $0x1ac] ss:$16 sps:$4 sm:$0xff]   ;;  %v10711_v62 = vld [vmem:[#allocation9 + $0x1a0] ss:$16 sps:$4 sm:$0xff]  }
 0x39c   :  { %5352 = vmatpush1.bf16.msra.mxu0 %v10621_v63  ;;  %5868 = vmatpush1.bf16.msra.mxu1 %v10624_v0  ;;  %v10714_v63 = vld [vmem:[#allocation9 + $0x1a8] ss:$16 sps:$4 sm:$0xff]   ;;  %v10719_v0 = vld [vmem:[#allocation9 + $0x1c4] ss:$16 sps:$4 sm:$0xff]  }
 0x39d   :  { %5353 = vmatprep.subr.bf16.mxu0 %v10629_v1  ;;  %5869 = vmatprep.subr.bf16.mxu1 %v10632_v2  ;;  %v10722_v1 = vld [vmem:[#allocation9 + $0x1cc] ss:$16 sps:$4 sm:$0xff]   ;;  %v10717_v2 = vld [vmem:[#allocation9 + $0x1c0] ss:$16 sps:$4 sm:$0xff]  }
 0x3a0   :  { %5354 = vmatpush1.bf16.msra.mxu0 %v10627_v3  ;;  %5870 = vmatpush1.bf16.msra.mxu1 %v10630_v4  ;;  %v10720_v3 = vld [vmem:[#allocation9 + $0x1c8] ss:$16 sps:$4 sm:$0xff]   ;;  %v10725_v4 = vld [vmem:[#allocation9 + $0x1e4] ss:$16 sps:$4 sm:$0xff]  }
 0x3a1   :  { %6692 = vmatprep.subr.bf16.mxu0 %v10635_v7  ;;  %6778 = vmatprep.subr.bf16.mxu1 %v10638_v8  ;;  %v10726_v7 = vld [vmem:[#allocation9 + $0x1e8] ss:$16 sps:$4 sm:$0xff]   ;;  %v10731_v8 = vld [vmem:[#allocation9 + $0x204] ss:$16 sps:$4 sm:$0xff]  }
 0x3a3   :  { %5356 = vmatmul.mubr.bf16.vlgmr.msra.gmra.mrb[0].mxu0 %v218_v9  ;;  %5872 = vmatmul.mubr.bf16.vlgmr.msra.gmra.mrb[0].mxu1 %v218_v9  ;;  %v10734_v9 = vld [vmem:[#allocation9 + $0x20c] ss:$16 sps:$4 sm:$0xff]  }
 0x3a4   :  { %6693 = vmatpush1.bf16.msra.mxu0 %v10633_v10  ;;  %6779 = vmatpush1.bf16.msra.mxu1 %v10636_v11  ;;  %v990_v10 = vlaneseq }
 0x3a5   :  { %6694 = vmatprep.subr.bf16.mxu0 %v10641_v12  ;;  %6780 = vmatprep.subr.bf16.mxu1 %v10644_v13 }
 0x3a6   :  { %v991_v11 = vshrl.u32 %v990_v10, 7  ;;  %v10768_v10 = vld [vmem:[#allocation9 + $0x2c8] ss:$16 sps:$4 sm:$0xff]  }
 0x3a8   :  { %6695 = vmatpush1.bf16.msra.mxu0 %v10639_v14  ;;  %6781 = vmatpush1.bf16.msra.mxu1 %v10642_v15  ;;  %v11466_v12 = vsub.s32 0, %v991_v11  ;;  %v11468_v13 = vsub.s32 2, %v991_v11  ;;  %v988_v14 = vld [vmem:[#allocation8] sm:$0xf]  ;;  %v11470_v15 = vsub.s32 1, %v991_v11 }
 0x3a9   :  { %6696 = vmatprep.subr.bf16.mxu0 %v10647_v16  ;;  %6782 = vmatprep.subr.bf16.mxu1 %v10650_v17  ;;  %v11472_v16 = vsub.s32 3, %v991_v11  ;;  %v10773_v11 = vld [vmem:[#allocation9 + $0x2e4] ss:$16 sps:$4 sm:$0xff]  }
 0x3aa   :  { %v993_v17 = vrot.slane %v988_v14, %v11466_v12 }
 0x3ac   :  { %6697 = vmatpush1.bf16.msra.mxu0 %v10645_v18  ;;  %6783 = vmatpush1.bf16.msra.mxu1 %v10648_v19  ;;  %v1001_v18 = vrot.slane %v988_v14, %v11468_v13  ;;  %v997_v19 = vrot.slane %v988_v14, %v11470_v15 }
 0x3ad   :  { %6698 = vmatprep.subr.bf16.mxu0 %v10653_v20  ;;  %6784 = vmatprep.subr.bf16.mxu1 %v10656_v21  ;;  %v1005_v20 = vrot.slane %v988_v14, %v11472_v16  ;;  %v10776_v14 = vld [vmem:[#allocation9 + $0x2ec] ss:$16 sps:$4 sm:$0xff]  }
 0x3b0   :  { %6699 = vmatpush1.bf16.msra.mxu0 %v10651_v22  ;;  %6785 = vmatpush1.bf16.msra.mxu1 %v10654_v23 }
 0x3b1   :  { %6700 = vmatprep.subr.bf16.mxu0 %v10659_v24  ;;  %6786 = vmatprep.subr.bf16.mxu1 %v10662_v25 }
 0x3b4   :  { %6701 = vmatpush1.bf16.msra.mxu0 %v10657_v26  ;;  %6787 = vmatpush1.bf16.msra.mxu1 %v10660_v27 }
 0x3b5   :  { %6702 = vmatprep.subr.bf16.mxu0 %v10665_v28  ;;  %6788 = vmatprep.subr.bf16.mxu1 %v10668_v29 }
 0x3b8   :  { %6703 = vmatpush1.bf16.msra.mxu0 %v10663_v30  ;;  %6789 = vmatpush1.bf16.msra.mxu1 %v10666_v31 }
 0x3b9   :  { %6704 = vmatprep.subr.bf16.mxu0 %v10671_v32  ;;  %6790 = vmatprep.subr.bf16.mxu1 %v10674_v33 }
 0x3bc   :  { %6705 = vmatpush1.bf16.msra.mxu0 %v10669_v34  ;;  %6791 = vmatpush1.bf16.msra.mxu1 %v10672_v35 }
 0x3bd   :  { %6706 = vmatprep.subr.bf16.mxu0 %v10677_v36  ;;  %6792 = vmatprep.subr.bf16.mxu1 %v10680_v37 }
 0x3c0   :  { %6707 = vmatpush1.bf16.msra.mxu0 %v10675_v38  ;;  %6793 = vmatpush1.bf16.msra.mxu1 %v10678_v39 }
 0x3c1   :  { %6708 = vmatprep.subr.bf16.mxu0 %v10683_v40  ;;  %6794 = vmatprep.subr.bf16.mxu1 %v10686_v41 }
 0x3c4   :  { %6709 = vmatpush1.bf16.msra.mxu0 %v10681_v42  ;;  %6795 = vmatpush1.bf16.msra.mxu1 %v10684_v43 }
 0x3c5   :  { %6710 = vmatprep.subr.bf16.mxu0 %v10689_v44  ;;  %6796 = vmatprep.subr.bf16.mxu1 %v10692_v45 }
 0x3c8   :  { %6711 = vmatpush1.bf16.msra.mxu0 %v10687_v46  ;;  %6797 = vmatpush1.bf16.msra.mxu1 %v10690_v47 }
 0x3c9   :  { %6712 = vmatprep.subr.bf16.mxu0 %v10695_v48  ;;  %6798 = vmatprep.subr.bf16.mxu1 %v10698_v49  ;;  %v10729_v49 = vld [vmem:[#allocation9 + $0x200] ss:$16 sps:$4 sm:$0xff]  }
 0x3cc   :  { %6713 = vmatpush1.bf16.msra.mxu0 %v10693_v50  ;;  %6799 = vmatpush1.bf16.msra.mxu1 %v10696_v51  ;;  %v10732_v50 = vld [vmem:[#allocation9 + $0x208] ss:$16 sps:$4 sm:$0xff]   ;;  %v10737_v51 = vld [vmem:[#allocation9 + $0x224] ss:$16 sps:$4 sm:$0xff]  }
 0x3cd   :  { %6714 = vmatprep.subr.bf16.mxu0 %v10701_v52  ;;  %6800 = vmatprep.subr.bf16.mxu1 %v10704_v53  ;;  %v10740_v52 = vld [vmem:[#allocation9 + $0x22c] ss:$16 sps:$4 sm:$0xff]   ;;  %v10735_v53 = vld [vmem:[#allocation9 + $0x220] ss:$16 sps:$4 sm:$0xff]  }
 0x3d0   :  { %6715 = vmatpush1.bf16.msra.mxu0 %v10699_v54  ;;  %6801 = vmatpush1.bf16.msra.mxu1 %v10702_v55  ;;  %v10738_v54 = vld [vmem:[#allocation9 + $0x228] ss:$16 sps:$4 sm:$0xff]   ;;  %v10743_v55 = vld [vmem:[#allocation9 + $0x244] ss:$16 sps:$4 sm:$0xff]  }
 0x3d1   :  { %6716 = vmatprep.subr.bf16.mxu0 %v10707_v56  ;;  %6802 = vmatprep.subr.bf16.mxu1 %v10710_v57  ;;  %v10746_v56 = vld [vmem:[#allocation9 + $0x24c] ss:$16 sps:$4 sm:$0xff]   ;;  %v10741_v57 = vld [vmem:[#allocation9 + $0x240] ss:$16 sps:$4 sm:$0xff]  }
 0x3d4   :  { %6717 = vmatpush1.bf16.msra.mxu0 %v10705_v58  ;;  %6803 = vmatpush1.bf16.msra.mxu1 %v10708_v59  ;;  %v10744_v58 = vld [vmem:[#allocation9 + $0x248] ss:$16 sps:$4 sm:$0xff]   ;;  %v10749_v59 = vld [vmem:[#allocation9 + $0x264] ss:$16 sps:$4 sm:$0xff]  }
 0x3d5   :  { %6718 = vmatprep.subr.bf16.mxu0 %v10713_v60  ;;  %6804 = vmatprep.subr.bf16.mxu1 %v10716_v61  ;;  %v10752_v60 = vld [vmem:[#allocation9 + $0x26c] ss:$16 sps:$4 sm:$0xff]   ;;  %v10747_v61 = vld [vmem:[#allocation9 + $0x260] ss:$16 sps:$4 sm:$0xff]  }
 0x3d8   :  { %6719 = vmatpush1.bf16.msra.mxu0 %v10711_v62  ;;  %6805 = vmatpush1.bf16.msra.mxu1 %v10714_v63  ;;  %v10750_v62 = vld [vmem:[#allocation9 + $0x268] ss:$16 sps:$4 sm:$0xff]   ;;  %v10755_v63 = vld [vmem:[#allocation9 + $0x284] ss:$16 sps:$4 sm:$0xff]  }
 0x3d9   :  { %6720 = vmatprep.subr.bf16.mxu0 %v10719_v0  ;;  %6806 = vmatprep.subr.bf16.mxu1 %v10722_v1  ;;  %v10758_v0 = vld [vmem:[#allocation9 + $0x28c] ss:$16 sps:$4 sm:$0xff]   ;;  %v10753_v1 = vld [vmem:[#allocation9 + $0x280] ss:$16 sps:$4 sm:$0xff]  }
 0x3dc   :  { %6721 = vmatpush1.bf16.msra.mxu0 %v10717_v2  ;;  %6807 = vmatpush1.bf16.msra.mxu1 %v10720_v3  ;;  %v10756_v2 = vld [vmem:[#allocation9 + $0x288] ss:$16 sps:$4 sm:$0xff]   ;;  %v10761_v3 = vld [vmem:[#allocation9 + $0x2a4] ss:$16 sps:$4 sm:$0xff]  }
 0x3dd   :  { %6722 = vmatprep.subr.bf16.mxu0 %v10725_v4  ;;  %6808 = vmatprep.subr.bf16.mxu1 %v10728_v5  ;;  %v10764_v4 = vld [vmem:[#allocation9 + $0x2ac] ss:$16 sps:$4 sm:$0xff]   ;;  %v10759_v5 = vld [vmem:[#allocation9 + $0x2a0] ss:$16 sps:$4 sm:$0xff]  }
 0x3e0   :  { %6723 = vmatpush1.bf16.msra.mxu0 %v10723_v6  ;;  %6809 = vmatpush1.bf16.msra.mxu1 %v10726_v7  ;;  %v10762_v6 = vld [vmem:[#allocation9 + $0x2a8] ss:$16 sps:$4 sm:$0xff]   ;;  %v10767_v7 = vld [vmem:[#allocation9 + $0x2c4] ss:$16 sps:$4 sm:$0xff]  }
 0x3e1   :  { %6735 = vmatprep.subr.bf16.mxu0 %v10731_v8  ;;  %6821 = vmatprep.subr.bf16.mxu1 %v10734_v9  ;;  %v10770_v8 = vld [vmem:[#allocation9 + $0x2cc] ss:$16 sps:$4 sm:$0xff]   ;;  %v10765_v9 = vld [vmem:[#allocation9 + $0x2c0] ss:$16 sps:$4 sm:$0xff]  }
 0x476   :  { %v5357_v21 = vpop.f32.mrb[0].mxu0  ;;  %v5873_v22 = vpop.f32.mrb[0].mxu1 }
 0x477   :  { %v9335_v23 = vadd.f32 %v5357_v21, %v993_v17  ;;  %v9339_v24 = vadd.f32 %v5873_v22, %v1001_v18  ;;  %v5359_v25 = vpop.f32.mrb[1].mxu0  ;;  %v5875_v26 = vpop.f32.mrb[1].mxu1  ;;  %v10777_v21 = vld [vmem:[#allocation9 + $0x300] ss:$16 sps:$4 sm:$0xff]   ;;  %v10780_v22 = vld [vmem:[#allocation9 + $0x308] ss:$16 sps:$4 sm:$0xff]  }
 0x478   :  { %v9336_v27 = vadd.f32 %v5359_v25, %v997_v19  ;;  %v9340_v28 = vadd.f32 %v5875_v26, %v1005_v20  ;;  %v5361_v29 = vpop.f32.mrb[2].mxu0  ;;  %v5877_v30 = vpop.f32.mrb[2].mxu1  ;;  %v10783_v25 = vld [vmem:[#allocation9 + $0x320] ss:$16 sps:$4 sm:$0xff]   ;;  %v10786_v26 = vld [vmem:[#allocation9 + $0x328] ss:$16 sps:$4 sm:$0xff]  }
 0x479   :  { %v9337_v31 = vadd.f32 %v5361_v29, %v993_v17  ;;  %v9341_v32 = vadd.f32 %v5877_v30, %v1001_v18  ;;  %v5363_v33 = vpop.f32.mrb[3].mxu0  ;;  %v5879_v34 = vpop.f32.mrb[3].mxu1  ;;  %v5882_v37 = vmax.f32 %v9335_v23, 0.0  ;;  %v5884_v38 = vmax.f32 %v9339_v24, 0.0  ;;  %v10771_v17 = vld [vmem:[#allocation9 + $0x2e0] ss:$16 sps:$4 sm:$0xff]  }
 0x47a   :  { %v9338_v35 = vadd.f32 %v5363_v33, %v997_v19  ;;  %v9342_v36 = vadd.f32 %v5879_v34, %v1005_v20  ;;  %v5883_v41 = vmax.f32 %v9336_v27, 0.0  ;;  %v5885_v42 = vmax.f32 %v9340_v28, 0.0  ;;  %v10774_v18 = vld [vmem:[#allocation9 + $0x2e8] ss:$16 sps:$4 sm:$0xff]   ;;  %v10779_v19 = vld [vmem:[#allocation9 + $0x304] ss:$16 sps:$4 sm:$0xff]  }
 0x47b   :  { %v5886_v39 = vmax.f32 %v9337_v31, 0.0  ;;  %v5888_v40 = vmax.f32 %v9341_v32, 0.0  ;;  %v10782_v20 = vld [vmem:[#allocation9 + $0x30c] ss:$16 sps:$4 sm:$0xff]   ;;  %v10785_v23 = vld [vmem:[#allocation9 + $0x324] ss:$16 sps:$4 sm:$0xff]  }
 0x47c   :  { %v5887_v43 = vmax.f32 %v9338_v35, 0.0  ;;  %v5889_v44 = vmax.f32 %v9342_v36, 0.0  ;;  %v10788_v24 = vld [vmem:[#allocation9 + $0x32c] ss:$16 sps:$4 sm:$0xff]   ;;  %v10791_v27 = vld [vmem:[#allocation9 + $0x344] ss:$16 sps:$4 sm:$0xff]  }
 0x47d   :  { %v5890_v45 = vpack.c.bf16 %v5886_v39, %v5882_v37  ;;  %v11478_v46 = vpack.c.bf16 %v5888_v40, %v5884_v38  ;;  %v10794_v28 = vld [vmem:[#allocation9 + $0x34c] ss:$16 sps:$4 sm:$0xff]   ;;  %v10789_v29 = vld [vmem:[#allocation9 + $0x340] ss:$16 sps:$4 sm:$0xff]   ;;  %v10792_v30 = vld [vmem:[#allocation9 + $0x348] ss:$16 sps:$4 sm:$0xff]  }
 0x47e   :  { %v5891_v47 = vpack.c.bf16 %v5887_v43, %v5883_v41  ;;  %v5893_v48 = vpack.c.bf16 %v5889_v44, %v5885_v42  ;;  %v10797_v31 = vld [vmem:[#allocation9 + $0x364] ss:$16 sps:$4 sm:$0xff]   ;;  %v10800_v32 = vld [vmem:[#allocation9 + $0x36c] ss:$16 sps:$4 sm:$0xff]   ;;  %v10795_v33 = vld [vmem:[#allocation9 + $0x360] ss:$16 sps:$4 sm:$0xff]  }
 0x47f   :  { %v10798_v34 = vld [vmem:[#allocation9 + $0x368] ss:$16 sps:$4 sm:$0xff]   ;;  %v10803_v35 = vld [vmem:[#allocation9 + $0x384] ss:$16 sps:$4 sm:$0xff]   ;;  %v10806_v36 = vld [vmem:[#allocation9 + $0x38c] ss:$16 sps:$4 sm:$0xff]  }
 0x480   :  { %6724 = vmatprep.mubr.bf16.mxu0 %v5891_v47  ;;  %6810 = vmatprep.mubr.bf16.mxu1 %v5891_v47  ;;  %v10801_v37 = vld [vmem:[#allocation9 + $0x380] ss:$16 sps:$4 sm:$0xff]   ;;  %v10804_v38 = vld [vmem:[#allocation9 + $0x388] ss:$16 sps:$4 sm:$0xff]   ;;  %v10809_v39 = vld [vmem:[#allocation9 + $0x3a4] ss:$16 sps:$4 sm:$0xff]  }
 0x481   :  { %6725 = vmatmul.mubr.bf16.vlgmr.msra.gmra.mrb[4].mxu0 %v5890_v45  ;;  %6811 = vmatmul.mubr.bf16.vlgmr.msra.gmra.mrb[4].mxu1 %v5890_v45  ;;  %v10812_v40 = vld [vmem:[#allocation9 + $0x3ac] ss:$16 sps:$4 sm:$0xff]   ;;  %v10807_v41 = vld [vmem:[#allocation9 + $0x3a0] ss:$16 sps:$4 sm:$0xff]   ;;  %v10810_v42 = vld [vmem:[#allocation9 + $0x3a8] ss:$16 sps:$4 sm:$0xff]  }
 0x482   :  { %6736 = vmatpush1.bf16.msra.mxu0 %v10729_v49  ;;  %6822 = vmatpush1.bf16.msra.mxu1 %v10732_v50  ;;  %v10815_v43 = vld [vmem:[#allocation9 + $0x3c4] ss:$16 sps:$4 sm:$0xff]   ;;  %v10818_v44 = vld [vmem:[#allocation9 + $0x3cc] ss:$16 sps:$4 sm:$0xff]   ;;  %v10813_v45 = vld [vmem:[#allocation9 + $0x3c0] ss:$16 sps:$4 sm:$0xff]  }
 0x483   :  { %6767 = vmatprep.mubr.bf16.mxu0 %v5893_v48  ;;  %6853 = vmatprep.mubr.bf16.mxu1 %v5893_v48  ;;  %v10816_v47 = vld [vmem:[#allocation9 + $0x3c8] ss:$16 sps:$4 sm:$0xff]   ;;  %v10821_v48 = vld [vmem:[#allocation9 + $0x3e4] ss:$16 sps:$4 sm:$0xff]   ;;  %v10824_v49 = vld [vmem:[#allocation9 + $0x3ec] ss:$16 sps:$4 sm:$0xff]  }
 0x484   :  { %6737 = vmatprep.subr.bf16.mxu0 %v10737_v51  ;;  %6823 = vmatprep.subr.bf16.mxu1 %v10740_v52  ;;  %v10819_v50 = vld [vmem:[#allocation9 + $0x3e0] ss:$16 sps:$4 sm:$0xff]   ;;  %v10822_v51 = vld [vmem:[#allocation9 + $0x3e8] ss:$16 sps:$4 sm:$0xff]  }
 0x485   :  { %v10827_v52 = vld [vmem:[#allocation12 + $0x4] ss:$16 sps:$4 sm:$0xff]  }
 0x486   :  { %6738 = vmatpush1.bf16.msra.mxu0 %v10735_v53  ;;  %6824 = vmatpush1.bf16.msra.mxu1 %v10738_v54  ;;  %v10830_v53 = vld [vmem:[#allocation12 + $0xc] ss:$16 sps:$4 sm:$0xff]   ;;  %v10825_v54 = vld [vmem:[#allocation12] ss:$16 sps:$4 sm:$0xff]  }
 0x487   :  { %6739 = vmatprep.subr.bf16.mxu0 %v10743_v55  ;;  %6825 = vmatprep.subr.bf16.mxu1 %v10746_v56  ;;  %v10828_v55 = vld [vmem:[#allocation12 + $0x8] ss:$16 sps:$4 sm:$0xff]   ;;  %v10833_v56 = vld [vmem:[#allocation12 + $0x24] ss:$16 sps:$4 sm:$0xff]  }
 0x48a   :  { %6740 = vmatpush1.bf16.msra.mxu0 %v10741_v57  ;;  %6826 = vmatpush1.bf16.msra.mxu1 %v10744_v58  ;;  %v10836_v57 = vld [vmem:[#allocation12 + $0x2c] ss:$16 sps:$4 sm:$0xff]   ;;  %v10831_v58 = vld [vmem:[#allocation12 + $0x20] ss:$16 sps:$4 sm:$0xff]  }
 0x48b   :  { %6741 = vmatprep.subr.bf16.mxu0 %v10749_v59  ;;  %6827 = vmatprep.subr.bf16.mxu1 %v10752_v60  ;;  %v10834_v59 = vld [vmem:[#allocation12 + $0x28] ss:$16 sps:$4 sm:$0xff]   ;;  %v10839_v60 = vld [vmem:[#allocation12 + $0x44] ss:$16 sps:$4 sm:$0xff]  }
 0x48e   :  { %6742 = vmatpush1.bf16.msra.mxu0 %v10747_v61  ;;  %6828 = vmatpush1.bf16.msra.mxu1 %v10750_v62  ;;  %v10842_v61 = vld [vmem:[#allocation12 + $0x4c] ss:$16 sps:$4 sm:$0xff]   ;;  %v10837_v62 = vld [vmem:[#allocation12 + $0x40] ss:$16 sps:$4 sm:$0xff]  }
 0x48f   :  { %6743 = vmatprep.subr.bf16.mxu0 %v10755_v63  ;;  %6829 = vmatprep.subr.bf16.mxu1 %v10758_v0  ;;  %v10840_v63 = vld [vmem:[#allocation12 + $0x48] ss:$16 sps:$4 sm:$0xff]   ;;  %v10845_v0 = vld [vmem:[#allocation12 + $0x64] ss:$16 sps:$4 sm:$0xff]  }
 0x492   :  { %6744 = vmatpush1.bf16.msra.mxu0 %v10753_v1  ;;  %6830 = vmatpush1.bf16.msra.mxu1 %v10756_v2  ;;  %v10848_v1 = vld [vmem:[#allocation12 + $0x6c] ss:$16 sps:$4 sm:$0xff]   ;;  %v10843_v2 = vld [vmem:[#allocation12 + $0x60] ss:$16 sps:$4 sm:$0xff]  }
 0x493   :  { %6745 = vmatprep.subr.bf16.mxu0 %v10761_v3  ;;  %6831 = vmatprep.subr.bf16.mxu1 %v10764_v4  ;;  %v10851_v3 = vld [vmem:[#allocation12 + $0x84] ss:$16 sps:$4 sm:$0xff]   ;;  %v10854_v4 = vld [vmem:[#allocation12 + $0x8c] ss:$16 sps:$4 sm:$0xff]  }
 0x496   :  { %6746 = vmatpush1.bf16.msra.mxu0 %v10759_v5  ;;  %6832 = vmatpush1.bf16.msra.mxu1 %v10762_v6  ;;  %v10849_v5 = vld [vmem:[#allocation12 + $0x80] ss:$16 sps:$4 sm:$0xff]   ;;  %v10852_v6 = vld [vmem:[#allocation12 + $0x88] ss:$16 sps:$4 sm:$0xff]  }
 0x497   :  { %6747 = vmatprep.subr.bf16.mxu0 %v10767_v7  ;;  %6833 = vmatprep.subr.bf16.mxu1 %v10770_v8  ;;  %v10857_v7 = vld [vmem:[#allocation12 + $0xa4] ss:$16 sps:$4 sm:$0xff]   ;;  %v10860_v8 = vld [vmem:[#allocation12 + $0xac] ss:$16 sps:$4 sm:$0xff]  }
 0x49a   :  { %6748 = vmatpush1.bf16.msra.mxu0 %v10765_v9  ;;  %6834 = vmatpush1.bf16.msra.mxu1 %v10768_v10  ;;  %v10855_v9 = vld [vmem:[#allocation12 + $0xa0] ss:$16 sps:$4 sm:$0xff]   ;;  %v10858_v10 = vld [vmem:[#allocation12 + $0xa8] ss:$16 sps:$4 sm:$0xff]  }
 0x49b   :  { %6749 = vmatprep.subr.bf16.mxu0 %v10773_v11  ;;  %6835 = vmatprep.subr.bf16.mxu1 %v10776_v14  ;;  %v10863_v11 = vld [vmem:[#allocation12 + $0xc4] ss:$16 sps:$4 sm:$0xff]   ;;  %v10866_v14 = vld [vmem:[#allocation12 + $0xcc] ss:$16 sps:$4 sm:$0xff]  }
 0x49e   :  { %6750 = vmatpush1.bf16.msra.mxu0 %v10771_v17  ;;  %6836 = vmatpush1.bf16.msra.mxu1 %v10774_v18  ;;  %v10861_v17 = vld [vmem:[#allocation12 + $0xc0] ss:$16 sps:$4 sm:$0xff]   ;;  %v10864_v18 = vld [vmem:[#allocation12 + $0xc8] ss:$16 sps:$4 sm:$0xff]  }
 0x49f   :  { %6751 = vmatprep.subr.bf16.mxu0 %v10779_v19  ;;  %6837 = vmatprep.subr.bf16.mxu1 %v10782_v20  ;;  %v10869_v19 = vld [vmem:[#allocation12 + $0xe4] ss:$16 sps:$4 sm:$0xff]   ;;  %v10872_v20 = vld [vmem:[#allocation12 + $0xec] ss:$16 sps:$4 sm:$0xff]  }
 0x4a2   :  { %6752 = vmatpush1.bf16.msra.mxu0 %v10777_v21  ;;  %6838 = vmatpush1.bf16.msra.mxu1 %v10780_v22  ;;  %v10867_v21 = vld [vmem:[#allocation12 + $0xe0] ss:$16 sps:$4 sm:$0xff]   ;;  %v10870_v22 = vld [vmem:[#allocation12 + $0xe8] ss:$16 sps:$4 sm:$0xff]  }
 0x4a3   :  { %6753 = vmatprep.subr.bf16.mxu0 %v10785_v23  ;;  %6839 = vmatprep.subr.bf16.mxu1 %v10788_v24  ;;  %v10875_v23 = vld [vmem:[#allocation12 + $0x104] ss:$16 sps:$4 sm:$0xff]   ;;  %v10878_v24 = vld [vmem:[#allocation12 + $0x10c] ss:$16 sps:$4 sm:$0xff]  }
 0x4a6   :  { %6754 = vmatpush1.bf16.msra.mxu0 %v10783_v25  ;;  %6840 = vmatpush1.bf16.msra.mxu1 %v10786_v26  ;;  %v10873_v25 = vld [vmem:[#allocation12 + $0x100] ss:$16 sps:$4 sm:$0xff]   ;;  %v10876_v26 = vld [vmem:[#allocation12 + $0x108] ss:$16 sps:$4 sm:$0xff]  }
 0x4a7   :  { %6755 = vmatprep.subr.bf16.mxu0 %v10791_v27  ;;  %6841 = vmatprep.subr.bf16.mxu1 %v10794_v28  ;;  %v10881_v27 = vld [vmem:[#allocation12 + $0x124] ss:$16 sps:$4 sm:$0xff]   ;;  %v10884_v28 = vld [vmem:[#allocation12 + $0x12c] ss:$16 sps:$4 sm:$0xff]  }
 0x4aa   :  { %6756 = vmatpush1.bf16.msra.mxu0 %v10789_v29  ;;  %6842 = vmatpush1.bf16.msra.mxu1 %v10792_v30  ;;  %v10879_v29 = vld [vmem:[#allocation12 + $0x120] ss:$16 sps:$4 sm:$0xff]   ;;  %v10882_v30 = vld [vmem:[#allocation12 + $0x128] ss:$16 sps:$4 sm:$0xff]  }
 0x4ab   :  { %6757 = vmatprep.subr.bf16.mxu0 %v10797_v31  ;;  %6843 = vmatprep.subr.bf16.mxu1 %v10800_v32  ;;  %v10887_v31 = vld [vmem:[#allocation12 + $0x144] ss:$16 sps:$4 sm:$0xff]   ;;  %v10890_v32 = vld [vmem:[#allocation12 + $0x14c] ss:$16 sps:$4 sm:$0xff]  }
 0x4ae   :  { %6758 = vmatpush1.bf16.msra.mxu0 %v10795_v33  ;;  %6844 = vmatpush1.bf16.msra.mxu1 %v10798_v34  ;;  %v10885_v33 = vld [vmem:[#allocation12 + $0x140] ss:$16 sps:$4 sm:$0xff]   ;;  %v10888_v34 = vld [vmem:[#allocation12 + $0x148] ss:$16 sps:$4 sm:$0xff]  }
 0x4af   :  { %6759 = vmatprep.subr.bf16.mxu0 %v10803_v35  ;;  %6845 = vmatprep.subr.bf16.mxu1 %v10806_v36  ;;  %v10893_v35 = vld [vmem:[#allocation12 + $0x164] ss:$16 sps:$4 sm:$0xff]   ;;  %v10896_v36 = vld [vmem:[#allocation12 + $0x16c] ss:$16 sps:$4 sm:$0xff]  }
 0x4b2   :  { %6760 = vmatpush1.bf16.msra.mxu0 %v10801_v37  ;;  %6846 = vmatpush1.bf16.msra.mxu1 %v10804_v38  ;;  %v10891_v37 = vld [vmem:[#allocation12 + $0x160] ss:$16 sps:$4 sm:$0xff]   ;;  %v10894_v38 = vld [vmem:[#allocation12 + $0x168] ss:$16 sps:$4 sm:$0xff]  }
 0x4b3   :  { %6761 = vmatprep.subr.bf16.mxu0 %v10809_v39  ;;  %6847 = vmatprep.subr.bf16.mxu1 %v10812_v40  ;;  %v10899_v39 = vld [vmem:[#allocation12 + $0x184] ss:$16 sps:$4 sm:$0xff]   ;;  %v10902_v40 = vld [vmem:[#allocation12 + $0x18c] ss:$16 sps:$4 sm:$0xff]  }
 0x4b6   :  { %6762 = vmatpush1.bf16.msra.mxu0 %v10807_v41  ;;  %6848 = vmatpush1.bf16.msra.mxu1 %v10810_v42  ;;  %v10897_v41 = vld [vmem:[#allocation12 + $0x180] ss:$16 sps:$4 sm:$0xff]   ;;  %v10900_v42 = vld [vmem:[#allocation12 + $0x188] ss:$16 sps:$4 sm:$0xff]  }
 0x4b7   :  { %6763 = vmatprep.subr.bf16.mxu0 %v10815_v43  ;;  %6849 = vmatprep.subr.bf16.mxu1 %v10818_v44  ;;  %v10905_v43 = vld [vmem:[#allocation12 + $0x1a4] ss:$16 sps:$4 sm:$0xff]   ;;  %v10908_v44 = vld [vmem:[#allocation12 + $0x1ac] ss:$16 sps:$4 sm:$0xff]  }
 0x4ba   :  { %6764 = vmatpush1.bf16.msra.mxu0 %v10813_v45  ;;  %6850 = vmatpush1.bf16.msra.mxu1 %v10816_v47  ;;  %v10903_v45 = vld [vmem:[#allocation12 + $0x1a0] ss:$16 sps:$4 sm:$0xff]   ;;  %v10906_v47 = vld [vmem:[#allocation12 + $0x1a8] ss:$16 sps:$4 sm:$0xff]  }
 0x4bb   :  { %6765 = vmatprep.subr.bf16.mxu0 %v10821_v48  ;;  %6851 = vmatprep.subr.bf16.mxu1 %v10824_v49  ;;  %v10911_v48 = vld [vmem:[#allocation12 + $0x1c4] ss:$16 sps:$4 sm:$0xff]   ;;  %v10914_v49 = vld [vmem:[#allocation12 + $0x1cc] ss:$16 sps:$4 sm:$0xff]  }
 0x4be   :  { %6766 = vmatpush1.bf16.msra.mxu0 %v10819_v50  ;;  %6852 = vmatpush1.bf16.msra.mxu1 %v10822_v51  ;;  %v10909_v50 = vld [vmem:[#allocation12 + $0x1c0] ss:$16 sps:$4 sm:$0xff]   ;;  %v10912_v51 = vld [vmem:[#allocation12 + $0x1c8] ss:$16 sps:$4 sm:$0xff]  }
 0x4bf   :  { %7674 = vmatprep.subr.bf16.mxu0 %v10827_v52  ;;  %7760 = vmatprep.subr.bf16.mxu1 %v10830_v53  ;;  %v10917_v52 = vld [vmem:[#allocation12 + $0x1e4] ss:$16 sps:$4 sm:$0xff]   ;;  %v10920_v53 = vld [vmem:[#allocation12 + $0x1ec] ss:$16 sps:$4 sm:$0xff]  }
 0x4c1   :  { %6768 = vmatmul.mubr.bf16.vlgmr.msra.gmra.mrb[4].mxu0 %v11478_v46  ;;  %6854 = vmatmul.mubr.bf16.vlgmr.msra.gmra.mrb[4].mxu1 %v11478_v46  ;;  %v10846_v46 = vld [vmem:[#allocation12 + $0x68] ss:$16 sps:$4 sm:$0xff]  }
 0x4c2   :  { %7675 = vmatpush1.bf16.msra.mxu0 %v10825_v54  ;;  %7761 = vmatpush1.bf16.msra.mxu1 %v10828_v55  ;;  %v10915_v54 = vld [vmem:[#allocation12 + $0x1e0] ss:$16 sps:$4 sm:$0xff]   ;;  %v10918_v55 = vld [vmem:[#allocation12 + $0x1e8] ss:$16 sps:$4 sm:$0xff]  }
 0x4c3   :  { %7676 = vmatprep.subr.bf16.mxu0 %v10833_v56  ;;  %7762 = vmatprep.subr.bf16.mxu1 %v10836_v57  ;;  %v10923_v56 = vld [vmem:[#allocation12 + $0x204] ss:$16 sps:$4 sm:$0xff]   ;;  %v10926_v57 = vld [vmem:[#allocation12 + $0x20c] ss:$16 sps:$4 sm:$0xff]  }
 0x4c6   :  { %7677 = vmatpush1.bf16.msra.mxu0 %v10831_v58  ;;  %7763 = vmatpush1.bf16.msra.mxu1 %v10834_v59  ;;  %v6030_v58 = vld [vmem:[#allocation11] sm:$0xf] }
 0x4c7   :  { %7678 = vmatprep.subr.bf16.mxu0 %v10839_v60  ;;  %7764 = vmatprep.subr.bf16.mxu1 %v10842_v61  ;;  %v6035_v59 = vrot.slane %v6030_v58, %v11466_v12  ;;  %v6043_v60 = vrot.slane %v6030_v58, %v11468_v13  ;;  %v6039_v61 = vrot.slane %v6030_v58, %v11470_v15 }
 0x4ca   :  { %7679 = vmatpush1.bf16.msra.mxu0 %v10837_v62  ;;  %7765 = vmatpush1.bf16.msra.mxu1 %v10840_v63  ;;  %v6047_v62 = vrot.slane %v6030_v58, %v11472_v16  ;;  %v10968_v58 = vld [vmem:[#allocation12 + $0x2ec] ss:$16 sps:$4 sm:$0xff]  }
 0x4cb   :  { %7680 = vmatprep.subr.bf16.mxu0 %v10845_v0  ;;  %7766 = vmatprep.subr.bf16.mxu1 %v10848_v1 }
 0x4ce   :  { %7681 = vmatpush1.bf16.msra.mxu0 %v10843_v2  ;;  %7767 = vmatpush1.bf16.msra.mxu1 %v10846_v46 }
 0x4cf   :  { %7682 = vmatprep.subr.bf16.mxu0 %v10851_v3  ;;  %7768 = vmatprep.subr.bf16.mxu1 %v10854_v4 }
 0x4d2   :  { %7683 = vmatpush1.bf16.msra.mxu0 %v10849_v5  ;;  %7769 = vmatpush1.bf16.msra.mxu1 %v10852_v6 }
 0x4d3   :  { %7684 = vmatprep.subr.bf16.mxu0 %v10857_v7  ;;  %7770 = vmatprep.subr.bf16.mxu1 %v10860_v8 }
 0x4d6   :  { %7685 = vmatpush1.bf16.msra.mxu0 %v10855_v9  ;;  %7771 = vmatpush1.bf16.msra.mxu1 %v10858_v10 }
 0x4d7   :  { %7686 = vmatprep.subr.bf16.mxu0 %v10863_v11  ;;  %7772 = vmatprep.subr.bf16.mxu1 %v10866_v14 }
 0x4da   :  { %7687 = vmatpush1.bf16.msra.mxu0 %v10861_v17  ;;  %7773 = vmatpush1.bf16.msra.mxu1 %v10864_v18 }
 0x4db   :  { %7688 = vmatprep.subr.bf16.mxu0 %v10869_v19  ;;  %7774 = vmatprep.subr.bf16.mxu1 %v10872_v20 }
 0x4de   :  { %7689 = vmatpush1.bf16.msra.mxu0 %v10867_v21  ;;  %7775 = vmatpush1.bf16.msra.mxu1 %v10870_v22 }
 0x4df   :  { %7690 = vmatprep.subr.bf16.mxu0 %v10875_v23  ;;  %7776 = vmatprep.subr.bf16.mxu1 %v10878_v24 }
 0x4e2   :  { %7691 = vmatpush1.bf16.msra.mxu0 %v10873_v25  ;;  %7777 = vmatpush1.bf16.msra.mxu1 %v10876_v26 }
 0x4e3   :  { %7692 = vmatprep.subr.bf16.mxu0 %v10881_v27  ;;  %7778 = vmatprep.subr.bf16.mxu1 %v10884_v28 }
 0x4e6   :  { %7693 = vmatpush1.bf16.msra.mxu0 %v10879_v29  ;;  %7779 = vmatpush1.bf16.msra.mxu1 %v10882_v30  ;;  %v10921_v30 = vld [vmem:[#allocation12 + $0x200] ss:$16 sps:$4 sm:$0xff]  }
 0x4e7   :  { %7694 = vmatprep.subr.bf16.mxu0 %v10887_v31  ;;  %7780 = vmatprep.subr.bf16.mxu1 %v10890_v32  ;;  %v10924_v31 = vld [vmem:[#allocation12 + $0x208] ss:$16 sps:$4 sm:$0xff]   ;;  %v10929_v32 = vld [vmem:[#allocation12 + $0x224] ss:$16 sps:$4 sm:$0xff]  }
 0x4ea   :  { %7695 = vmatpush1.bf16.msra.mxu0 %v10885_v33  ;;  %7781 = vmatpush1.bf16.msra.mxu1 %v10888_v34  ;;  %v10932_v33 = vld [vmem:[#allocation12 + $0x22c] ss:$16 sps:$4 sm:$0xff]   ;;  %v10927_v34 = vld [vmem:[#allocation12 + $0x220] ss:$16 sps:$4 sm:$0xff]  }
 0x4eb   :  { %7696 = vmatprep.subr.bf16.mxu0 %v10893_v35  ;;  %7782 = vmatprep.subr.bf16.mxu1 %v10896_v36  ;;  %v10930_v35 = vld [vmem:[#allocation12 + $0x228] ss:$16 sps:$4 sm:$0xff]   ;;  %v10935_v36 = vld [vmem:[#allocation12 + $0x244] ss:$16 sps:$4 sm:$0xff]  }
 0x4ee   :  { %7697 = vmatpush1.bf16.msra.mxu0 %v10891_v37  ;;  %7783 = vmatpush1.bf16.msra.mxu1 %v10894_v38  ;;  %v10938_v37 = vld [vmem:[#allocation12 + $0x24c] ss:$16 sps:$4 sm:$0xff]   ;;  %v10933_v38 = vld [vmem:[#allocation12 + $0x240] ss:$16 sps:$4 sm:$0xff]  }
 0x4ef   :  { %7698 = vmatprep.subr.bf16.mxu0 %v10899_v39  ;;  %7784 = vmatprep.subr.bf16.mxu1 %v10902_v40  ;;  %v10936_v39 = vld [vmem:[#allocation12 + $0x248] ss:$16 sps:$4 sm:$0xff]   ;;  %v10941_v40 = vld [vmem:[#allocation12 + $0x264] ss:$16 sps:$4 sm:$0xff]  }
 0x4f2   :  { %7699 = vmatpush1.bf16.msra.mxu0 %v10897_v41  ;;  %7785 = vmatpush1.bf16.msra.mxu1 %v10900_v42  ;;  %v10944_v41 = vld [vmem:[#allocation12 + $0x26c] ss:$16 sps:$4 sm:$0xff]   ;;  %v10939_v42 = vld [vmem:[#allocation12 + $0x260] ss:$16 sps:$4 sm:$0xff]  }
 0x4f3   :  { %7700 = vmatprep.subr.bf16.mxu0 %v10905_v43  ;;  %7786 = vmatprep.subr.bf16.mxu1 %v10908_v44  ;;  %v10942_v43 = vld [vmem:[#allocation12 + $0x268] ss:$16 sps:$4 sm:$0xff]   ;;  %v10947_v44 = vld [vmem:[#allocation12 + $0x284] ss:$16 sps:$4 sm:$0xff]  }
 0x4f6   :  { %7701 = vmatpush1.bf16.msra.mxu0 %v10903_v45  ;;  %7787 = vmatpush1.bf16.msra.mxu1 %v10906_v47  ;;  %v10950_v45 = vld [vmem:[#allocation12 + $0x28c] ss:$16 sps:$4 sm:$0xff]   ;;  %v10945_v47 = vld [vmem:[#allocation12 + $0x280] ss:$16 sps:$4 sm:$0xff]  }
 0x4f7   :  { %7702 = vmatprep.subr.bf16.mxu0 %v10911_v48  ;;  %7788 = vmatprep.subr.bf16.mxu1 %v10914_v49  ;;  %v10948_v48 = vld [vmem:[#allocation12 + $0x288] ss:$16 sps:$4 sm:$0xff]   ;;  %v10953_v49 = vld [vmem:[#allocation12 + $0x2a4] ss:$16 sps:$4 sm:$0xff]  }
 0x4fa   :  { %7703 = vmatpush1.bf16.msra.mxu0 %v10909_v50  ;;  %7789 = vmatpush1.bf16.msra.mxu1 %v10912_v51  ;;  %v10956_v50 = vld [vmem:[#allocation12 + $0x2ac] ss:$16 sps:$4 sm:$0xff]   ;;  %v10951_v51 = vld [vmem:[#allocation12 + $0x2a0] ss:$16 sps:$4 sm:$0xff]  }
 0x4fb   :  { %7704 = vmatprep.subr.bf16.mxu0 %v10917_v52  ;;  %7790 = vmatprep.subr.bf16.mxu1 %v10920_v53  ;;  %v10954_v52 = vld [vmem:[#allocation12 + $0x2a8] ss:$16 sps:$4 sm:$0xff]   ;;  %v10959_v53 = vld [vmem:[#allocation12 + $0x2c4] ss:$16 sps:$4 sm:$0xff]  }
 0x4fe   :  { %7705 = vmatpush1.bf16.msra.mxu0 %v10915_v54  ;;  %7791 = vmatpush1.bf16.msra.mxu1 %v10918_v55  ;;  %v10962_v54 = vld [vmem:[#allocation12 + $0x2cc] ss:$16 sps:$4 sm:$0xff]   ;;  %v10957_v55 = vld [vmem:[#allocation12 + $0x2c0] ss:$16 sps:$4 sm:$0xff]  }
 0x4ff   :  { %7717 = vmatprep.subr.bf16.mxu0 %v10923_v56  ;;  %7803 = vmatprep.subr.bf16.mxu1 %v10926_v57  ;;  %v10960_v56 = vld [vmem:[#allocation12 + $0x2c8] ss:$16 sps:$4 sm:$0xff]   ;;  %v10965_v57 = vld [vmem:[#allocation12 + $0x2e4] ss:$16 sps:$4 sm:$0xff]  }
 0x594   :  { %v6769_v63 = vpop.f32.mrb[4].mxu0  ;;  %v6855_v0 = vpop.f32.mrb[4].mxu1 }
 0x595   :  { %v9343_v1 = vadd.f32 %v6769_v63, %v6035_v59  ;;  %v9347_v2 = vadd.f32 %v6855_v0, %v6043_v60  ;;  %v6771_v46 = vpop.f32.mrb[5].mxu0  ;;  %v6857_v3 = vpop.f32.mrb[5].mxu1  ;;  %v10969_v63 = vld [vmem:[#allocation12 + $0x300] ss:$16 sps:$4 sm:$0xff]   ;;  %v10972_v0 = vld [vmem:[#allocation12 + $0x308] ss:$16 sps:$4 sm:$0xff]  }
 0x596   :  { %v9344_v4 = vadd.f32 %v6771_v46, %v6039_v61  ;;  %v9348_v5 = vadd.f32 %v6857_v3, %v6047_v62  ;;  %v6773_v6 = vpop.f32.mrb[6].mxu0  ;;  %v6859_v7 = vpop.f32.mrb[6].mxu1  ;;  %v10975_v46 = vld [vmem:[#allocation12 + $0x320] ss:$16 sps:$4 sm:$0xff]   ;;  %v10978_v3 = vld [vmem:[#allocation12 + $0x328] ss:$16 sps:$4 sm:$0xff]  }
 0x597   :  { %v9345_v8 = vadd.f32 %v6773_v6, %v6035_v59  ;;  %v9349_v9 = vadd.f32 %v6859_v7, %v6043_v60  ;;  %v6775_v10 = vpop.f32.mrb[7].mxu0  ;;  %v6861_v11 = vpop.f32.mrb[7].mxu1  ;;  %v6864_v18 = vmax.f32 %v9343_v1, 0.0  ;;  %v6866_v19 = vmax.f32 %v9347_v2, 0.0  ;;  %v10963_v59 = vld [vmem:[#allocation12 + $0x2e0] ss:$16 sps:$4 sm:$0xff]  }
 0x598   :  { %v9346_v14 = vadd.f32 %v6775_v10, %v6039_v61  ;;  %v9350_v17 = vadd.f32 %v6861_v11, %v6047_v62  ;;  %v6865_v22 = vmax.f32 %v9344_v4, 0.0  ;;  %v6867_v23 = vmax.f32 %v9348_v5, 0.0  ;;  %v10966_v60 = vld [vmem:[#allocation12 + $0x2e8] ss:$16 sps:$4 sm:$0xff]   ;;  %v10971_v61 = vld [vmem:[#allocation12 + $0x304] ss:$16 sps:$4 sm:$0xff]  }
 0x599   :  { %v6868_v20 = vmax.f32 %v9345_v8, 0.0  ;;  %v6870_v21 = vmax.f32 %v9349_v9, 0.0  ;;  %v10974_v62 = vld [vmem:[#allocation12 + $0x30c] ss:$16 sps:$4 sm:$0xff]   ;;  %v10977_v1 = vld [vmem:[#allocation12 + $0x324] ss:$16 sps:$4 sm:$0xff]  }
 0x59a   :  { %v6869_v24 = vmax.f32 %v9346_v14, 0.0  ;;  %v6871_v25 = vmax.f32 %v9350_v17, 0.0  ;;  %v10980_v2 = vld [vmem:[#allocation12 + $0x32c] ss:$16 sps:$4 sm:$0xff]   ;;  %v10983_v4 = vld [vmem:[#allocation12 + $0x344] ss:$16 sps:$4 sm:$0xff]  }
 0x59b   :  { %v6872_v26 = vpack.c.bf16 %v6868_v20, %v6864_v18  ;;  %v11486_v27 = vpack.c.bf16 %v6870_v21, %v6866_v19  ;;  %v10986_v5 = vld [vmem:[#allocation12 + $0x34c] ss:$16 sps:$4 sm:$0xff]   ;;  %v10981_v6 = vld [vmem:[#allocation12 + $0x340] ss:$16 sps:$4 sm:$0xff]   ;;  %v10984_v7 = vld [vmem:[#allocation12 + $0x348] ss:$16 sps:$4 sm:$0xff]  }
 0x59c   :  { %v6873_v28 = vpack.c.bf16 %v6869_v24, %v6865_v22  ;;  %v6875_v29 = vpack.c.bf16 %v6871_v25, %v6867_v23  ;;  %v10989_v8 = vld [vmem:[#allocation12 + $0x364] ss:$16 sps:$4 sm:$0xff]   ;;  %v10992_v9 = vld [vmem:[#allocation12 + $0x36c] ss:$16 sps:$4 sm:$0xff]   ;;  %v10987_v10 = vld [vmem:[#allocation12 + $0x360] ss:$16 sps:$4 sm:$0xff]  }
 0x59d   :  { %v10990_v11 = vld [vmem:[#allocation12 + $0x368] ss:$16 sps:$4 sm:$0xff]   ;;  %v10995_v14 = vld [vmem:[#allocation12 + $0x384] ss:$16 sps:$4 sm:$0xff]   ;;  %v10998_v17 = vld [vmem:[#allocation12 + $0x38c] ss:$16 sps:$4 sm:$0xff]  }
 0x59e   :  { %7706 = vmatprep.mubr.bf16.mxu0 %v6873_v28  ;;  %7792 = vmatprep.mubr.bf16.mxu1 %v6873_v28  ;;  %v10993_v18 = vld [vmem:[#allocation12 + $0x380] ss:$16 sps:$4 sm:$0xff]   ;;  %v10996_v19 = vld [vmem:[#allocation12 + $0x388] ss:$16 sps:$4 sm:$0xff]   ;;  %v11001_v20 = vld [vmem:[#allocation12 + $0x3a4] ss:$16 sps:$4 sm:$0xff]  }
 0x59f   :  { %7707 = vmatmul.mubr.bf16.vlgmr.msra.gmra.mrb[8].mxu0 %v6872_v26  ;;  %7793 = vmatmul.mubr.bf16.vlgmr.msra.gmra.mrb[8].mxu1 %v6872_v26  ;;  %v11004_v21 = vld [vmem:[#allocation12 + $0x3ac] ss:$16 sps:$4 sm:$0xff]   ;;  %v10999_v22 = vld [vmem:[#allocation12 + $0x3a0] ss:$16 sps:$4 sm:$0xff]   ;;  %v11002_v23 = vld [vmem:[#allocation12 + $0x3a8] ss:$16 sps:$4 sm:$0xff]  }
 0x5a0   :  { %7718 = vmatpush1.bf16.msra.mxu0 %v10921_v30  ;;  %7804 = vmatpush1.bf16.msra.mxu1 %v10924_v31  ;;  %v11007_v24 = vld [vmem:[#allocation12 + $0x3c4] ss:$16 sps:$4 sm:$0xff]   ;;  %v11010_v25 = vld [vmem:[#allocation12 + $0x3cc] ss:$16 sps:$4 sm:$0xff]   ;;  %v11005_v26 = vld [vmem:[#allocation12 + $0x3c0] ss:$16 sps:$4 sm:$0xff]  }
 0x5a1   :  { %7749 = vmatprep.mubr.bf16.mxu0 %v6875_v29  ;;  %7835 = vmatprep.mubr.bf16.mxu1 %v6875_v29  ;;  %v11008_v28 = vld [vmem:[#allocation12 + $0x3c8] ss:$16 sps:$4 sm:$0xff]   ;;  %v11013_v29 = vld [vmem:[#allocation12 + $0x3e4] ss:$16 sps:$4 sm:$0xff]   ;;  %v11016_v30 = vld [vmem:[#allocation12 + $0x3ec] ss:$16 sps:$4 sm:$0xff]  }
 0x5a2   :  { %7719 = vmatprep.subr.bf16.mxu0 %v10929_v32  ;;  %7805 = vmatprep.subr.bf16.mxu1 %v10932_v33  ;;  %v11011_v31 = vld [vmem:[#allocation12 + $0x3e0] ss:$16 sps:$4 sm:$0xff]   ;;  %v11014_v32 = vld [vmem:[#allocation12 + $0x3e8] ss:$16 sps:$4 sm:$0xff]  }
 0x5a3   :  { %v11017_v33 = vld [vmem:[#allocation15 + $0x40] sm:$0xff]  }
 0x5a4   :  { %7720 = vmatpush1.bf16.msra.mxu0 %v10927_v34  ;;  %7806 = vmatpush1.bf16.msra.mxu1 %v10930_v35  ;;  %v11018_v34 = vld [vmem:[#allocation15 + $0xc0] sm:$0xff]  }
 0x5a5   :  { %7721 = vmatprep.subr.bf16.mxu0 %v10935_v36  ;;  %7807 = vmatprep.subr.bf16.mxu1 %v10938_v37  ;;  %v11019_v35 = vld [vmem:[#allocation15] sm:$0xff]   ;;  %v11021_v37 = vld [vmem:[#allocation15 + $0x48] sm:$0xff]  }
 0x5a6   :  { %v11020_v36 = vld [vmem:[#allocation15 + $0x80] sm:$0xff]  }
 0x5a8   :  { %7722 = vmatpush1.bf16.msra.mxu0 %v10933_v38  ;;  %7808 = vmatpush1.bf16.msra.mxu1 %v10936_v39  ;;  %v11022_v38 = vld [vmem:[#allocation15 + $0xc8] sm:$0xff]  }
 0x5a9   :  { %7723 = vmatprep.subr.bf16.mxu0 %v10941_v40  ;;  %7809 = vmatprep.subr.bf16.mxu1 %v10944_v41  ;;  %v11023_v39 = vld [vmem:[#allocation15 + $0x8] sm:$0xff]   ;;  %v11025_v41 = vld [vmem:[#allocation15 + $0x50] sm:$0xff]  }
 0x5aa   :  { %v11024_v40 = vld [vmem:[#allocation15 + $0x88] sm:$0xff]  }
 0x5ac   :  { %7724 = vmatpush1.bf16.msra.mxu0 %v10939_v42  ;;  %7810 = vmatpush1.bf16.msra.mxu1 %v10942_v43  ;;  %v11026_v42 = vld [vmem:[#allocation15 + $0xd0] sm:$0xff]  }
 0x5ad   :  { %7725 = vmatprep.subr.bf16.mxu0 %v10947_v44  ;;  %7811 = vmatprep.subr.bf16.mxu1 %v10950_v45  ;;  %v11027_v43 = vld [vmem:[#allocation15 + $0x10] sm:$0xff]   ;;  %v11029_v45 = vld [vmem:[#allocation15 + $0x58] sm:$0xff]  }
 0x5ae   :  { %v11028_v44 = vld [vmem:[#allocation15 + $0x90] sm:$0xff]  }
 0x5b0   :  { %7726 = vmatpush1.bf16.msra.mxu0 %v10945_v47  ;;  %7812 = vmatpush1.bf16.msra.mxu1 %v10948_v48  ;;  %v11030_v47 = vld [vmem:[#allocation15 + $0xd8] sm:$0xff]  }
 0x5b1   :  { %7727 = vmatprep.subr.bf16.mxu0 %v10953_v49  ;;  %7813 = vmatprep.subr.bf16.mxu1 %v10956_v50  ;;  %v11031_v48 = vld [vmem:[#allocation15 + $0x18] sm:$0xff]   ;;  %v11033_v49 = vld [vmem:[#allocation15 + $0x60] sm:$0xff]  }
 0x5b2   :  { %v11034_v50 = vld [vmem:[#allocation15 + $0xe0] sm:$0xff]  }
 0x5b4   :  { %7728 = vmatpush1.bf16.msra.mxu0 %v10951_v51  ;;  %7814 = vmatpush1.bf16.msra.mxu1 %v10954_v52  ;;  %v11035_v51 = vld [vmem:[#allocation15 + $0x20] sm:$0xff]  }
 0x5b5   :  { %7729 = vmatprep.subr.bf16.mxu0 %v10959_v53  ;;  %7815 = vmatprep.subr.bf16.mxu1 %v10962_v54  ;;  %v11036_v52 = vld [vmem:[#allocation15 + $0xa0] sm:$0xff]   ;;  %v11037_v53 = vld [vmem:[#allocation15 + $0x68] sm:$0xff]  }
 0x5b6   :  { %v11038_v54 = vld [vmem:[#allocation15 + $0xe8] sm:$0xff]  }
 0x5b8   :  { %7730 = vmatpush1.bf16.msra.mxu0 %v10957_v55  ;;  %7816 = vmatpush1.bf16.msra.mxu1 %v10960_v56  ;;  %v11039_v55 = vld [vmem:[#allocation15 + $0x28] sm:$0xff]  }
 0x5b9   :  { %7731 = vmatprep.subr.bf16.mxu0 %v10965_v57  ;;  %7817 = vmatprep.subr.bf16.mxu1 %v10968_v58  ;;  %v11040_v56 = vld [vmem:[#allocation15 + $0xa8] sm:$0xff]   ;;  %v11041_v57 = vld [vmem:[#allocation15 + $0x70] sm:$0xff]  }
 0x5ba   :  { %v11042_v58 = vld [vmem:[#allocation15 + $0xf0] sm:$0xff]  }
 0x5bc   :  { %7732 = vmatpush1.bf16.msra.mxu0 %v10963_v59  ;;  %7818 = vmatpush1.bf16.msra.mxu1 %v10966_v60  ;;  %v11043_v59 = vld [vmem:[#allocation15 + $0x30] sm:$0xff]  }
 0x5bd   :  { %7733 = vmatprep.subr.bf16.mxu0 %v10971_v61  ;;  %7819 = vmatprep.subr.bf16.mxu1 %v10974_v62  ;;  %v11044_v60 = vld [vmem:[#allocation15 + $0xb0] sm:$0xff]   ;;  %v11045_v61 = vld [vmem:[#allocation15 + $0x78] sm:$0xff]  }
 0x5be   :  { %v11046_v62 = vld [vmem:[#allocation15 + $0xf8] sm:$0xff]  }
 0x5c0   :  { %7734 = vmatpush1.bf16.msra.mxu0 %v10969_v63  ;;  %7820 = vmatpush1.bf16.msra.mxu1 %v10972_v0  ;;  %v11047_v63 = vld [vmem:[#allocation15 + $0x38] sm:$0xff]  }
 0x5c1   :  { %7735 = vmatprep.subr.bf16.mxu0 %v10977_v1  ;;  %7821 = vmatprep.subr.bf16.mxu1 %v10980_v2  ;;  %v11048_v0 = vld [vmem:[#allocation15 + $0xb8] sm:$0xff]  }
 0x5c2   :  { %v7012_v1 = vld [vmem:[#allocation14] sm:$0xf] }
 0x5c3   :  { %v7017_v2 = vrot.slane %v7012_v1, %v11466_v12 }
 0x5c4   :  { %7736 = vmatpush1.bf16.msra.mxu0 %v10975_v46  ;;  %7822 = vmatpush1.bf16.msra.mxu1 %v10978_v3  ;;  %v7025_v46 = vrot.slane %v7012_v1, %v11468_v13  ;;  %v7021_v3 = vrot.slane %v7012_v1, %v11470_v15 }
 0x5c5   :  { %7737 = vmatprep.subr.bf16.mxu0 %v10983_v4  ;;  %7823 = vmatprep.subr.bf16.mxu1 %v10986_v5  ;;  %v7029_v4 = vrot.slane %v7012_v1, %v11472_v16 }
 0x5c8   :  { %7738 = vmatpush1.bf16.msra.mxu0 %v10981_v6  ;;  %7824 = vmatpush1.bf16.msra.mxu1 %v10984_v7 }
 0x5c9   :  { %7739 = vmatprep.subr.bf16.mxu0 %v10989_v8  ;;  %7825 = vmatprep.subr.bf16.mxu1 %v10992_v9 }
 0x5cc   :  { %7740 = vmatpush1.bf16.msra.mxu0 %v10987_v10  ;;  %7826 = vmatpush1.bf16.msra.mxu1 %v10990_v11 }
 0x5cd   :  { %7741 = vmatprep.subr.bf16.mxu0 %v10995_v14  ;;  %7827 = vmatprep.subr.bf16.mxu1 %v10998_v17 }
 0x5d0   :  { %7742 = vmatpush1.bf16.msra.mxu0 %v10993_v18  ;;  %7828 = vmatpush1.bf16.msra.mxu1 %v10996_v19 }
 0x5d1   :  { %7743 = vmatprep.subr.bf16.mxu0 %v11001_v20  ;;  %7829 = vmatprep.subr.bf16.mxu1 %v11004_v21 }
 0x5d4   :  { %7744 = vmatpush1.bf16.msra.mxu0 %v10999_v22  ;;  %7830 = vmatpush1.bf16.msra.mxu1 %v11002_v23 }
 0x5d5   :  { %7745 = vmatprep.subr.bf16.mxu0 %v11007_v24  ;;  %7831 = vmatprep.subr.bf16.mxu1 %v11010_v25 }
 0x5d8   :  { %7746 = vmatpush1.bf16.msra.mxu0 %v11005_v26  ;;  %7832 = vmatpush1.bf16.msra.mxu1 %v11008_v28 }
 0x5d9   :  { %7747 = vmatprep.subr.bf16.mxu0 %v11013_v29  ;;  %7833 = vmatprep.subr.bf16.mxu1 %v11016_v30 }
 0x5dc   :  { %7748 = vmatpush1.bf16.msra.mxu0 %v11011_v31  ;;  %7834 = vmatpush1.bf16.msra.mxu1 %v11014_v32 }
 0x5dd   :  { %9291 = vmatprep.subr.bf16.mxu0 %v11017_v33  ;;  %9313 = vmatprep.subr.bf16.mxu1 %v11018_v34 }
 0x5df   :  { %7750 = vmatmul.mubr.bf16.vlgmr.msra.gmra.mrb[8].mxu0 %v11486_v27  ;;  %7836 = vmatmul.mubr.bf16.vlgmr.msra.gmra.mrb[8].mxu1 %v11486_v27  ;;  %v11032_v27 = vld [vmem:[#allocation15 + $0x98] sm:$0xff]  }
 0x5e0   :  { %9292 = vmatpush3.bf16.msra.mxu0 %v11019_v35  ;;  %9314 = vmatpush3.bf16.msra.mxu1 %v11020_v36  ;;  %v9258_v36 = vld [vmem:[#allocation17] ss:$0 sm:$0xff] }
 0x5e1   :  { %9293 = vmatprep.subr.bf16.mxu0 %v11021_v37  ;;  %9315 = vmatprep.subr.bf16.mxu1 %v11022_v38 }
 0x5e4   :  { %9294 = vmatpush3.bf16.msra.mxu0 %v11023_v39  ;;  %9316 = vmatpush3.bf16.msra.mxu1 %v11024_v40 }
 0x5e5   :  { %9295 = vmatprep.subr.bf16.mxu0 %v11025_v41  ;;  %9317 = vmatprep.subr.bf16.mxu1 %v11026_v42 }
 0x5e8   :  { %9296 = vmatpush3.bf16.msra.mxu0 %v11027_v43  ;;  %9318 = vmatpush3.bf16.msra.mxu1 %v11028_v44 }
 0x5e9   :  { %9297 = vmatprep.subr.bf16.mxu0 %v11029_v45  ;;  %9319 = vmatprep.subr.bf16.mxu1 %v11030_v47 }
 0x5ec   :  { %9298 = vmatpush3.bf16.msra.mxu0 %v11031_v48  ;;  %9320 = vmatpush3.bf16.msra.mxu1 %v11032_v27 }
 0x5ed   :  { %9299 = vmatprep.subr.bf16.mxu0 %v11033_v49  ;;  %9321 = vmatprep.subr.bf16.mxu1 %v11034_v50 }
 0x5f0   :  { %9300 = vmatpush3.bf16.msra.mxu0 %v11035_v51  ;;  %9322 = vmatpush3.bf16.msra.mxu1 %v11036_v52 }
 0x5f1   :  { %9301 = vmatprep.subr.bf16.mxu0 %v11037_v53  ;;  %9323 = vmatprep.subr.bf16.mxu1 %v11038_v54 }
 0x5f4   :  { %9302 = vmatpush3.bf16.msra.mxu0 %v11039_v55  ;;  %9324 = vmatpush3.bf16.msra.mxu1 %v11040_v56 }
 0x5f5   :  { %9303 = vmatprep.subr.bf16.mxu0 %v11041_v57  ;;  %9325 = vmatprep.subr.bf16.mxu1 %v11042_v58 }
 0x5f8   :  { %9304 = vmatpush3.bf16.msra.mxu0 %v11043_v59  ;;  %9326 = vmatpush3.bf16.msra.mxu1 %v11044_v60 }
 0x5f9   :  { %9305 = vmatprep.subr.bf16.mxu0 %v11045_v61  ;;  %9327 = vmatprep.subr.bf16.mxu1 %v11046_v62 }
 0x5fc   :  { %9306 = vmatpush3.bf16.msra.mxu0 %v11047_v63  ;;  %9328 = vmatpush3.bf16.msra.mxu1 %v11048_v0 }
 0x6b2   :  { %v7751_v5 = vpop.f32.mrb[8].mxu0  ;;  %v7837_v6 = vpop.f32.mrb[8].mxu1 }
 0x6b3   :  { %v9351_v7 = vadd.f32 %v7751_v5, %v7017_v2  ;;  %v9355_v8 = vadd.f32 %v7837_v6, %v7025_v46  ;;  %v7753_v9 = vpop.f32.mrb[9].mxu0  ;;  %v7839_v10 = vpop.f32.mrb[9].mxu1 }
 0x6b4   :  { %v9352_v11 = vadd.f32 %v7753_v9, %v7021_v3  ;;  %v9356_v14 = vadd.f32 %v7839_v10, %v7029_v4  ;;  %v7755_v17 = vpop.f32.mrb[10].mxu0  ;;  %v7841_v18 = vpop.f32.mrb[10].mxu1 }
 0x6b5   :  { %v9353_v19 = vadd.f32 %v7755_v17, %v7017_v2  ;;  %v9357_v20 = vadd.f32 %v7841_v18, %v7025_v46  ;;  %v7757_v21 = vpop.f32.mrb[11].mxu0  ;;  %v7843_v12 = vpop.f32.mrb[11].mxu1  ;;  %v7846_v23 = vmax.f32 %v9351_v7, 0.0  ;;  %v7848_v15 = vmax.f32 %v9355_v8, 0.0 }
 0x6b6   :  { %v9354_v22 = vadd.f32 %v7757_v21, %v7021_v3  ;;  %v9358_v13 = vadd.f32 %v7843_v12, %v7029_v4  ;;  %v7847_v25 = vmax.f32 %v9352_v11, 0.0  ;;  %v7849_v26 = vmax.f32 %v9356_v14, 0.0 }
 0x6b7   :  { %v7850_v24 = vmax.f32 %v9353_v19, 0.0  ;;  %v7852_v16 = vmax.f32 %v9357_v20, 0.0 }
 0x6b8   :  { %v7851_v28 = vmax.f32 %v9354_v22, 0.0  ;;  %v7853_v29 = vmax.f32 %v9358_v13, 0.0 }
 0x6b9   :  { %v7854_v30 = vpack.c.bf16 %v7850_v24, %v7846_v23  ;;  %v7856_v31 = vpack.c.bf16 %v7852_v16, %v7848_v15 }
 0x6ba   :  { %v7855_v32 = vpack.c.bf16 %v7851_v28, %v7847_v25  ;;  %v7857_v33 = vpack.c.bf16 %v7853_v29, %v7849_v26 }
 0x6bc   :  { %8161 = vmatprep.mubr.bf16.mxu0 %v7855_v32  ;;  %8202 = vmatprep.mubr.bf16.mxu1 %v7857_v33 }
 0x6bd   :  { %8162 = vmatmul.mubr.bf16.vlgmr.msra.gmra.mrb[12].mxu0 %v7854_v30  ;;  %8203 = vmatmul.mubr.bf16.vlgmr.msra.gmra.mrb[12].mxu1 %v7856_v31 }
 0x790   :  { %v9307_v34 = vpop.f32.mrb[12].mxu0  ;;  %v9329_v35 = vpop.f32.mrb[12].mxu1 }
 0x791   :  { %v9308_v37 = vpop.f32.mrb[13].mxu0  ;;  %v9330_v38 = vpop.f32.mrb[13].mxu1 }
 0x792   :  { %v9309_v39 = vadd.f32 %v9308_v37, %v9307_v34  ;;  %v9331_v40 = vadd.f32 %v9330_v38, %v9329_v35  ;;  %v9310_v41 = vpop.f32.mrb[14].mxu0  ;;  %v9332_v42 = vpop.f32.mrb[14].mxu1 }
 0x793   :  { %v9311_v43 = vpop.f32.mrb[15].mxu0  ;;  %v9333_v44 = vpop.f32.mrb[15].mxu1 }
 0x794   :  { %v8164_v45 = vadd.f32 %v9309_v39, %v9258_v36  ;;  %v9312_v47 = vadd.f32 %v9311_v43, %v9310_v41  ;;  %v9334_v48 = vadd.f32 %v9333_v44, %v9332_v42 }
 0x796   :  { %v8205_v27 = vadd.f32 %v9331_v40, %v8164_v45  ;;  %v8167_v49 = vadd.f32 %v9312_v47, %v9258_v36 }
 0x798   :  { %8211 = vst [vmem:[#allocation18] sm:$0xff] %v8205_v27  ;;  %v8208_v50 = vadd.f32 %v9334_v48, %v8167_v49 }
 0x79a   :  { %8212 = vst [vmem:[#allocation18 + $0x8] sm:$0xff] %v8208_v50 }
 0x79b   :  { %11258 = shalt.err (!%p11255_p6)
}
 0x79c   :  { %s11259_s27 = scalar_lea.hbm %s11515_s9, 256 }
 0x79d   :  { %p11260_p7 = scmp.ne.s32.totalorder %s11515_s9, %s11259_s27  ;;  %p11263_p8 = scmp.lt.u32.totalorder %s11259_s27, %s11515_s9 }
 0x79f   :  { %p11265_p9 = pnand %p11263_p8, %p11260_p7 }
 0x7a1   :  { %11268 = shalt.err (!%p11265_p9)
}
 0x7a2   :  { %s11297_s12 = smov 128   ;;  %s11298_s1 = smov 8  }
 0x7a3   :  { %8224 = dma.vmem_to_hbm [thread:$0]  %s8219_s3, 256, %s11515_s9, [#allocation5], %s11297_s12, %s11297_s12, %s11298_s1  }
 0x7a4   :  { %11279 = dma.done.wait [#allocation5], 256  }
 0x7a5   :  { %11280 = vsyncadd [#allocation5], 4294967040 }
 0x7a6   :  { %8228 = vsyncpa [#allocation4], 1 }
 0x7a7   :  { %8229 = vsyncpa [#allocation7], 1 }
 0x7a8   :  { %8230 = vsyncpa [#allocation10], 1 }
 0x7a9   :  { %8231 = vsyncpa [#allocation13], 1 }
 0x7aa   :  { %8232 = vsyncpa [#allocation16], 1 }
 0x7ab   :  { %8233 = vsyncpa [#allocation5], 1 }

</bundles_post_ra>
